<compile_context>
chip_gen: v5e
topology: v5e:2x2
jax: 0.10.0
libtpu: 0.0.40
codegen_flags: <defaults>
</compile_context>

<pallas_src>
import jax
import jax.numpy as jnp
from jax import lax
from jax.experimental import pallas as pl
from jax.experimental.pallas import tpu as pltpu

EPS = 1e-5
VMEM_LIMIT_BYTES = 32 * 1024 * 1024       # > v5e 16MiB default, <= v7x 32MiB default


# --------------------------------------------------------------------------- kernels
def _pad_and_patches(h1, pad_ref):
    """Write replicate ('edge') padding of h1 into the halo'd VMEM scratch and return
    the (HW, 9P) matrix of 3x3 patches (9 shifted views concatenated along lanes)."""
    hp2, wp2, p = pad_ref.shape
    h, w = hp2 - 2, wp2 - 2
    hw = h * w
    h1 = h1.reshape(h, w, p)
    pad_ref[1:h + 1, 1:w + 1, :] = h1
    pad_ref[0:1, 1:w + 1, :] = h1[0:1, :, :]
    pad_ref[h + 1:h + 2, 1:w + 1, :] = h1[h - 1:h, :, :]
    pad_ref[:, 0:1, :] = pad_ref[:, 1:2, :]              # left col (corners for free)
    pad_ref[:, w + 1:w + 2, :] = pad_ref[:, w:w + 1, :]  # right col
    taps = []
    for ky in range(3):
        for kx in range(3):
            taps.append(pad_ref[ky:ky + h, kx:kx + w, :].reshape(hw, p))
    return jnp.concatenate(taps, axis=-1)                # (HW, 9P)


def _stats_kernel(x_ref, w1_ref, psum_ref, pgram_ref, pad_ref):
    """Pass 1 (one image per grid step): conv1 -> replicate-pad -> 3x3 patch matrix;
    accumulate its per-column sums and Gram.  Every BN batch statistic of the block
    is derived from these two small resident accumulators in the wrapper."""
    @pl.when(pl.program_id(0) == 0)
    def _():
        psum_ref[...] = jnp.zeros_like(psum_ref)
        pgram_ref[...] = jnp.zeros_like(pgram_ref)

    h1 = jnp.dot(x_ref[0], w1_ref[...], preferred_element_type=jnp.float32)
    patches = _pad_and_patches(h1, pad_ref)
    psum_ref[0:1, :] = psum_ref[0:1, :] + jnp.sum(patches, axis=0, keepdims=True)
    pgram_ref[...] = pgram_ref[...] + lax.dot_general(
        patches, patches, (((0,), (0,)), ((), ())),
        preferred_element_type=jnp.float32)


def _fused_out_kernel(x_ref, w1_ref, w2s_ref, w3s_ref, sc3_ref, sh3_ref,
                      o_ref, pad_ref):
    """Pass 2 (one image per grid step): conv1 -> replicate-pad -> 3x3 conv as ONE
    (HW,9P)x(9P,P) MXU matmul (bn1/bn2 scales pre-folded into w2s/w3s) -> conv3
    -> bn3 scale/shift -> relu -> channel-padded residual add -> store."""
    cin = x_ref.shape[-1]
    hw = x_ref.shape[1]
    cout = o_ref.shape[-1]

    x_img = x_ref[0]                                                      # (HW, Cin)
    h1 = jnp.dot(x_img, w1_ref[...], preferred_element_type=jnp.float32)  # conv1
    patches = _pad_and_patches(h1, pad_ref)
    h2 = jnp.dot(patches, w2s_ref[...], preferred_element_type=jnp.float32)   # conv2
    h3 = jnp.dot(h2, w3s_ref[...], preferred_element_type=jnp.float32)        # conv3
    out = jnp.maximum(h3 * sc3_ref[...] + sh3_ref[...], 0.0)              # bn3+relu
    if cin == cout:
        out = out + x_img
    else:  # shortcut = x zero-padded along channels
        out = out + jnp.concatenate(
            [x_img, jnp.zeros((hw, cout - cin), jnp.float32)], axis=-1)
    o_ref[0] = out


# --------------------------------------------------------------------------- wrapper
@jax.jit
def bottleneck_tppi(x_nchw, params):
    """PyTorch-layout (NCHW in/out) wrapper around the NHWC / lane-dense kernels."""
    n, cin, h, w = x_nchw.shape
    p = params["w1"].shape[1]
    cout = params["w3"].shape[1]
    assert cin <= cout, "Bottleneck_TPPI shortcut assumes Cin <= Cout"
    hw = h * w
    nhw = n * hw
    r = float(nhw)

    x3d = jnp.transpose(x_nchw, (0, 2, 3, 1)).astype(jnp.float32).reshape(n, hw, cin)

    acc_params = pltpu.CompilerParams(dimension_semantics=("arbitrary",),
                                      vmem_limit_bytes=VMEM_LIMIT_BYTES)
    par_params = pltpu.CompilerParams(dimension_semantics=("parallel",),
                                      vmem_limit_bytes=VMEM_LIMIT_BYTES)

    # ------- pass 1: column sums + Gram of the 3x3 patch matrix of conv1(x) ---------
    psum, pgram = pl.pallas_call(
        _stats_kernel,
        out_shape=(jax.ShapeDtypeStruct((8, 9 * p), jnp.float32),
                   jax.ShapeDtypeStruct((9 * p, 9 * p), jnp.float32)),
        grid_spec=pltpu.PrefetchScalarGridSpec(
            num_scalar_prefetch=0, grid=(n,),
            in_specs=[pl.BlockSpec((1, hw, cin), lambda i: (i, 0, 0)),
                      pl.BlockSpec((cin, p), lambda i: (0, 0))],
            out_specs=[pl.BlockSpec((8, 9 * p), lambda i: (0, 0)),
                       pl.BlockSpec((9 * p, 9 * p), lambda i: (0, 0))],
            scratch_shapes=[pltpu.VMEM((h + 2, w + 2, p), jnp.float32)]),
        compiler_params=acc_params,
        cost_estimate=pl.CostEstimate(
            flops=2 * nhw * (cin * p + 81 * p * p), transcendentals=0,
            bytes_accessed=4 * (nhw * cin + cin * p + 72 * p + 81 * p * p)),
    )(x3d, params["w1"])

    # bn1 batch stats = centre-tap block of the patch statistics (its shift, and the
    # conv biases, are per-channel constants removed exactly by the next train-mode BN)
    c0 = 4 * p
    sum1 = psum[0, c0:c0 + p]
    sumsq1 = jnp.diagonal(pgram)[c0:c0 + p]
    mean1 = sum1 / r
    var1 = jnp.maximum(sumsq1 / r - mean1 * mean1, 0.0)
    scale1 = params["g1"] * lax.rsqrt(var1 + EPS)
    w2s = jnp.tile(scale1, 9)[:, None] * params["w2"]           # bn1 scale folded in

    # bn2 batch stats of h2 = patches @ w2s, straight from the patch sums / Gram
    s2 = psum[0] @ w2s
    g2 = w2s.T @ (pgram @ w2s)
    mean2 = s2 / r
    var2 = jnp.maximum(jnp.diagonal(g2) / r - mean2 * mean2, 0.0)
    scale2 = params["g2"] * lax.rsqrt(var2 + EPS)
    w3s = scale2[:, None] * params["w3"]                        # bn2 scale folded in

    # bn3 batch stats of h3 = h2 @ w3s (bn2's shift is a constant -> cancels in bn3)
    sum3 = s2 @ w3s
    sumsq3 = jnp.einsum("jc,jk,kc->c", w3s, g2, w3s)
    mean3 = sum3 / r
    var3 = jnp.maximum(sumsq3 / r - mean3 * mean3, 0.0)
    scale3 = params["g3"] * lax.rsqrt(var3 + EPS)
    shift3 = params["be3"] - mean3 * scale3

    # ------- pass 2: fused conv1 -> 3x3 conv -> conv3 -> bn3 -> relu -> residual ----
    out3d = pl.pallas_call(
        _fused_out_kernel,
        out_shape=jax.ShapeDtypeStruct((n, hw, cout), jnp.float32),
        grid_spec=pltpu.PrefetchScalarGridSpec(
            num_scalar_prefetch=0, grid=(n,),
            in_specs=[pl.BlockSpec((1, hw, cin), lambda i: (i, 0, 0)),
                      pl.BlockSpec((cin, p), lambda i: (0, 0)),
                      pl.BlockSpec((9 * p, p), lambda i: (0, 0)),
                      pl.BlockSpec((p, cout), lambda i: (0, 0)),
                      pl.BlockSpec((1, cout), lambda i: (0, 0)),
                      pl.BlockSpec((1, cout), lambda i: (0, 0))],
            out_specs=pl.BlockSpec((1, hw, cout), lambda i: (i, 0, 0)),
            scratch_shapes=[pltpu.VMEM((h + 2, w + 2, p), jnp.float32)]),
        compiler_params=par_params,
        cost_estimate=pl.CostEstimate(
            flops=2 * nhw * (cin * p + 9 * p * p + p * cout), transcendentals=0,
            bytes_accessed=4 * (nhw * (cin + cout) + cin * p + 9 * p * p
                                + p * cout + 2 * cout)),
    )(x3d, params["w1"], w2s, w3s, scale3.reshape(1, cout), shift3.reshape(1, cout))

    return jnp.transpose(out3d.reshape(n, h, w, cout), (0, 3, 1, 2))


# ------------------------------------------------------------------------- reference
def _reference(x_nchw, params, w2_hwio, b1, b2, b3):
    """Plain-JAX reference with training-mode BN, INCLUDING conv biases (which must
    cancel exactly inside the batch norms — the kernels omit them)."""
    x = jnp.transpose(x_nchw, (0, 2, 3, 1))
    n, h, w, cin = x.shape
    p = params["w1"].shape[1]
    cout = params["w3"].shape[1]
    nhw = n * h * w

    def bn(a, g, b):
        mean = jnp.mean(a, axis=0)
        var = jnp.mean((a - mean) ** 2, axis=0)
        return (a - mean) * lax.rsqrt(var + EPS) * g + b

    xf = x.reshape(nhw, cin)
    h1 = bn(xf @ params["w1"] + b1, params["g1"], params["be1"])
    t = jnp.pad(h1.reshape(n, h, w, p), ((0, 0), (1, 1), (1, 1), (0, 0)), mode="edge")
    c2 = lax.conv_general_dilated(t, w2_hwio, (1, 1), "VALID",
                                  dimension_numbers=("NHWC", "HWIO", "NHWC"))
    h2 = bn(c2.reshape(nhw, p) + b2, params["g2"], params["be2"])
    h3 = bn(h2 @ params["w3"] + b3, params["g3"], params["be3"])
    out = jnp.maximum(h3, 0.0)
    if cin != cout:
        short = jnp.concatenate([xf, jnp.zeros((nhw, cout - cin), xf.dtype)], axis=-1)
    else:
        short = xf
    return jnp.transpose((out + short).reshape(n, h, w, cout), (0, 3, 1, 2))


if __name__ == "__main__":
    # Small shapes consistent with the module: inplanes=4, planes=8 -> out channels 32
    N, Cin, H, W = 2, 4, 16, 16
    P = 8
    Cout = P * 4  # Bottleneck_TPPP.outchannel_ratio = 4

    key = jax.random.PRNGKey(0)
    ks = jax.random.split(key, 13)

    x = jax.random.normal(ks[0], (N, Cin, H, W), jnp.float32)
    w2_hwio = 0.1 * jax.random.normal(ks[1], (3, 3, P, P), jnp.float32)

    params = {
        "w1": 0.1 * jax.random.normal(ks[2], (Cin, P), jnp.float32),
        "g1": 1.0 + 0.1 * jax.random.normal(ks[3], (P,), jnp.float32),
        "be1": 0.1 * jax.random.normal(ks[4], (P,), jnp.float32),
        "w2": w2_hwio.reshape(9 * P, P),   # row (ky*3+kx)*P + cin  ->  cout
        "g2": 1.0 + 0.1 * jax.random.normal(ks[5], (P,), jnp.float32),
        "be2": 0.1 * jax.random.normal(ks[6], (P,), jnp.float32),
        "w3": 0.1 * jax.random.normal(ks[7], (P, Cout), jnp.float32),
        "g3": 1.0 + 0.1 * jax.random.normal(ks[8], (Cout,), jnp.float32),
        "be3": 0.1 * jax.random.normal(ks[9], (Cout,), jnp.float32),
    }
    # conv biases: used only by the reference (they cancel exactly in training-mode BN)
    b1 = 0.1 * jax.random.normal(ks[10], (P,), jnp.float32)
    b2 = 0.1 * jax.random.normal(ks[11], (P,), jnp.float32)
    b3 = 0.1 * jax.random.normal(ks[12], (Cout,), jnp.float32)

    out = jax.block_until_ready(bottleneck_tppi(x, params))
    ref = jax.block_until_ready(_reference(x, params, w2_hwio, b1, b2, b3))

    assert out.shape == (N, Cout, H, W), out.shape
    assert jnp.allclose(out, ref, atol=3e-2, rtol=3e-2), \
        float(jnp.max(jnp.abs(out - ref)))
    print("KERNEL_OK")
</pallas_src>

<mosaic_0001>
module attributes {stable_mosaic.version = 11 : i64} {
  func.func @_stats_kernel(%arg0: i32, %arg1: memref<1x256x4xf32, #tpu.memory_space<vmem>>, %arg2: memref<4x8xf32, #tpu.memory_space<vmem>>, %arg3: memref<8x72xf32, #tpu.memory_space<vmem>>, %arg4: memref<72x72xf32, #tpu.memory_space<vmem>>, %arg5: memref<18x18x8xf32, #tpu.memory_space<vmem>>) attributes {dimension_semantics = [#tpu.dimension_semantics<arbitrary>], iteration_bounds = array<i64: 2>, scalar_prefetch = 0 : i64, scratch_operands = 1 : i64, tpu.core_type = #tpu.core_type<tc>, window_params = [{transform_indices = @transform_0, window_bounds = array<i64: 1, 256, 4>}, {pipeline_mode = #tpu.pipeline_mode<synchronous>, transform_indices = @transform_1, window_bounds = array<i64: 4, 8>}, {pipeline_mode = #tpu.pipeline_mode<synchronous>, transform_indices = @transform_2, window_bounds = array<i64: 8, 72>}, {pipeline_mode = #tpu.pipeline_mode<synchronous>, transform_indices = @transform_3, window_bounds = array<i64: 72, 72>}]} {
    %c0_i32 = arith.constant 0 : i32
    %0 = arith.cmpi eq, %arg0, %c0_i32 : i32
    %1 = arith.extui %0 : i1 to i32
    %c0_i32_0 = arith.constant 0 : i32
    %2 = arith.cmpi ne, %1, %c0_i32_0 : i32
    scf.if %2 {
      %cst_59 = arith.constant 0.000000e+00 : f32
      %45 = vector.broadcast %cst_59 : f32 to vector<8x72xf32>
      %c0_60 = arith.constant 0 : index
      %c0_61 = arith.constant 0 : index
      %46 = vector.load %arg3[%c0_60, %c0_61] : memref<8x72xf32, #tpu.memory_space<vmem>>, vector<8x72xf32>
      tpu.vector_store %arg3[%c0_60, %c0_61], %45 {strides = array<i32>} : memref<8x72xf32, #tpu.memory_space<vmem>>, vector<8x72xf32>,
      %cst_62 = arith.constant 0.000000e+00 : f32
      %47 = vector.broadcast %cst_62 : f32 to vector<72x72xf32>
      %c0_63 = arith.constant 0 : index
      %c0_64 = arith.constant 0 : index
      %48 = vector.load %arg4[%c0_63, %c0_64] : memref<72x72xf32, #tpu.memory_space<vmem>>, vector<72x72xf32>
      tpu.vector_store %arg4[%c0_63, %c0_64], %47 {strides = array<i32>} : memref<72x72xf32, #tpu.memory_space<vmem>>, vector<72x72xf32>,
    } else {
    }
    %c0 = arith.constant 0 : index
    %c0_1 = arith.constant 0 : index
    %c0_2 = arith.constant 0 : index
    %3 = vector.load %arg1[%c0, %c0_1, %c0_2] : memref<1x256x4xf32, #tpu.memory_space<vmem>>, vector<1x256x4xf32>
    %4 = vector.shape_cast %3 : vector<1x256x4xf32> to vector<256x4xf32>
    %c0_3 = arith.constant 0 : index
    %c0_4 = arith.constant 0 : index
    %5 = vector.load %arg2[%c0_3, %c0_4] : memref<4x8xf32, #tpu.memory_space<vmem>>, vector<4x8xf32>
    %cst = arith.constant dense<0.000000e+00> : vector<256x8xf32>
    %6 = tpu.matmul %4, %5, %cst {dimension_numbers = #tpu.dot_dimension_numbers<[1], [0], [0], [1], [0, 0, 1, 1], [], []>} : vector<256x4xf32>, vector<4x8xf32>, vector<256x8xf32> -> vector<256x8xf32>
    %7 = vector.shape_cast %6 : vector<256x8xf32> to vector<16x16x8xf32>
    %c1 = arith.constant 1 : index
    %c1_5 = arith.constant 1 : index
    %c0_6 = arith.constant 0 : index
    %8 = vector.load %arg5[%c1, %c1_5, %c0_6] : memref<18x18x8xf32, #tpu.memory_space<vmem>>, vector<16x16x8xf32>
    tpu.vector_store %arg5[%c1, %c1_5, %c0_6], %7 {strides = array<i32>} : memref<18x18x8xf32, #tpu.memory_space<vmem>>, vector<16x16x8xf32>,
    %9 = vector.extract_strided_slice %7 {offsets = [0, 0, 0], sizes = [1, 16, 8], strides = [1, 1, 1]} : vector<16x16x8xf32> to vector<1x16x8xf32>
    %c0_7 = arith.constant 0 : index
    %c1_8 = arith.constant 1 : index
    %c0_9 = arith.constant 0 : index
    %10 = vector.load %arg5[%c0_7, %c1_8, %c0_9] : memref<18x18x8xf32, #tpu.memory_space<vmem>>, vector<1x16x8xf32>
    tpu.vector_store %arg5[%c0_7, %c1_8, %c0_9], %9 {strides = array<i32>} : memref<18x18x8xf32, #tpu.memory_space<vmem>>, vector<1x16x8xf32>,
    %11 = vector.extract_strided_slice %7 {offsets = [15, 0, 0], sizes = [1, 16, 8], strides = [1, 1, 1]} : vector<16x16x8xf32> to vector<1x16x8xf32>
    %c17 = arith.constant 17 : index
    %c1_10 = arith.constant 1 : index
    %c0_11 = arith.constant 0 : index
    %12 = vector.load %arg5[%c17, %c1_10, %c0_11] : memref<18x18x8xf32, #tpu.memory_space<vmem>>, vector<1x16x8xf32>
    tpu.vector_store %arg5[%c17, %c1_10, %c0_11], %11 {strides = array<i32>} : memref<18x18x8xf32, #tpu.memory_space<vmem>>, vector<1x16x8xf32>,
    %c0_12 = arith.constant 0 : index
    %c1_13 = arith.constant 1 : index
    %c0_14 = arith.constant 0 : index
    %13 = vector.load %arg5[%c0_12, %c1_13, %c0_14] : memref<18x18x8xf32, #tpu.memory_space<vmem>>, vector<18x1x8xf32>
    %c0_15 = arith.constant 0 : index
    %c0_16 = arith.constant 0 : index
    %c0_17 = arith.constant 0 : index
    %14 = vector.load %arg5[%c0_15, %c0_16, %c0_17] : memref<18x18x8xf32, #tpu.memory_space<vmem>>, vector<18x1x8xf32>
    tpu.vector_store %arg5[%c0_15, %c0_16, %c0_17], %13 {strides = array<i32>} : memref<18x18x8xf32, #tpu.memory_space<vmem>>, vector<18x1x8xf32>,
    %c0_18 = arith.constant 0 : index
    %c16 = arith.constant 16 : index
    %c0_19 = arith.constant 0 : index
    %15 = vector.load %arg5[%c0_18, %c16, %c0_19] : memref<18x18x8xf32, #tpu.memory_space<vmem>>, vector<18x1x8xf32>
    %c0_20 = arith.constant 0 : index
    %c17_21 = arith.constant 17 : index
    %c0_22 = arith.constant 0 : index
    %16 = vector.load %arg5[%c0_20, %c17_21, %c0_22] : memref<18x18x8xf32, #tpu.memory_space<vmem>>, vector<18x1x8xf32>
    tpu.vector_store %arg5[%c0_20, %c17_21, %c0_22], %15 {strides = array<i32>} : memref<18x18x8xf32, #tpu.memory_space<vmem>>, vector<18x1x8xf32>,
    %c0_23 = arith.constant 0 : index
    %c0_24 = arith.constant 0 : index
    %c0_25 = arith.constant 0 : index
    %17 = vector.load %arg5[%c0_23, %c0_24, %c0_25] : memref<18x18x8xf32, #tpu.memory_space<vmem>>, vector<16x16x8xf32>
    %18 = vector.shape_cast %17 : vector<16x16x8xf32> to vector<256x8xf32>
    %c0_26 = arith.constant 0 : index
    %c1_27 = arith.constant 1 : index
    %c0_28 = arith.constant 0 : index
    %19 = vector.load %arg5[%c0_26, %c1_27, %c0_28] : memref<18x18x8xf32, #tpu.memory_space<vmem>>, vector<16x16x8xf32>
    %20 = vector.shape_cast %19 : vector<16x16x8xf32> to vector<256x8xf32>
    %c0_29 = arith.constant 0 : index
    %c2 = arith.constant 2 : index
    %c0_30 = arith.constant 0 : index
    %21 = vector.load %arg5[%c0_29, %c2, %c0_30] : memref<18x18x8xf32, #tpu.memory_space<vmem>>, vector<16x16x8xf32>
    %22 = vector.shape_cast %21 : vector<16x16x8xf32> to vector<256x8xf32>
    %c1_31 = arith.constant 1 : index
    %c0_32 = arith.constant 0 : index
    %c0_33 = arith.constant 0 : index
    %23 = vector.load %arg5[%c1_31, %c0_32, %c0_33] : memref<18x18x8xf32, #tpu.memory_space<vmem>>, vector<16x16x8xf32>
    %24 = vector.shape_cast %23 : vector<16x16x8xf32> to vector<256x8xf32>
    %c1_34 = arith.constant 1 : index
    %c1_35 = arith.constant 1 : index
    %c0_36 = arith.constant 0 : index
    %25 = vector.load %arg5[%c1_34, %c1_35, %c0_36] : memref<18x18x8xf32, #tpu.memory_space<vmem>>, vector<16x16x8xf32>
    %26 = vector.shape_cast %25 : vector<16x16x8xf32> to vector<256x8xf32>
    %c1_37 = arith.constant 1 : index
    %c2_38 = arith.constant 2 : index
    %c0_39 = arith.constant 0 : index
    %27 = vector.load %arg5[%c1_37, %c2_38, %c0_39] : memref<18x18x8xf32, #tpu.memory_space<vmem>>, vector<16x16x8xf32>
    %28 = vector.shape_cast %27 : vector<16x16x8xf32> to vector<256x8xf32>
    %c2_40 = arith.constant 2 : index
    %c0_41 = arith.constant 0 : index
    %c0_42 = arith.constant 0 : index
    %29 = vector.load %arg5[%c2_40, %c0_41, %c0_42] : memref<18x18x8xf32, #tpu.memory_space<vmem>>, vector<16x16x8xf32>
    %30 = vector.shape_cast %29 : vector<16x16x8xf32> to vector<256x8xf32>
    %c2_43 = arith.constant 2 : index
    %c1_44 = arith.constant 1 : index
    %c0_45 = arith.constant 0 : index
    %31 = vector.load %arg5[%c2_43, %c1_44, %c0_45] : memref<18x18x8xf32, #tpu.memory_space<vmem>>, vector<16x16x8xf32>
    %32 = vector.shape_cast %31 : vector<16x16x8xf32> to vector<256x8xf32>
    %c2_46 = arith.constant 2 : index
    %c2_47 = arith.constant 2 : index
    %c0_48 = arith.constant 0 : index
    %33 = vector.load %arg5[%c2_46, %c2_47, %c0_48] : memref<18x18x8xf32, #tpu.memory_space<vmem>>, vector<16x16x8xf32>
    %34 = vector.shape_cast %33 : vector<16x16x8xf32> to vector<256x8xf32>
    %35 = tpu.concatenate %18, %20, %22, %24, %26, %28, %30, %32, %34 in 1 : vector<256x8xf32>, vector<256x8xf32>, vector<256x8xf32>, vector<256x8xf32>, vector<256x8xf32>, vector<256x8xf32>, vector<256x8xf32>, vector<256x8xf32>, vector<256x8xf32> -> vector<256x72xf32>
    %c0_49 = arith.constant 0 : index
    %c0_50 = arith.constant 0 : index
    %36 = vector.load %arg3[%c0_49, %c0_50] : memref<8x72xf32, #tpu.memory_space<vmem>>, vector<1x72xf32>
    %cst_51 = arith.constant dense<0.000000e+00> : vector<72xf32>
    %37 = vector.multi_reduction <add>, %35, %cst_51 [0] : vector<256x72xf32> to vector<72xf32>
    %38 = vector.shape_cast %37 : vector<72xf32> to vector<1x72xf32>
    %39 = arith.addf %36, %38 : vector<1x72xf32>
    %c0_52 = arith.constant 0 : index
    %c0_53 = arith.constant 0 : index
    %40 = vector.load %arg3[%c0_52, %c0_53] : memref<8x72xf32, #tpu.memory_space<vmem>>, vector<1x72xf32>
    tpu.vector_store %arg3[%c0_52, %c0_53], %39 {strides = array<i32>} : memref<8x72xf32, #tpu.memory_space<vmem>>, vector<1x72xf32>,
    %c0_54 = arith.constant 0 : index
    %c0_55 = arith.constant 0 : index
    %41 = vector.load %arg4[%c0_54, %c0_55] : memref<72x72xf32, #tpu.memory_space<vmem>>, vector<72x72xf32>
    %cst_56 = arith.constant dense<0.000000e+00> : vector<72x72xf32>
    %42 = tpu.matmul %35, %35, %cst_56 {dimension_numbers = #tpu.dot_dimension_numbers<[0], [0], [1], [1], [0, 1, 1, 1], [], []>} : vector<256x72xf32>, vector<256x72xf32>, vector<72x72xf32> -> vector<72x72xf32>
    %43 = arith.addf %41, %42 : vector<72x72xf32>
    %c0_57 = arith.constant 0 : index
    %c0_58 = arith.constant 0 : index
    %44 = vector.load %arg4[%c0_57, %c0_58] : memref<72x72xf32, #tpu.memory_space<vmem>>, vector<72x72xf32>
    tpu.vector_store %arg4[%c0_57, %c0_58], %43 {strides = array<i32>} : memref<72x72xf32, #tpu.memory_space<vmem>>, vector<72x72xf32>,
    return
  }
  func.func @transform_0(%arg0: i32) -> (i32, i32, i32) {
    %c0_i32 = arith.constant 0 : i32
    %c0_i32_0 = arith.constant 0 : i32
    %c0_i32_1 = arith.constant 0 : i32
    return %arg0, %c0_i32, %c0_i32_0 : i32, i32, i32
  }
  func.func @transform_1(%arg0: i32) -> (i32, i32) {
    %c0_i32 = arith.constant 0 : i32
    %c0_i32_0 = arith.constant 0 : i32
    %c0_i32_1 = arith.constant 0 : i32
    return %c0_i32, %c0_i32_0 : i32, i32
  }
  func.func @transform_2(%arg0: i32) -> (i32, i32) {
    %c0_i32 = arith.constant 0 : i32
    %c0_i32_0 = arith.constant 0 : i32
    %c0_i32_1 = arith.constant 0 : i32
    return %c0_i32, %c0_i32_0 : i32, i32
  }
  func.func @transform_3(%arg0: i32) -> (i32, i32) {
    %c0_i32 = arith.constant 0 : i32
    %c0_i32_0 = arith.constant 0 : i32
    %c0_i32_1 = arith.constant 0 : i32
    return %c0_i32, %c0_i32_0 : i32, i32
  }
}

module attributes {stable_mosaic.version = 11 : i64} {
  func.func @_fused_out_kernel(%arg0: i32, %arg1: memref<1x256x4xf32, #tpu.memory_space<vmem>>, %arg2: memref<4x8xf32, #tpu.memory_space<vmem>>, %arg3: memref<72x8xf32, #tpu.memory_space<vmem>>, %arg4: memref<8x32xf32, #tpu.memory_space<vmem>>, %arg5: memref<1x32xf32, #tpu.memory_space<vmem>>, %arg6: memref<1x32xf32, #tpu.memory_space<vmem>>, %arg7: memref<1x256x32xf32, #tpu.memory_space<vmem>>, %arg8: memref<18x18x8xf32, #tpu.memory_space<vmem>>) attributes {dimension_semantics = [#tpu.dimension_semantics<parallel>], iteration_bounds = array<i64: 2>, scalar_prefetch = 0 : i64, scratch_operands = 1 : i64, tpu.core_type = #tpu.core_type<tc>, window_params = [{transform_indices = @transform_0, window_bounds = array<i64: 1, 256, 4>}, {pipeline_mode = #tpu.pipeline_mode<synchronous>, transform_indices = @transform_1, window_bounds = array<i64: 4, 8>}, {pipeline_mode = #tpu.pipeline_mode<synchronous>, transform_indices = @transform_2, window_bounds = array<i64: 72, 8>}, {pipeline_mode = #tpu.pipeline_mode<synchronous>, transform_indices = @transform_3, window_bounds = array<i64: 8, 32>}, {pipeline_mode = #tpu.pipeline_mode<synchronous>, transform_indices = @transform_4, window_bounds = array<i64: 1, 32>}, {pipeline_mode = #tpu.pipeline_mode<synchronous>, transform_indices = @transform_5, window_bounds = array<i64: 1, 32>}, {transform_indices = @transform_6, window_bounds = array<i64: 1, 256, 32>}]} {
    %c0 = arith.constant 0 : index
    %c0_0 = arith.constant 0 : index
    %c0_1 = arith.constant 0 : index
    %0 = vector.load %arg1[%c0, %c0_0, %c0_1] : memref<1x256x4xf32, #tpu.memory_space<vmem>>, vector<1x256x4xf32>
    %1 = vector.shape_cast %0 : vector<1x256x4xf32> to vector<256x4xf32>
    %c0_2 = arith.constant 0 : index
    %c0_3 = arith.constant 0 : index
    %2 = vector.load %arg2[%c0_2, %c0_3] : memref<4x8xf32, #tpu.memory_space<vmem>>, vector<4x8xf32>
    %cst = arith.constant dense<0.000000e+00> : vector<256x8xf32>
    %3 = tpu.matmul %1, %2, %cst {dimension_numbers = #tpu.dot_dimension_numbers<[1], [0], [0], [1], [0, 0, 1, 1], [], []>} : vector<256x4xf32>, vector<4x8xf32>, vector<256x8xf32> -> vector<256x8xf32>
    %4 = vector.shape_cast %3 : vector<256x8xf32> to vector<16x16x8xf32>
    %c1 = arith.constant 1 : index
    %c1_4 = arith.constant 1 : index
    %c0_5 = arith.constant 0 : index
    %5 = vector.load %arg8[%c1, %c1_4, %c0_5] : memref<18x18x8xf32, #tpu.memory_space<vmem>>, vector<16x16x8xf32>
    tpu.vector_store %arg8[%c1, %c1_4, %c0_5], %4 {strides = array<i32>} : memref<18x18x8xf32, #tpu.memory_space<vmem>>, vector<16x16x8xf32>,
    %6 = vector.extract_strided_slice %4 {offsets = [0, 0, 0], sizes = [1, 16, 8], strides = [1, 1, 1]} : vector<16x16x8xf32> to vector<1x16x8xf32>
    %c0_6 = arith.constant 0 : index
    %c1_7 = arith.constant 1 : index
    %c0_8 = arith.constant 0 : index
    %7 = vector.load %arg8[%c0_6, %c1_7, %c0_8] : memref<18x18x8xf32, #tpu.memory_space<vmem>>, vector<1x16x8xf32>
    tpu.vector_store %arg8[%c0_6, %c1_7, %c0_8], %6 {strides = array<i32>} : memref<18x18x8xf32, #tpu.memory_space<vmem>>, vector<1x16x8xf32>,
    %8 = vector.extract_strided_slice %4 {offsets = [15, 0, 0], sizes = [1, 16, 8], strides = [1, 1, 1]} : vector<16x16x8xf32> to vector<1x16x8xf32>
    %c17 = arith.constant 17 : index
    %c1_9 = arith.constant 1 : index
    %c0_10 = arith.constant 0 : index
    %9 = vector.load %arg8[%c17, %c1_9, %c0_10] : memref<18x18x8xf32, #tpu.memory_space<vmem>>, vector<1x16x8xf32>
    tpu.vector_store %arg8[%c17, %c1_9, %c0_10], %8 {strides = array<i32>} : memref<18x18x8xf32, #tpu.memory_space<vmem>>, vector<1x16x8xf32>,
    %c0_11 = arith.constant 0 : index
    %c1_12 = arith.constant 1 : index
    %c0_13 = arith.constant 0 : index
    %10 = vector.load %arg8[%c0_11, %c1_12, %c0_13] : memref<18x18x8xf32, #tpu.memory_space<vmem>>, vector<18x1x8xf32>
    %c0_14 = arith.constant 0 : index
    %c0_15 = arith.constant 0 : index
    %c0_16 = arith.constant 0 : index
    %11 = vector.load %arg8[%c0_14, %c0_15, %c0_16] : memref<18x18x8xf32, #tpu.memory_space<vmem>>, vector<18x1x8xf32>
    tpu.vector_store %arg8[%c0_14, %c0_15, %c0_16], %10 {strides = array<i32>} : memref<18x18x8xf32, #tpu.memory_space<vmem>>, vector<18x1x8xf32>,
    %c0_17 = arith.constant 0 : index
    %c16 = arith.constant 16 : index
    %c0_18 = arith.constant 0 : index
    %12 = vector.load %arg8[%c0_17, %c16, %c0_18] : memref<18x18x8xf32, #tpu.memory_space<vmem>>, vector<18x1x8xf32>
    %c0_19 = arith.constant 0 : index
    %c17_20 = arith.constant 17 : index
    %c0_21 = arith.constant 0 : index
    %13 = vector.load %arg8[%c0_19, %c17_20, %c0_21] : memref<18x18x8xf32, #tpu.memory_space<vmem>>, vector<18x1x8xf32>
    tpu.vector_store %arg8[%c0_19, %c17_20, %c0_21], %12 {strides = array<i32>} : memref<18x18x8xf32, #tpu.memory_space<vmem>>, vector<18x1x8xf32>,
    %c0_22 = arith.constant 0 : index
    %c0_23 = arith.constant 0 : index
    %c0_24 = arith.constant 0 : index
    %14 = vector.load %arg8[%c0_22, %c0_23, %c0_24] : memref<18x18x8xf32, #tpu.memory_space<vmem>>, vector<16x16x8xf32>
    %15 = vector.shape_cast %14 : vector<16x16x8xf32> to vector<256x8xf32>
    %c0_25 = arith.constant 0 : index
    %c1_26 = arith.constant 1 : index
    %c0_27 = arith.constant 0 : index
    %16 = vector.load %arg8[%c0_25, %c1_26, %c0_27] : memref<18x18x8xf32, #tpu.memory_space<vmem>>, vector<16x16x8xf32>
    %17 = vector.shape_cast %16 : vector<16x16x8xf32> to vector<256x8xf32>
    %c0_28 = arith.constant 0 : index
    %c2 = arith.constant 2 : index
    %c0_29 = arith.constant 0 : index
    %18 = vector.load %arg8[%c0_28, %c2, %c0_29] : memref<18x18x8xf32, #tpu.memory_space<vmem>>, vector<16x16x8xf32>
    %19 = vector.shape_cast %18 : vector<16x16x8xf32> to vector<256x8xf32>
    %c1_30 = arith.constant 1 : index
    %c0_31 = arith.constant 0 : index
    %c0_32 = arith.constant 0 : index
    %20 = vector.load %arg8[%c1_30, %c0_31, %c0_32] : memref<18x18x8xf32, #tpu.memory_space<vmem>>, vector<16x16x8xf32>
    %21 = vector.shape_cast %20 : vector<16x16x8xf32> to vector<256x8xf32>
    %c1_33 = arith.constant 1 : index
    %c1_34 = arith.constant 1 : index
    %c0_35 = arith.constant 0 : index
    %22 = vector.load %arg8[%c1_33, %c1_34, %c0_35] : memref<18x18x8xf32, #tpu.memory_space<vmem>>, vector<16x16x8xf32>
    %23 = vector.shape_cast %22 : vector<16x16x8xf32> to vector<256x8xf32>
    %c1_36 = arith.constant 1 : index
    %c2_37 = arith.constant 2 : index
    %c0_38 = arith.constant 0 : index
    %24 = vector.load %arg8[%c1_36, %c2_37, %c0_38] : memref<18x18x8xf32, #tpu.memory_space<vmem>>, vector<16x16x8xf32>
    %25 = vector.shape_cast %24 : vector<16x16x8xf32> to vector<256x8xf32>
    %c2_39 = arith.constant 2 : index
    %c0_40 = arith.constant 0 : index
    %c0_41 = arith.constant 0 : index
    %26 = vector.load %arg8[%c2_39, %c0_40, %c0_41] : memref<18x18x8xf32, #tpu.memory_space<vmem>>, vector<16x16x8xf32>
    %27 = vector.shape_cast %26 : vector<16x16x8xf32> to vector<256x8xf32>
    %c2_42 = arith.constant 2 : index
    %c1_43 = arith.constant 1 : index
    %c0_44 = arith.constant 0 : index
    %28 = vector.load %arg8[%c2_42, %c1_43, %c0_44] : memref<18x18x8xf32, #tpu.memory_space<vmem>>, vector<16x16x8xf32>
    %29 = vector.shape_cast %28 : vector<16x16x8xf32> to vector<256x8xf32>
    %c2_45 = arith.constant 2 : index
    %c2_46 = arith.constant 2 : index
    %c0_47 = arith.constant 0 : index
    %30 = vector.load %arg8[%c2_45, %c2_46, %c0_47] : memref<18x18x8xf32, #tpu.memory_space<vmem>>, vector<16x16x8xf32>
    %31 = vector.shape_cast %30 : vector<16x16x8xf32> to vector<256x8xf32>
    %32 = tpu.concatenate %15, %17, %19, %21, %23, %25, %27, %29, %31 in 1 : vector<256x8xf32>, vector<256x8xf32>, vector<256x8xf32>, vector<256x8xf32>, vector<256x8xf32>, vector<256x8xf32>, vector<256x8xf32>, vector<256x8xf32>, vector<256x8xf32> -> vector<256x72xf32>
    %c0_48 = arith.constant 0 : index
    %c0_49 = arith.constant 0 : index
    %33 = vector.load %arg3[%c0_48, %c0_49] : memref<72x8xf32, #tpu.memory_space<vmem>>, vector<72x8xf32>
    %cst_50 = arith.constant dense<0.000000e+00> : vector<256x8xf32>
    %34 = tpu.matmul %32, %33, %cst_50 {dimension_numbers = #tpu.dot_dimension_numbers<[1], [0], [0], [1], [0, 0, 1, 1], [], []>} : vector<256x72xf32>, vector<72x8xf32>, vector<256x8xf32> -> vector<256x8xf32>
    %c0_51 = arith.constant 0 : index
    %c0_52 = arith.constant 0 : index
    %35 = vector.load %arg4[%c0_51, %c0_52] : memref<8x32xf32, #tpu.memory_space<vmem>>, vector<8x32xf32>
    %cst_53 = arith.constant dense<0.000000e+00> : vector<256x32xf32>
    %36 = tpu.matmul %34, %35, %cst_53 {dimension_numbers = #tpu.dot_dimension_numbers<[1], [0], [0], [1], [0, 0, 1, 1], [], []>} : vector<256x8xf32>, vector<8x32xf32>, vector<256x32xf32> -> vector<256x32xf32>
    %c0_54 = arith.constant 0 : index
    %c0_55 = arith.constant 0 : index
    %37 = vector.load %arg5[%c0_54, %c0_55] : memref<1x32xf32, #tpu.memory_space<vmem>>, vector<1x32xf32>
    %38 = vector.broadcast %37 : vector<1x32xf32> to vector<256x32xf32>
    %39 = arith.mulf %36, %38 : vector<256x32xf32>
    %c0_56 = arith.constant 0 : index
    %c0_57 = arith.constant 0 : index
    %40 = vector.load %arg6[%c0_56, %c0_57] : memref<1x32xf32, #tpu.memory_space<vmem>>, vector<1x32xf32>
    %41 = vector.broadcast %40 : vector<1x32xf32> to vector<256x32xf32>
    %42 = arith.addf %39, %41 : vector<256x32xf32>
    %cst_58 = arith.constant 0.000000e+00 : f32
    %43 = vector.broadcast %cst_58 : f32 to vector<256x32xf32>
    %44 = arith.maximumf %42, %43 : vector<256x32xf32>
    %cst_59 = arith.constant 0.000000e+00 : f32
    %45 = vector.broadcast %cst_59 : f32 to vector<256x28xf32>
    %46 = tpu.concatenate %1, %45 in 1 : vector<256x4xf32>, vector<256x28xf32> -> vector<256x32xf32>
    %47 = arith.addf %44, %46 : vector<256x32xf32>
    %c0_60 = arith.constant 0 : index
    %c0_61 = arith.constant 0 : index
    %c0_62 = arith.constant 0 : index
    %48 = vector.load %arg7[%c0_60, %c0_61, %c0_62] : memref<1x256x32xf32, #tpu.memory_space<vmem>>, vector<1x256x32xf32>
    %49 = vector.shape_cast %48 : vector<1x256x32xf32> to vector<256x32xf32>
    %50 = vector.shape_cast %47 : vector<256x32xf32> to vector<1x256x32xf32>
    tpu.vector_store %arg7[%c0_60, %c0_61, %c0_62], %50 {strides = array<i32>} : memref<1x256x32xf32, #tpu.memory_space<vmem>>, vector<1x256x32xf32>,
    return
  }
  func.func @transform_0(%arg0: i32) -> (i32, i32, i32) {
    %c0_i32 = arith.constant 0 : i32
    %c0_i32_0 = arith.constant 0 : i32
    %c0_i32_1 = arith.constant 0 : i32
    return %arg0, %c0_i32, %c0_i32_0 : i32, i32, i32
  }
  func.func @transform_1(%arg0: i32) -> (i32, i32) {
    %c0_i32 = arith.constant 0 : i32
    %c0_i32_0 = arith.constant 0 : i32
    %c0_i32_1 = arith.constant 0 : i32
    return %c0_i32, %c0_i32_0 : i32, i32
  }
  func.func @transform_2(%arg0: i32) -> (i32, i32) {
    %c0_i32 = arith.constant 0 : i32
    %c0_i32_0 = arith.constant 0 : i32
    %c0_i32_1 = arith.constant 0 : i32
    return %c0_i32, %c0_i32_0 : i32, i32
  }
  func.func @transform_3(%arg0: i32) -> (i32, i32) {
    %c0_i32 = arith.constant 0 : i32
    %c0_i32_0 = arith.constant 0 : i32
    %c0_i32_1 = arith.constant 0 : i32
    return %c0_i32, %c0_i32_0 : i32, i32
  }
  func.func @transform_4(%arg0: i32) -> (i32, i32) {
    %c0_i32 = arith.constant 0 : i32
    %c0_i32_0 = arith.constant 0 : i32
    %c0_i32_1 = arith.constant 0 : i32
    return %c0_i32, %c0_i32_0 : i32, i32
  }
  func.func @transform_5(%arg0: i32) -> (i32, i32) {
    %c0_i32 = arith.constant 0 : i32
    %c0_i32_0 = arith.constant 0 : i32
    %c0_i32_1 = arith.constant 0 : i32
    return %c0_i32, %c0_i32_0 : i32, i32
  }
  func.func @transform_6(%arg0: i32) -> (i32, i32, i32) {
    %c0_i32 = arith.constant 0 : i32
    %c0_i32_0 = arith.constant 0 : i32
    %c0_i32_1 = arith.constant 0 : i32
    return %arg0, %c0_i32, %c0_i32_0 : i32, i32, i32
  }
}

</mosaic_0001>

<bundles_post_ra>
// kernel: tile.8
= control target key start
LH: loop header
LB: loop body
LE: loop exit
PB: predicated region body
PF: predicated region fallthrough
CT: control target
= control target key end

     0   :  { %s28_s0 = inlined_call_operand.vmem [shape: f32[8], index: 0, kind: input, shape index: {}]   ;;  %s29_s1 = inlined_call_operand.vmem [shape: f32[9,8], index: 1, kind: output, shape index: {}]  }
   0x1   :  { %v4_v0 = vld [vmem:[%s28_s0] ss:$0 sm:$0xff] }
   0x2   :  { %5 = vst [vmem:[%s29_s1] sm:$0xff] %v4_v0 }
   0x3   :  { %8 = vst [vmem:[%s29_s1 + $0x8] sm:$0xff] %v4_v0 }

// kernel: mul.18
= control target key start
LH: loop header
LB: loop body
LE: loop exit
PB: predicated region body
PF: predicated region fallthrough
CT: control target
= control target key end

     0   :  { %s75_s10 = smov 64   ;;  %s76_s11 = smov 48   ;;  %vm3_vm0 = vcmask 64512   ;;  %vm9_vm1 = vcmask 589312   ;;  %vm15_vm2 = vcmask 523712   ;;  %vm21_vm3 = vcmask 458112   ;;  %s123_s0 = inlined_call_operand.vmem [shape: f32[9,8], index: 0, kind: input, shape index: {}]   ;;  %s124_s1 = inlined_call_operand.vmem [shape: f32[72], index: 1, kind: output, shape index: {}]  }
   0x1   :  { %v59_v0 = vld [vmem:[%s123_s0 + $0x8] sm:$0x1]   ;;  %v61_v1 = vld [vmem:[%s123_s0 + $0x6] sm:$0x1]   ;;  %v63_v2 = vld [vmem:[%s123_s0 + $0x4] sm:$0x1]  }
   0x2   :  { %7 = vrot.lane.b32.xlu0 %v59_v0, %s75_s10  ;;  %19 = vrot.lane.b32.xlu1 %v61_v1, %s76_s11  ;;  %s77_s14 = smov 32   ;;  %v60_v3 = vld [vmem:[%s123_s0 + $0x7] sm:$0x1]   ;;  %v62_v4 = vld [vmem:[%s123_s0 + $0x5] sm:$0x1]   ;;  %s78_s19 = smov 56  }
   0x3   :  { %31 = vrot.lane.b32.xlu2 %v63_v2, %s77_s14  ;;  %s79_s20 = smov 40   ;;  %v64_v5 = vld [vmem:[%s123_s0 + $0x3] sm:$0x1]   ;;  %s80_s23 = smov 24   ;;  %v65_v6 = vld [vmem:[%s123_s0 + $0x2] sm:$0x1]  }
   0x4   :  { %v66_v7 = vld [vmem:[%s123_s0 + $0x1] sm:$0x1]   ;;  %s81_s28 = smov 16   ;;  %s82_s29 = smov 8   ;;  %v2_v8 = vld [vmem:[%s123_s0] sm:$0x1]  }
   0x5   :  { %4 = vst.msk [vmem:[#allocation0] sm:$0x1] %vm3_vm0, %v2_v8   ;;  %vm27_vm4 = vcmask 392512   ;;  %vm33_vm5 = vcmask 326912   ;;  %vm39_vm6 = vcmask 261312   ;;  %vm45_vm7 = vcmask 195712  }
   0x6   :  { %vm51_vm8 = vcmask 130112  }
   0xa   :  { %13 = vrot.lane.b32.xlu0 %v60_v3, %s78_s19  ;;  %25 = vrot.lane.b32.xlu1 %v62_v4, %s79_s20 }
   0xb   :  { %37 = vrot.lane.b32.xlu2 %v64_v5, %s80_s23 }
  0x12   :  { %43 = vrot.lane.b32.xlu0 %v65_v6, %s81_s28  ;;  %49 = vrot.lane.b32.xlu1 %v66_v7, %s82_s29 }
  0x5d   :  { %v32_v9 = vpop.permute.xlu2 %31  }
  0x65   :  { %v38_v10 = vpop.permute.xlu2 %37  }
  0x74   :  { %v8_v11 = vpop.permute.xlu0 %7   ;;  %v20_v12 = vpop.permute.xlu1 %19  }
  0x75   :  { %10 = vst.msk [vmem:[#allocation0] sm:$0x1] %vm9_vm1, %v8_v11  }
  0x7c   :  { %v14_v13 = vpop.permute.xlu0 %13   ;;  %v26_v14 = vpop.permute.xlu1 %25  }
  0x7d   :  { %16 = vst.msk [vmem:[#allocation0] sm:$0x1] %vm15_vm2, %v14_v13  }
  0x7e   :  { %22 = vst.msk [vmem:[#allocation0] sm:$0x1] %vm21_vm3, %v20_v12  }
  0x7f   :  { %28 = vst.msk [vmem:[#allocation0] sm:$0x1] %vm27_vm4, %v26_v14  }
  0x80   :  { %34 = vst.msk [vmem:[#allocation0] sm:$0x1] %vm33_vm5, %v32_v9  }
  0x81   :  { %40 = vst.msk [vmem:[#allocation0] sm:$0x1] %vm39_vm6, %v38_v10  }
  0x84   :  { %v44_v15 = vpop.permute.xlu0 %43   ;;  %v50_v16 = vpop.permute.xlu1 %49  }
  0x85   :  { %46 = vst.msk [vmem:[#allocation0] sm:$0x1] %vm45_vm7, %v44_v15  }
  0x86   :  { %52 = vst.msk [vmem:[#allocation0] sm:$0x1] %vm51_vm8, %v50_v16  }
  0x8d   :  { %v55_v17 = vld [vmem:[#allocation0] sm:$0x1] }
  0x8e   :  { %58 = vst [vmem:[%s124_s1] sm:$0x1] %v55_v17 }

// kernel: bottleneck_tppi.2
= control target key start
LH: loop header
LB: loop body
LE: loop exit
PB: predicated region body
PF: predicated region fallthrough
CT: control target
= control target key end

     0   :  { %s2587_s12 = smov 0   ;;  %s4451_s0 = inlined_call_operand.vmem [shape: f32[2,256,4], index: 0, kind: input, shape index: {}]   ;;  %s4452_s1 = inlined_call_operand.vmem [shape: f32[4,8], index: 1, kind: input, shape index: {}]   ;;  %s4453_s2 = inlined_call_operand.vmem [shape: f32[8,72], index: 2, kind: output, shape index: {0}]   ;;  %s4454_s3 = inlined_call_operand.vmem [shape: f32[72,72], index: 3, kind: output, shape index: {1}]  }
   0x1 LB: > { %s2391_s13 = sadd.s32 4294967295, %s2556_s12   ;;  %p2394_p0 = scmp.ge.s32.totalorder %s2556_s12, 1  ;;  %s2556_s12 = sphi %s2587_s12, %s14_s12  }
   0x2   : > { %p130_p1 = scmp.lt.s32.totalorder %s2556_s12, 3 }
   0x4   : > { %p131_p2 = pnand %p2394_p0, %p130_p1 }
   0x6   : > { %134 = sbr.rel (%p131_p2) target bundleno = 1262 (0x4ee), region = 28 }
   0xb   : > { %p149_p3 = scmp.lt.s32.totalorder %s2391_s13, 1  ;;  %p2397_p4 = scmp.ne.s32.totalorder %s2391_s13, 0 }
   0xd   : > { %s150_s14 = scalar_select %p149_p3, %s2391_s13, 1 }
   0xe   : > { %157 = sbr.rel (%p2397_p4) target bundleno = 30 (0x1e), region = 32 }
   0xf   : > { %s2433_s15 = sshll.u32 %s150_s14, 8 }
  0x10   : > { %s2598_s18 = scalar_lea.vmem %s4451_s0, %s2433_s15 }
  0x13   : > { %vm158_vm0 = vcmask 588800   ;;  %v2558_v0 = vmov 0.0  }
  0x14   : > { %159 = vst.msk [vmem:[%s4453_s2] sm:$0xff] %vm158_vm0, %v2558_v0 }
  0x15   : > { %160 = vst.msk [vmem:[%s4454_s3] sm:$0xff] %vm158_vm0, %v2558_v0 }
  0x16   : > { %161 = vst.msk [vmem:[%s4454_s3 + $0x8] sm:$0xff] %vm158_vm0, %v2558_v0 }
  0x17   : > { %162 = vst.msk [vmem:[%s4454_s3 + $0x10] sm:$0xff] %vm158_vm0, %v2558_v0 }
  0x18   : > { %163 = vst.msk [vmem:[%s4454_s3 + $0x18] sm:$0xff] %vm158_vm0, %v2558_v0 }
  0x19   : > { %164 = vst.msk [vmem:[%s4454_s3 + $0x20] sm:$0xff] %vm158_vm0, %v2558_v0 }
  0x1a   : > { %165 = vst.msk [vmem:[%s4454_s3 + $0x28] sm:$0xff] %vm158_vm0, %v2558_v0 }
  0x1b   : > { %166 = vst.msk [vmem:[%s4454_s3 + $0x30] sm:$0xff] %vm158_vm0, %v2558_v0 }
  0x1c   : > { %167 = vst.msk [vmem:[%s4454_s3 + $0x38] sm:$0xff] %vm158_vm0, %v2558_v0 }
  0x1d   : > { %168 = vst.msk [vmem:[%s4454_s3 + $0x40] sm:$0xff] %vm158_vm0, %v2558_v0 }
  0x1e PF: > { %v201_v1 = vld [vmem:[%s4452_s1] sm:$0xf]  ;;  %vm299_vm1 = vcmask 1043456   ;;  %vm202_vm2 = vcmask 31744   ;;  %v184_v3 = vld [vmem:[%s2598_s18 + $0x78] sm:$0xff]  ;;  %v170_v4 = vld [vmem:[%s2598_s18 + $0x8] sm:$0xff] }
  0x1f   : > { %v169_v2 = vld [vmem:[%s2598_s18] sm:$0xff]  ;;  %2398 = vmatpush.msk.msra.mxu0 %vm299_vm1, %v201_v1  ;;  %2434 = vmatpush.msk.msra.mxu3 %vm299_vm1, %v201_v1  ;;  %v171_v6 = vld [vmem:[%s2598_s18 + $0x10] sm:$0xff]  ;;  %v186_v7 = vld [vmem:[%s2598_s18 + $0x88] sm:$0xff]  ;;  %vm417_vm3 = vcmask 64512   ;;  %vm473_vm4 = vcmask 57344   ;;  %s2559_s15 = smov 8  }
  0x20   : > { %2399 = vmatmul.msk.f32.vlgmr.msra.gmra.mxu0 %vm202_vm2, %v169_v2  ;;  %2414 = vmatmul.msk.f32.vlgmr.msra.gmra.mxu3 %vm202_vm2, %v184_v3  ;;  %v185_v5 = vld [vmem:[%s2598_s18 + $0x80] sm:$0xff]  ;;  %v172_v8 = vld [vmem:[%s2598_s18 + $0x18] sm:$0xff]  ;;  %v187_v9 = vld [vmem:[%s2598_s18 + $0x90] sm:$0xff]  ;;  %s2560_s16 = smov 32   ;;  %s2561_s17 = smov 16   ;;  %vm1873_vm5 = vcmask 130048  }
  0x21   : > { %v173_v10 = vld [vmem:[%s2598_s18 + $0x20] sm:$0xff]  ;;  %v188_v11 = vld [vmem:[%s2598_s18 + $0x98] sm:$0xff]  ;;  %v174_v12 = vld [vmem:[%s2598_s18 + $0x28] sm:$0xff]  ;;  %s2562_s19 = smov 24   ;;  %s2564_s20 = smov 48   ;;  %vm1906_vm6 = vcmask 195584  }
  0x22   : > { %v175_v13 = vld [vmem:[%s2598_s18 + $0x30] sm:$0xff]  ;;  %v189_v14 = vld [vmem:[%s2598_s18 + $0xa0] sm:$0xff]  ;;  %v176_v15 = vld [vmem:[%s2598_s18 + $0x38] sm:$0xff]  ;;  %vm1939_vm7 = vcmask 261120   ;;  %vm1972_vm8 = vcmask 326656   ;;  %s2565_s21 = smov 56  }
  0x23   : > { %v190_v16 = vld [vmem:[%s2598_s18 + $0xa8] sm:$0xff]  ;;  %v177_v17 = vld [vmem:[%s2598_s18 + $0x40] sm:$0xff]  ;;  %v179_v19 = vld [vmem:[%s2598_s18 + $0x50] sm:$0xff]  ;;  %s2566_s22 = smov 64   ;;  %vm2005_vm9 = vcmask 392192   ;;  %vm2038_vm10 = vcmask 457728  }
  0x24   : > { %v178_v18 = vld [vmem:[%s2598_s18 + $0x48] sm:$0xff]  ;;  %v191_v20 = vld [vmem:[%s2598_s18 + $0xb0] sm:$0xff]  ;;  %v180_v21 = vld [vmem:[%s2598_s18 + $0x58] sm:$0xff]  ;;  %vm2071_vm11 = vcmask 523264   ;;  %vm2105_vm12 = vcmask 588800   ;;  %vm2176_vm13 = vcmask 581632  }
  0x25   : > { %v181_v22 = vld [vmem:[%s2598_s18 + $0x60] sm:$0xff]  ;;  %v192_v23 = vld [vmem:[%s2598_s18 + $0xb8] sm:$0xff]  ;;  %v182_v24 = vld [vmem:[%s2598_s18 + $0x68] sm:$0xff] }
  0x26   : > { %v183_v25 = vld [vmem:[%s2598_s18 + $0x70] sm:$0xff]  ;;  %v193_v26 = vld [vmem:[%s2598_s18 + $0xc0] sm:$0xff]  ;;  %v194_v27 = vld [vmem:[%s2598_s18 + $0xc8] sm:$0xff] }
  0x27   : > { %v195_v47 = vld [vmem:[%s2598_s18 + $0xd0] sm:$0xff]  ;;  %v196_v55 = vld [vmem:[%s2598_s18 + $0xd8] sm:$0xff] }
  0x28   : > { %2400 = vmatmul.msk.f32.gmra.mxu0 %vm202_vm2, %v170_v4  ;;  %2415 = vmatmul.msk.f32.gmra.mxu3 %vm202_vm2, %v185_v5 }
  0x30   : > { %2401 = vmatmul.msk.f32.gmra.mxu0 %vm202_vm2, %v171_v6  ;;  %2416 = vmatmul.msk.f32.gmra.mxu3 %vm202_vm2, %v186_v7 }
  0x38   : > { %2402 = vmatmul.msk.f32.gmra.mxu0 %vm202_vm2, %v172_v8  ;;  %2417 = vmatmul.msk.f32.gmra.mxu3 %vm202_vm2, %v187_v9 }
  0x40   : > { %2403 = vmatmul.msk.f32.gmra.mxu0 %vm202_vm2, %v173_v10  ;;  %2418 = vmatmul.msk.f32.gmra.mxu3 %vm202_vm2, %v188_v11 }
  0x48   : > { %2404 = vmatmul.msk.f32.gmra.mxu0 %vm202_vm2, %v174_v12  ;;  %2419 = vmatmul.msk.f32.gmra.mxu3 %vm202_vm2, %v189_v14 }
  0x50   : > { %2405 = vmatmul.msk.f32.gmra.mxu0 %vm202_vm2, %v175_v13  ;;  %2420 = vmatmul.msk.f32.gmra.mxu3 %vm202_vm2, %v190_v16  ;;  %v197_v13 = vld [vmem:[%s2598_s18 + $0xe0] sm:$0xff] }
  0x58   : > { %2406 = vmatmul.msk.f32.gmra.mxu0 %vm202_vm2, %v176_v15  ;;  %2421 = vmatmul.msk.f32.gmra.mxu3 %vm202_vm2, %v191_v20 }
  0x60   : > { %2407 = vmatmul.msk.f32.gmra.mxu0 %vm202_vm2, %v177_v17  ;;  %2422 = vmatmul.msk.f32.gmra.mxu3 %vm202_vm2, %v192_v23 }
  0x68   : > { %2408 = vmatmul.msk.f32.gmra.mxu0 %vm202_vm2, %v178_v18  ;;  %2423 = vmatmul.msk.f32.gmra.mxu3 %vm202_vm2, %v193_v26 }
  0x70   : > { %2409 = vmatmul.msk.f32.gmra.mxu0 %vm202_vm2, %v179_v19  ;;  %2424 = vmatmul.msk.f32.gmra.mxu3 %vm202_vm2, %v194_v27 }
  0x78   : > { %2410 = vmatmul.msk.f32.gmra.mxu0 %vm202_vm2, %v180_v21  ;;  %2425 = vmatmul.msk.f32.gmra.mxu3 %vm202_vm2, %v195_v47 }
  0x80   : > { %2411 = vmatmul.msk.f32.gmra.mxu0 %vm202_vm2, %v181_v22  ;;  %2426 = vmatmul.msk.f32.gmra.mxu3 %vm202_vm2, %v196_v55 }
  0x88   : > { %2412 = vmatmul.msk.f32.gmra.mxu0 %vm202_vm2, %v182_v24  ;;  %2427 = vmatmul.msk.f32.gmra.mxu3 %vm202_vm2, %v197_v13 }
  0x90   : > { %2413 = vmatmul.msk.f32.gmra.mxu0 %vm202_vm2, %v183_v25 }
  0x9d   : > { %v320_v28 = vpop.f32.mrf.mxu0 }
  0x9e   : > { %418 = vst.msk [vmem:[#allocation2 + $0x19] sm:$0xff] %vm417_vm3, %v320_v28 }
  0x9f   : > { %450 = vst.msk [vmem:[#allocation2 + $0x1] sm:$0xff] %vm417_vm3, %v320_v28  ;;  %v198_v28 = vld [vmem:[%s2598_s18 + $0xe8] sm:$0xff] }
  0xa0   : > { %2428 = vmatmul.msk.f32.gmra.mxu3 %vm202_vm2, %v198_v28 }
  0xa3   : > { %v365_v29 = vpop.f32.mrf.mxu3 }
  0xa4   : > { %433 = vst.msk [vmem:[#allocation2 + $0xc9] sm:$0xff] %vm417_vm3, %v365_v29 }
  0xa5   : > { %v456_v30 = vld [vmem:[#allocation2 + $0x19] sm:$0x1]  ;;  %v323_v31 = vpop.f32.mrf.mxu0 }
  0xa6   : > { %v562_v32 = vld [vmem:[#allocation2 + $0x19] sm:$0xff]  ;;  %v455_v33 = vld [vmem:[#allocation2 + $0x1] sm:$0x1]  ;;  %475 = vst.msk [vmem:[#allocation2 + $0x18] sm:$0x1] %vm473_vm4, %v456_v30 }
  0xa7   : > { %v560_v34 = vld [vmem:[#allocation2 + $0x1] sm:$0xff]  ;;  %853 = vrot.lane.b32.xlu1 %v562_v32, %s2559_s15  ;;  %474 = vst.msk [vmem:[#allocation2] sm:$0x1] %vm473_vm4, %v455_v33 }
  0xa8   : > { %849 = vrot.lane.b32.xlu0 %v560_v34, %s2559_s15  ;;  %419 = vst.msk [vmem:[#allocation2 + $0x21] sm:$0xff] %vm417_vm3, %v323_v31  ;;  %v199_v34 = vld [vmem:[%s2598_s18 + $0xf0] sm:$0xff] }
  0xa9   : > { %451 = vst.msk [vmem:[#allocation2 + $0x9] sm:$0xff] %vm417_vm3, %v323_v31  ;;  %2429 = vmatmul.msk.f32.gmra.mxu3 %vm202_vm2, %v199_v34 }
  0xab   : > { %v500_v35 = vld [vmem:[#allocation2 + $0xd0] sm:$0x1]  ;;  %v368_v37 = vpop.f32.mrf.mxu3 }
  0xac   : > { %v577_v36 = vld [vmem:[#allocation2 + $0xc9] sm:$0xff]  ;;  %518 = vst.msk [vmem:[#allocation2 + $0xd1] sm:$0x1] %vm473_vm4, %v500_v35 }
  0xad   : > { %883 = vrot.lane.b32.xlu2 %v577_v36, %s2559_s15  ;;  %v326_v38 = vpop.f32.mrf.mxu0  ;;  %434 = vst.msk [vmem:[#allocation2 + $0xd9] sm:$0xff] %vm417_vm3, %v368_v37  ;;  %v624_v57 = vld [vmem:[#allocation2 + $0x18] sm:$0xff] }
  0xae   : > { %420 = vst.msk [vmem:[#allocation2 + $0x31] sm:$0xff] %vm417_vm3, %v326_v38  ;;  %v200_v38 = vld [vmem:[%s2598_s18 + $0xf8] sm:$0xff]  ;;  %s2563_s18 = smov 40  }
  0xaf   : > { %v493_v39 = vld [vmem:[#allocation2 + $0x28] sm:$0x1]  ;;  %v594_v49 = vld [vmem:[#allocation2 + $0x1a] sm:$0xff] }
  0xb0   : > { %1233 = vrot.lane.b32.xlu0 %v562_v32, %s2560_s16  ;;  %v563_v40 = vld [vmem:[#allocation2 + $0x21] sm:$0xff]  ;;  %v492_v41 = vld [vmem:[#allocation2 + $0x10] sm:$0x1]  ;;  %511 = vst.msk [vmem:[#allocation2 + $0x29] sm:$0x1] %vm473_vm4, %v493_v39 }
  0xb1   : > { %855 = vrot.lane.b32.xlu1 %v563_v40, %s2559_s15  ;;  %510 = vst.msk [vmem:[#allocation2 + $0x11] sm:$0x1] %vm473_vm4, %v492_v41  ;;  %v592_v42 = vld [vmem:[#allocation2 + $0x2] sm:$0xff]  ;;  %2430 = vmatmul.msk.f32.gmra.mxu3 %vm202_vm2, %v200_v38 }
  0xb2   : > { %v561_v48 = vld [vmem:[#allocation2 + $0x9] sm:$0xff]  ;;  %v625_v50 = vld [vmem:[#allocation2 + $0x20] sm:$0xff] }
  0xb3   : > { %v371_v43 = vpop.f32.mrf.mxu3  ;;  %v609_v5 = vld [vmem:[#allocation2 + $0xca] sm:$0xff] }
  0xb4   : > { %v464_v44 = vld [vmem:[#allocation2 + $0xd9] sm:$0x1]  ;;  %435 = vst.msk [vmem:[#allocation2 + $0xe1] sm:$0xff] %vm417_vm3, %v371_v43 }
  0xb5   : > { %977 = vrot.lane.b32.xlu2 %v592_v42, %s2561_s17  ;;  %v457_v45 = vld [vmem:[#allocation2 + $0x31] sm:$0x1]  ;;  %v329_v46 = vpop.f32.mrf.mxu0  ;;  %483 = vst.msk [vmem:[#allocation2 + $0xd8] sm:$0x1] %vm473_vm4, %v464_v44  ;;  %v2712_v53 = vld [vmem:[#allocation2 + $0xd9] sm:$0xff] }
  0xb6   : > { %476 = vst.msk [vmem:[#allocation2 + $0x30] sm:$0x1] %vm473_vm4, %v457_v45  ;;  %v564_v58 = vld [vmem:[#allocation2 + $0x31] sm:$0xff] }
  0xb7   : > { %421 = vst.msk [vmem:[#allocation2 + $0x39] sm:$0xff] %vm417_vm3, %v329_v46  ;;  %v595_v0 = vld [vmem:[#allocation2 + $0x22] sm:$0xff] }
  0xb8   : > { %851 = vrot.lane.b32.xlu0 %v561_v48, %s2559_s15  ;;  %v593_v63 = vld [vmem:[#allocation2 + $0xa] sm:$0xff] }
  0xb9   : > { %981 = vrot.lane.b32.xlu1 %v594_v49, %s2561_s17 }
  0xbb   : > { %v501_v51 = vld [vmem:[#allocation2 + $0xe8] sm:$0x1]  ;;  %v374_v52 = vpop.f32.mrf.mxu3  ;;  %v641_v2 = vld [vmem:[#allocation2 + $0xe0] sm:$0xff] }
  0xbc   : > { %519 = vst.msk [vmem:[#allocation2 + $0xe9] sm:$0x1] %vm473_vm4, %v501_v51  ;;  %v2737_v9 = vld [vmem:[#allocation2 + $0xe1] sm:$0xff]  ;;  %v2756_v19 = vld [vmem:[#allocation2 + $0xd8] sm:$0xff] }
  0xbd   : > { %1107 = vrot.lane.b32.xlu2 %v625_v50, %s2562_s19  ;;  %v332_v54 = vpop.f32.mrf.mxu0  ;;  %436 = vst.msk [vmem:[#allocation2 + $0xf1] sm:$0xff] %vm417_vm3, %v374_v52  ;;  %v610_v11 = vld [vmem:[#allocation2 + $0xda] sm:$0xff]  ;;  %v2748_v15 = vld [vmem:[#allocation2 + $0x30] sm:$0xff] }
  0xbe   : > { %v494_v56 = vld [vmem:[#allocation2 + $0x40] sm:$0x1]  ;;  %422 = vst.msk [vmem:[#allocation2 + $0x49] sm:$0xff] %vm417_vm3, %v332_v54  ;;  %v596_v6 = vld [vmem:[#allocation2 + $0x32] sm:$0xff] }
  0xbf   : > { %512 = vst.msk [vmem:[#allocation2 + $0x41] sm:$0x1] %vm473_vm4, %v494_v56  ;;  %v627_v16 = vld [vmem:[#allocation2 + $0x38] sm:$0xff] }
  0xc0   : > { %885 = vrot.lane.b32.xlu0 %v2712_v53, %s2559_s15  ;;  %4476 = vst [vmem:[#allocation3_spill] sm:$0xff] %v2756_v19  ;;  %v2768_v25 = vld [vmem:[#allocation2 + $0x39] sm:$0xff] }
  0xc1   : > { %1105 = vrot.lane.b32.xlu1 %v624_v57, %s2562_s19 }
  0xc3   : > { %v377_v59 = vpop.f32.mrf.mxu3  ;;  %v611_v22 = vld [vmem:[#allocation2 + $0xe2] sm:$0xff] }
  0xc4   : > { %v465_v60 = vld [vmem:[#allocation2 + $0xf1] sm:$0x1]  ;;  %437 = vst.msk [vmem:[#allocation2 + $0xf9] sm:$0xff] %vm417_vm3, %v377_v59 }
  0xc5   : > { %857 = vrot.lane.b32.xlu2 %v564_v58, %s2559_s15  ;;  %v458_v61 = vld [vmem:[#allocation2 + $0x49] sm:$0x1]  ;;  %v335_v62 = vpop.f32.mrf.mxu0  ;;  %484 = vst.msk [vmem:[#allocation2 + $0xf0] sm:$0x1] %vm473_vm4, %v465_v60  ;;  %v2782_v31 = vld [vmem:[#allocation2 + $0xf1] sm:$0xff] }
  0xc6   : > { %477 = vst.msk [vmem:[#allocation2 + $0x48] sm:$0x1] %vm473_vm4, %v458_v61  ;;  %v2764_v23 = vld [vmem:[#allocation2 + $0x3a] sm:$0xff]  ;;  %v2773_v26 = vld [vmem:[#allocation2 + $0x49] sm:$0xff] }
  0xc7   : > { %423 = vst.msk [vmem:[#allocation2 + $0x51] sm:$0xff] %vm417_vm3, %v335_v62 }
  0xc8   : > { %979 = vrot.lane.b32.xlu0 %v593_v63, %s2561_s17 }
  0xc9   : > { %1235 = vrot.lane.b32.xlu1 %v563_v40, %s2560_s16 }
  0xcb   : > { %v502_v1 = vld [vmem:[#allocation2 + $0x100] sm:$0x1]  ;;  %v380_v10 = vpop.f32.mrf.mxu3  ;;  %v612_v30 = vld [vmem:[#allocation2 + $0xf2] sm:$0xff] }
  0xcc   : > { %520 = vst.msk [vmem:[#allocation2 + $0x101] sm:$0x1] %vm473_vm4, %v502_v1  ;;  %v2788_v35 = vld [vmem:[#allocation2 + $0xf9] sm:$0xff]  ;;  %v642_v36 = vld [vmem:[#allocation2 + $0xf0] sm:$0xff] }
  0xcd   : > { %983 = vrot.lane.b32.xlu2 %v595_v0, %s2561_s17  ;;  %v338_v3 = vpop.f32.mrf.mxu0  ;;  %438 = vst.msk [vmem:[#allocation2 + $0x109] sm:$0xff] %vm417_vm3, %v380_v10  ;;  %v2795_v37 = vld [vmem:[#allocation2 + $0xf8] sm:$0xff]  ;;  %v628_v52 = vld [vmem:[#allocation2 + $0x48] sm:$0xff] }
  0xce   : > { %v495_v4 = vld [vmem:[#allocation2 + $0x58] sm:$0x1]  ;;  %424 = vst.msk [vmem:[#allocation2 + $0x61] sm:$0xff] %vm417_vm3, %v338_v3  ;;  %v629_v43 = vld [vmem:[#allocation2 + $0x50] sm:$0xff] }
  0xcf   : > { %513 = vst.msk [vmem:[#allocation2 + $0x59] sm:$0x1] %vm473_vm4, %v495_v4  ;;  %v2800_v41 = vld [vmem:[#allocation2 + $0x51] sm:$0xff] }
  0xd0   : > { %1139 = vrot.lane.b32.xlu0 %v641_v2, %s2562_s19  ;;  %4477 = vst [vmem:[#allocation4_spill] sm:$0xff] %v2795_v37  ;;  %v2809_v44 = vld [vmem:[#allocation2 + $0x4a] sm:$0xff] }
  0xd1   : > { %1011 = vrot.lane.b32.xlu1 %v609_v5, %s2561_s17 }
  0xd3   : > { %v383_v18 = vpop.f32.mrf.mxu3  ;;  %v2838_v60 = vld [vmem:[#allocation2 + $0xfa] sm:$0xff] }
  0xd4   : > { %v466_v17 = vld [vmem:[#allocation2 + $0x109] sm:$0x1]  ;;  %439 = vst.msk [vmem:[#allocation2 + $0x111] sm:$0xff] %vm417_vm3, %v383_v18 }
  0xd5   : > { %1237 = vrot.lane.b32.xlu2 %v564_v58, %s2560_s16  ;;  %v459_v7 = vld [vmem:[#allocation2 + $0x61] sm:$0x1]  ;;  %v341_v8 = vpop.f32.mrf.mxu0  ;;  %485 = vst.msk [vmem:[#allocation2 + $0x108] sm:$0x1] %vm473_vm4, %v466_v17  ;;  %v2813_v48 = vld [vmem:[#allocation2 + $0x109] sm:$0xff] }
  0xd6   : > { %478 = vst.msk [vmem:[#allocation2 + $0x60] sm:$0x1] %vm473_vm4, %v459_v7  ;;  %v2819_v50 = vld [vmem:[#allocation2 + $0x52] sm:$0xff]  ;;  %v2858_v4 = vld [vmem:[#allocation2 + $0x61] sm:$0xff] }
  0xd7   : > { %425 = vst.msk [vmem:[#allocation2 + $0x69] sm:$0xff] %vm417_vm3, %v341_v8 }
  0xd8   : > { %985 = vrot.lane.b32.xlu0 %v596_v6, %s2561_s17 }
  0xd9   : > { %887 = vrot.lane.b32.xlu1 %v2737_v9, %s2559_s15 }
  0xdb   : > { %v503_v24 = vld [vmem:[#allocation2 + $0x118] sm:$0x1]  ;;  %v386_v39 = vpop.f32.mrf.mxu3  ;;  %v2831_v57 = vld [vmem:[#allocation2 + $0x10a] sm:$0xff] }
  0xdc   : > { %521 = vst.msk [vmem:[#allocation2 + $0x119] sm:$0x1] %vm473_vm4, %v503_v24  ;;  %v645_v58 = vld [vmem:[#allocation2 + $0x110] sm:$0xff]  ;;  %v2845_v63 = vld [vmem:[#allocation2 + $0x108] sm:$0xff] }
  0xdd   : > { %1013 = vrot.lane.b32.xlu2 %v610_v11, %s2561_s17  ;;  %v344_v12 = vpop.f32.mrf.mxu0  ;;  %440 = vst.msk [vmem:[#allocation2 + $0x121] sm:$0xff] %vm417_vm3, %v386_v39  ;;  %v630_v7 = vld [vmem:[#allocation2 + $0x60] sm:$0xff]  ;;  %v2875_v13 = vld [vmem:[#allocation2 + $0x111] sm:$0xff] }
  0xde   : > { %v496_v14 = vld [vmem:[#allocation2 + $0x70] sm:$0x1]  ;;  %426 = vst.msk [vmem:[#allocation2 + $0x79] sm:$0xff] %vm417_vm3, %v344_v12  ;;  %v2849_v0 = vld [vmem:[#allocation2 + $0x62] sm:$0xff] }
  0xdf   : > { %514 = vst.msk [vmem:[#allocation2 + $0x71] sm:$0x1] %vm473_vm4, %v496_v14  ;;  %v2864_v6 = vld [vmem:[#allocation2 + $0x69] sm:$0xff] }
  0xe0   : > { %1109 = vrot.lane.b32.xlu0 %v2748_v15, %s2562_s19  ;;  %4481 = vst [vmem:[#allocation8_spill] sm:$0xff] %v2845_v63 }
  0xe1   : > { %1111 = vrot.lane.b32.xlu1 %v627_v16, %s2562_s19 }
  0xe3   : > { %v389_v51 = vpop.f32.mrf.mxu3  ;;  %v2883_v17 = vld [vmem:[#allocation2 + $0x112] sm:$0xff] }
  0xe4   : > { %v467_v45 = vld [vmem:[#allocation2 + $0x121] sm:$0x1]  ;;  %441 = vst.msk [vmem:[#allocation2 + $0x129] sm:$0xff] %vm417_vm3, %v389_v51 }
  0xe5   : > { %1137 = vrot.lane.b32.xlu2 %v2756_v19, %s2562_s19  ;;  %v460_v20 = vld [vmem:[#allocation2 + $0x79] sm:$0x1]  ;;  %v347_v21 = vpop.f32.mrf.mxu0  ;;  %486 = vst.msk [vmem:[#allocation2 + $0x120] sm:$0x1] %vm473_vm4, %v467_v45  ;;  %v2879_v14 = vld [vmem:[#allocation2 + $0x121] sm:$0xff] }
  0xe6   : > { %479 = vst.msk [vmem:[#allocation2 + $0x78] sm:$0x1] %vm473_vm4, %v460_v20 }
  0xe7   : > { %427 = vst.msk [vmem:[#allocation2 + $0x81] sm:$0xff] %vm417_vm3, %v347_v21 }
  0xe8   : > { %1015 = vrot.lane.b32.xlu0 %v611_v22, %s2561_s17  ;;  %v631_v22 = vld [vmem:[#allocation2 + $0x68] sm:$0xff] }
  0xe9   : > { %987 = vrot.lane.b32.xlu1 %v2764_v23, %s2561_s17 }
  0xeb   : > { %v504_v59 = vld [vmem:[#allocation2 + $0x130] sm:$0x1]  ;;  %v392_v2 = vpop.f32.mrf.mxu3  ;;  %v2895_v24 = vld [vmem:[#allocation2 + $0x128] sm:$0xff] }
  0xec   : > { %522 = vst.msk [vmem:[#allocation2 + $0x131] sm:$0x1] %vm473_vm4, %v504_v59 }
  0xed   : > { %859 = vrot.lane.b32.xlu2 %v2768_v25, %s2559_s15  ;;  %v350_v27 = vpop.f32.mrf.mxu0  ;;  %442 = vst.msk [vmem:[#allocation2 + $0x139] sm:$0xff] %vm417_vm3, %v392_v2  ;;  %v2934_v45 = vld [vmem:[#allocation2 + $0x78] sm:$0xff] }
  0xee   : > { %v497_v29 = vld [vmem:[#allocation2 + $0x88] sm:$0x1]  ;;  %428 = vst.msk [vmem:[#allocation2 + $0x91] sm:$0xff] %vm417_vm3, %v350_v27  ;;  %v2897_v27 = vld [vmem:[#allocation2 + $0x79] sm:$0xff] }
  0xef   : > { %515 = vst.msk [vmem:[#allocation2 + $0x89] sm:$0x1] %vm473_vm4, %v497_v29 }
  0xf0   : > { %861 = vrot.lane.b32.xlu0 %v2773_v26, %s2559_s15  ;;  %4489 = vst [vmem:[#allocation16_spill] sm:$0xff] %v2895_v24 }
  0xf1   : > { %1017 = vrot.lane.b32.xlu1 %v612_v30, %s2561_s17 }
  0xf3   : > { %v395_v10 = vpop.f32.mrf.mxu3  ;;  %v2954_v59 = vld [vmem:[#allocation2 + $0x12a] sm:$0xff] }
  0xf4   : > { %v468_v8 = vld [vmem:[#allocation2 + $0x139] sm:$0x1]  ;;  %443 = vst.msk [vmem:[#allocation2 + $0x141] sm:$0xff] %vm417_vm3, %v395_v10  ;;  %v2966_v10 = vld [vmem:[#allocation2 + $0x81] sm:$0xff] }
  0xf5   : > { %889 = vrot.lane.b32.xlu2 %v2782_v31, %s2559_s15  ;;  %v461_v32 = vld [vmem:[#allocation2 + $0x91] sm:$0x1]  ;;  %v353_v33 = vpop.f32.mrf.mxu0  ;;  %487 = vst.msk [vmem:[#allocation2 + $0x138] sm:$0x1] %vm473_vm4, %v468_v8 }
  0xf6   : > { %480 = vst.msk [vmem:[#allocation2 + $0x90] sm:$0x1] %vm473_vm4, %v461_v32  ;;  %v2909_v32 = vld [vmem:[#allocation2 + $0x6a] sm:$0xff] }
  0xf7   : > { %429 = vst.msk [vmem:[#allocation2 + $0x99] sm:$0xff] %vm417_vm3, %v353_v33  ;;  %v2913_v33 = vld [vmem:[#allocation2 + $0x129] sm:$0xff] }
  0xf8   : > { %891 = vrot.lane.b32.xlu0 %v2788_v35, %s2559_s15 }
  0xf9   : > { %1141 = vrot.lane.b32.xlu1 %v642_v36, %s2562_s19  ;;  %v2917_v36 = vld [vmem:[#allocation2 + $0x7a] sm:$0xff] }
  0xfb   : > { %v505_v20 = vld [vmem:[#allocation2 + $0x148] sm:$0x1]  ;;  %v398_v39 = vpop.f32.mrf.mxu3 }
  0xfc   : > { %523 = vst.msk [vmem:[#allocation2 + $0x149] sm:$0x1] %vm473_vm4, %v505_v20  ;;  %v2971_v20 = vld [vmem:[#allocation2 + $0x91] sm:$0xff] }
  0xfd   : > { %1143 = vrot.lane.b32.xlu2 %v2795_v37, %s2562_s19  ;;  %v356_v40 = vpop.f32.mrf.mxu0  ;;  %444 = vst.msk [vmem:[#allocation2 + $0x151] sm:$0xff] %vm417_vm3, %v398_v39  ;;  %v2975_v39 = vld [vmem:[#allocation2 + $0x13a] sm:$0xff] }
  0xfe   : > { %v498_v42 = vld [vmem:[#allocation2 + $0xa0] sm:$0x1]  ;;  %430 = vst.msk [vmem:[#allocation2 + $0xa9] sm:$0xff] %vm417_vm3, %v356_v40 }
  0xff   : > { %516 = vst.msk [vmem:[#allocation2 + $0xa1] sm:$0x1] %vm473_vm4, %v498_v42  ;;  %v2928_v42 = vld [vmem:[#allocation2 + $0x122] sm:$0xff] }
 0x100   : > { %1115 = vrot.lane.b32.xlu0 %v629_v43, %s2562_s19 }
 0x101   : > { %863 = vrot.lane.b32.xlu1 %v2800_v41, %s2559_s15 }
 0x104   : > { %v469_v51 = vld [vmem:[#allocation2 + $0x151] sm:$0x1] }
 0x105   : > { %989 = vrot.lane.b32.xlu2 %v2809_v44, %s2561_s17  ;;  %v462_v46 = vld [vmem:[#allocation2 + $0xa9] sm:$0x1]  ;;  %v359_v47 = vpop.f32.mrf.mxu0  ;;  %488 = vst.msk [vmem:[#allocation2 + $0x150] sm:$0x1] %vm473_vm4, %v469_v51 }
 0x106   : > { %481 = vst.msk [vmem:[#allocation2 + $0xa8] sm:$0x1] %vm473_vm4, %v462_v46  ;;  %v2936_v46 = vld [vmem:[#allocation2 + $0x80] sm:$0xff] }
 0x107   : > { %v2817_v49 = vpop.permute.xlu2 %883  ;;  %431 = vst.msk [vmem:[#allocation2 + $0xb1] sm:$0xff] %vm417_vm3, %v359_v47 }
 0x108   : > { %4478 = vst [vmem:[#allocation5_spill] sm:$0xff] %v2817_v49  ;;  %991 = vrot.lane.b32.xlu0 %v2819_v50, %s2561_s17 }
 0x109   : > { %893 = vrot.lane.b32.xlu1 %v2813_v48, %s2559_s15 }
 0x10d   : > { %1113 = vrot.lane.b32.xlu2 %v628_v52, %s2562_s19  ;;  %v362_v54 = vpop.f32.mrf.mxu0  ;;  %v401_v52 = vpop.f32.mrf.mxu3 }
 0x10e   : > { %v499_v55 = vld [vmem:[#allocation2 + $0xb8] sm:$0x1]  ;;  %432 = vst.msk [vmem:[#allocation2 + $0xc1] sm:$0xff] %vm417_vm3, %v362_v54 }
 0x10f   : > { %v2829_v56 = vpop.permute.xlu2 %977  ;;  %517 = vst.msk [vmem:[#allocation2 + $0xb9] sm:$0x1] %vm473_vm4, %v499_v55  ;;  %v2947_v55 = vld [vmem:[#allocation2 + $0x120] sm:$0xff] }
 0x110   : > { %4479 = vst [vmem:[#allocation6_spill] sm:$0xff] %v2829_v56  ;;  %1021 = vrot.lane.b32.xlu0 %v2831_v57, %s2561_s17 }
 0x111   : > { %1147 = vrot.lane.b32.xlu1 %v645_v58, %s2562_s19  ;;  %4499 = vst [vmem:[#allocation26_spill] sm:$0xff] %v2947_v55 }
 0x112   : > { %445 = vst.msk [vmem:[#allocation2 + $0x159] sm:$0xff] %vm417_vm3, %v401_v52 }
 0x115   : > { %1019 = vrot.lane.b32.xlu2 %v2838_v60, %s2561_s17  ;;  %v463_v61 = vld [vmem:[#allocation2 + $0xc1] sm:$0x1] }
 0x116   : > { %482 = vst.msk [vmem:[#allocation2 + $0xc0] sm:$0x1] %vm473_vm4, %v463_v61  ;;  %v2958_v61 = vld [vmem:[#allocation2 + $0x82] sm:$0xff] }
 0x117   : > { %v2843_v62 = vpop.permute.xlu2 %1107 }
 0x118   : > { %4480 = vst [vmem:[#allocation7_spill] sm:$0xff] %v2843_v62  ;;  %1145 = vrot.lane.b32.xlu0 %v2845_v63, %s2562_s19  ;;  %v3041_v62 = vld [vmem:[#allocation2 + $0x90] sm:$0xff] }
 0x119   : > { %993 = vrot.lane.b32.xlu1 %v2849_v0, %s2561_s17  ;;  %v2853_v1 = vpop.permute.xlu1 %853  ;;  %v506_v8 = vld [vmem:[#allocation2 + $0x160] sm:$0x1]  ;;  %v3047_v63 = vld [vmem:[#allocation2 + $0x152] sm:$0xff] }
 0x11a   : > { %4482 = vst [vmem:[#allocation9_spill] sm:$0xff] %v2853_v1  ;;  %v2855_v3 = vpop.permute.xlu0 %849 }
 0x11b   : > { %4483 = vst [vmem:[#allocation10_spill] sm:$0xff] %v2855_v3  ;;  %v3022_v3 = vld [vmem:[#allocation2 + $0x92] sm:$0xff] }
 0x11c   : > { %524 = vst.msk [vmem:[#allocation2 + $0x161] sm:$0x1] %vm473_vm4, %v506_v8  ;;  %v2985_v8 = vld [vmem:[#allocation2 + $0x139] sm:$0xff] }
 0x11d   : > { %865 = vrot.lane.b32.xlu2 %v2858_v4, %s2559_s15 }
 0x11f   : > { %v2862_v5 = vpop.permute.xlu2 %857 }
 0x120   : > { %867 = vrot.lane.b32.xlu0 %v2864_v6, %s2559_s15 }
 0x121   : > { %1117 = vrot.lane.b32.xlu1 %v630_v7, %s2562_s19 }
 0x122   : > { %v2869_v11 = vpop.permute.xlu0 %1233 }
 0x123   : > { %4484 = vst [vmem:[#allocation11_spill] sm:$0xff] %v2869_v11  ;;  %v2872_v12 = vpop.permute.xlu1 %855  ;;  %v3011_v11 = vld [vmem:[#allocation2 + $0x98] sm:$0xff] }
 0x124   : > { %4485 = vst [vmem:[#allocation12_spill] sm:$0xff] %v2872_v12 }
 0x125   : > { %895 = vrot.lane.b32.xlu2 %v2875_v13, %s2559_s15 }
 0x127   : > { %v2881_v16 = vpop.permute.xlu2 %983 }
 0x128   : > { %4486 = vst [vmem:[#allocation13_spill] sm:$0xff] %v2881_v16  ;;  %897 = vrot.lane.b32.xlu0 %v2879_v14, %s2559_s15  ;;  %v2993_v16 = vld [vmem:[#allocation2 + $0x138] sm:$0xff] }
 0x129   : > { %1023 = vrot.lane.b32.xlu1 %v2883_v17, %s2561_s17  ;;  %4506 = vst [vmem:[#allocation33_spill] sm:$0xff] %v2993_v16 }
 0x12a   : > { %v2889_v18 = vpop.permute.xlu0 %851 }
 0x12b   : > { %4487 = vst [vmem:[#allocation14_spill] sm:$0xff] %v2889_v18  ;;  %v2891_v21 = vpop.permute.xlu1 %981  ;;  %v3049_v18 = vld [vmem:[#allocation2 + $0x158] sm:$0xff] }
 0x12c   : > { %4488 = vst [vmem:[#allocation15_spill] sm:$0xff] %v2891_v21  ;;  %v3007_v21 = vld [vmem:[#allocation2 + $0x99] sm:$0xff] }
 0x12d   : > { %1119 = vrot.lane.b32.xlu2 %v631_v22, %s2562_s19  ;;  %4517 = vst [vmem:[#allocation44_spill] sm:$0xff] %v3049_v18 }
 0x12f   : > { %v2899_v28 = vpop.permute.xlu2 %1237 }
 0x130   : > { %4490 = vst [vmem:[#allocation17_spill] sm:$0xff] %v2899_v28  ;;  %1151 = vrot.lane.b32.xlu0 %v2895_v24, %s2562_s19  ;;  %v2991_v28 = vld [vmem:[#allocation2 + $0x141] sm:$0xff] }
 0x131   : > { %869 = vrot.lane.b32.xlu1 %v2897_v27, %s2559_s15 }
 0x132   : > { %v2905_v29 = vpop.permute.xlu0 %885 }
 0x133   : > { %4491 = vst [vmem:[#allocation18_spill] sm:$0xff] %v2905_v29  ;;  %v2907_v30 = vpop.permute.xlu1 %1105  ;;  %v3164_v29 = vld [vmem:[#allocation2 + $0xc0] sm:$0xff] }
 0x134   : > { %4492 = vst [vmem:[#allocation19_spill] sm:$0xff] %v2907_v30 }
 0x135   : > { %995 = vrot.lane.b32.xlu2 %v2909_v32, %s2561_s17 }
 0x137   : > { %v2915_v34 = vpop.permute.xlu2 %1013 }
 0x138   : > { %4493 = vst [vmem:[#allocation20_spill] sm:$0xff] %v2915_v34  ;;  %997 = vrot.lane.b32.xlu0 %v2917_v36, %s2561_s17 }
 0x139   : > { %899 = vrot.lane.b32.xlu1 %v2913_v33, %s2559_s15 }
 0x13a   : > { %v2923_v38 = vpop.permute.xlu0 %979 }
 0x13b   : > { %4494 = vst [vmem:[#allocation21_spill] sm:$0xff] %v2923_v38  ;;  %v2925_v40 = vpop.permute.xlu1 %1235 }
 0x13c   : > { %4495 = vst [vmem:[#allocation22_spill] sm:$0xff] %v2925_v40  ;;  %v3030_v40 = vld [vmem:[#allocation2 + $0x9a] sm:$0xff] }
 0x13d   : > { %1025 = vrot.lane.b32.xlu2 %v2928_v42, %s2561_s17 }
 0x13f   : > { %v2932_v43 = vpop.permute.xlu2 %1137 }
 0x140   : > { %4496 = vst [vmem:[#allocation23_spill] sm:$0xff] %v2932_v43  ;;  %1121 = vrot.lane.b32.xlu0 %v2934_v45, %s2562_s19  ;;  %v3079_v43 = vld [vmem:[#allocation2 + $0xa9] sm:$0xff] }
 0x141   : > { %1123 = vrot.lane.b32.xlu1 %v2936_v46, %s2562_s19 }
 0x142   : > { %v2942_v47 = vpop.permute.xlu0 %1139 }
 0x143   : > { %4497 = vst [vmem:[#allocation24_spill] sm:$0xff] %v2942_v47  ;;  %v2944_v54 = vpop.permute.xlu1 %1011 }
 0x144   : > { %4498 = vst [vmem:[#allocation25_spill] sm:$0xff] %v2944_v54  ;;  %v3087_v54 = vld [vmem:[#allocation2 + $0xb1] sm:$0xff] }
 0x145   : > { %1149 = vrot.lane.b32.xlu2 %v2947_v55, %s2562_s19 }
 0x147   : > { %v2952_v58 = vpop.permute.xlu2 %859 }
 0x148   : > { %4500 = vst [vmem:[#allocation27_spill] sm:$0xff] %v2952_v58  ;;  %1027 = vrot.lane.b32.xlu0 %v2954_v59, %s2561_s17 }
 0x149   : > { %999 = vrot.lane.b32.xlu1 %v2958_v61, %s2561_s17 }
 0x14a   : > { %v2962_v2 = vpop.permute.xlu0 %985 }
 0x14b   : > { %v2964_v7 = vpop.permute.xlu1 %887 }
 0x14c   : > { %4501 = vst [vmem:[#allocation28_spill] sm:$0xff] %v2964_v7  ;;  %v3066_v7 = vld [vmem:[#allocation2 + $0x150] sm:$0xff] }
 0x14d   : > { %871 = vrot.lane.b32.xlu2 %v2966_v10, %s2559_s15  ;;  %4521 = vst [vmem:[#allocation48_spill] sm:$0xff] %v3066_v7 }
 0x14f   : > { %v2973_v22 = vpop.permute.xlu2 %889 }
 0x150   : > { %4502 = vst [vmem:[#allocation29_spill] sm:$0xff] %v2973_v22  ;;  %873 = vrot.lane.b32.xlu0 %v2971_v20, %s2559_s15  ;;  %v3060_v22 = vld [vmem:[#allocation2 + $0x142] sm:$0xff] }
 0x151   : > { %1029 = vrot.lane.b32.xlu1 %v2975_v39, %s2561_s17 }
 0x152   : > { %v2981_v51 = vpop.permute.xlu0 %1109 }
 0x153   : > { %4503 = vst [vmem:[#allocation30_spill] sm:$0xff] %v2981_v51  ;;  %v2983_v52 = vpop.permute.xlu1 %1111  ;;  %v3003_v51 = vld [vmem:[#allocation2 + $0x140] sm:$0xff] }
 0x154   : > { %4504 = vst [vmem:[#allocation31_spill] sm:$0xff] %v2983_v52 }
 0x155   : > { %901 = vrot.lane.b32.xlu2 %v2985_v8, %s2559_s15  ;;  %4509 = vst [vmem:[#allocation36_spill] sm:$0xff] %v3003_v51 }
 0x157   : > { %v2989_v58 = vpop.permute.xlu2 %1143 }
 0x158   : > { %4505 = vst [vmem:[#allocation32_spill] sm:$0xff] %v2989_v58  ;;  %903 = vrot.lane.b32.xlu0 %v2991_v28, %s2559_s15 }
 0x159   : > { %1153 = vrot.lane.b32.xlu1 %v2993_v16, %s2562_s19 }
 0x15a   : > { %v2999_v12 = vpop.permute.xlu0 %1015 }
 0x15b   : > { %4507 = vst [vmem:[#allocation34_spill] sm:$0xff] %v2999_v12  ;;  %v3001_v52 = vpop.permute.xlu1 %987 }
 0x15c   : > { %4508 = vst [vmem:[#allocation35_spill] sm:$0xff] %v3001_v52  ;;  %v404_v52 = vpop.f32.mrf.mxu3 }
 0x15d   : > { %1155 = vrot.lane.b32.xlu2 %v3003_v51, %s2562_s19  ;;  %446 = vst.msk [vmem:[#allocation2 + $0x169] sm:$0xff] %vm417_vm3, %v404_v52  ;;  %v3070_v51 = vld [vmem:[#allocation2 + $0xaa] sm:$0xff] }
 0x15f   : > { %v3009_v1 = vpop.permute.xlu2 %989 }
 0x160   : > { %4510 = vst [vmem:[#allocation37_spill] sm:$0xff] %v3009_v1  ;;  %1127 = vrot.lane.b32.xlu0 %v3011_v11, %s2562_s19  ;;  %v3026_v1 = vld [vmem:[#allocation2 + $0x151] sm:$0xff] }
 0x161   : > { %875 = vrot.lane.b32.xlu1 %v3007_v21, %s2559_s15 }
 0x162   : > { %v3017_v30 = vpop.permute.xlu0 %861 }
 0x163   : > { %4511 = vst [vmem:[#allocation38_spill] sm:$0xff] %v3017_v30  ;;  %v3019_v56 = vpop.permute.xlu1 %1017 }
 0x164   : > { %4512 = vst [vmem:[#allocation39_spill] sm:$0xff] %v3019_v56  ;;  %v470_v52 = vld [vmem:[#allocation2 + $0x169] sm:$0x1] }
 0x165   : > { %1001 = vrot.lane.b32.xlu2 %v3022_v3, %s2561_s17  ;;  %489 = vst.msk [vmem:[#allocation2 + $0x168] sm:$0x1] %vm473_vm4, %v470_v52  ;;  %v407_v52 = vpop.f32.mrf.mxu3  ;;  %v3105_v55 = vld [vmem:[#allocation2 + $0x169] sm:$0xff] }
 0x166   : > { %447 = vst.msk [vmem:[#allocation2 + $0x171] sm:$0xff] %vm417_vm3, %v407_v52 }
 0x167   : > { %v3028_v16 = vpop.permute.xlu2 %1113 }
 0x168   : > { %4513 = vst [vmem:[#allocation40_spill] sm:$0xff] %v3028_v16  ;;  %1003 = vrot.lane.b32.xlu0 %v3030_v40, %s2561_s17 }
 0x169   : > { %905 = vrot.lane.b32.xlu1 %v3026_v1, %s2559_s15 }
 0x16a   : > { %v3036_v30 = vpop.permute.xlu0 %891 }
 0x16b   : > { %4514 = vst [vmem:[#allocation41_spill] sm:$0xff] %v3036_v30  ;;  %v3038_v24 = vpop.permute.xlu1 %1141  ;;  %v3129_v30 = vld [vmem:[#allocation2 + $0xc2] sm:$0xff] }
 0x16c   : > { %4515 = vst [vmem:[#allocation42_spill] sm:$0xff] %v3038_v24 }
 0x16d   : > { %1125 = vrot.lane.b32.xlu2 %v3041_v62, %s2562_s19  ;;  %v507_v52 = vld [vmem:[#allocation2 + $0x178] sm:$0x1]  ;;  %v3142_v24 = vld [vmem:[#allocation2 + $0x170] sm:$0xff] }
 0x16e   : > { %525 = vst.msk [vmem:[#allocation2 + $0x179] sm:$0x1] %vm473_vm4, %v507_v52  ;;  %v3156_v34 = vld [vmem:[#allocation2 + $0x16a] sm:$0xff] }
 0x16f   : > { %v3045_v38 = vpop.permute.xlu2 %1019  ;;  %4533 = vst [vmem:[#allocation60_spill] sm:$0xff] %v3142_v24  ;;  %v3160_v19 = vld [vmem:[#allocation2 + $0x171] sm:$0xff] }
 0x170   : > { %4516 = vst [vmem:[#allocation43_spill] sm:$0xff] %v3045_v38  ;;  %1033 = vrot.lane.b32.xlu0 %v3047_v63, %s2561_s17 }
 0x171   : > { %1159 = vrot.lane.b32.xlu1 %v3049_v18, %s2562_s19 }
 0x172   : > { %v3055_v58 = vpop.permute.xlu0 %1115 }
 0x173   : > { %4518 = vst [vmem:[#allocation45_spill] sm:$0xff] %v3055_v58  ;;  %v3057_v56 = vpop.permute.xlu1 %863 }
 0x174   : > { %4519 = vst [vmem:[#allocation46_spill] sm:$0xff] %v3057_v56  ;;  %v410_v56 = vpop.f32.mrf.mxu3 }
 0x175   : > { %1031 = vrot.lane.b32.xlu2 %v3060_v22, %s2561_s17  ;;  %448 = vst.msk [vmem:[#allocation2 + $0x181] sm:$0xff] %vm417_vm3, %v410_v56 }
 0x176   : > { %453 = vst.msk [vmem:[#allocation2 + $0x199] sm:$0xff] %vm417_vm3, %v410_v56  ;;  %v3100_v56 = vld [vmem:[#allocation2 + $0x159] sm:$0xff] }
 0x177   : > { %v3064_v12 = vpop.permute.xlu2 %865 }
 0x178   : > { %4520 = vst [vmem:[#allocation47_spill] sm:$0xff] %v3064_v12  ;;  %1157 = vrot.lane.b32.xlu0 %v3066_v7, %s2562_s19  ;;  %v3111_v7 = vld [vmem:[#allocation2 + $0x15a] sm:$0xff] }
 0x179   : > { %1005 = vrot.lane.b32.xlu1 %v3070_v51, %s2561_s17 }
 0x17a   : > { %v3074_v58 = vpop.permute.xlu0 %991 }
 0x17b   : > { %4522 = vst [vmem:[#allocation49_spill] sm:$0xff] %v3074_v58  ;;  %v3076_v47 = vpop.permute.xlu1 %893  ;;  %v3089_v58 = vld [vmem:[#allocation2 + $0xa8] sm:$0xff] }
 0x17c   : > { %4523 = vst [vmem:[#allocation50_spill] sm:$0xff] %v3076_v47  ;;  %v413_v47 = vpop.f32.mrf.mxu3  ;;  %v471_v18 = vld [vmem:[#allocation2 + $0x181] sm:$0x1] }
 0x17d   : > { %877 = vrot.lane.b32.xlu2 %v3079_v43, %s2559_s15  ;;  %449 = vst.msk [vmem:[#allocation2 + $0x189] sm:$0xff] %vm417_vm3, %v413_v47 }
 0x17e   : > { %490 = vst.msk [vmem:[#allocation2 + $0x180] sm:$0x1] %vm473_vm4, %v471_v18 }
 0x17f   : > { %v3085_v12 = vpop.permute.xlu2 %895  ;;  %454 = vst.msk [vmem:[#allocation2 + $0x1a1] sm:$0xff] %vm417_vm3, %v413_v47 }
 0x180   : > { %4524 = vst [vmem:[#allocation51_spill] sm:$0xff] %v3085_v12  ;;  %879 = vrot.lane.b32.xlu0 %v3087_v54, %s2559_s15  ;;  %v472_v12 = vld [vmem:[#allocation2 + $0x199] sm:$0x1] }
 0x181   : > { %1129 = vrot.lane.b32.xlu1 %v3089_v58, %s2562_s19  ;;  %491 = vst.msk [vmem:[#allocation2 + $0x198] sm:$0x1] %vm473_vm4, %v472_v12  ;;  %v3122_v12 = vld [vmem:[#allocation2 + $0xb0] sm:$0xff] }
 0x182   : > { %v3095_v52 = vpop.permute.xlu0 %1021 }
 0x183   : > { %4525 = vst [vmem:[#allocation52_spill] sm:$0xff] %v3095_v52  ;;  %v3097_v49 = vpop.permute.xlu1 %1147 }
 0x184   : > { %4526 = vst [vmem:[#allocation53_spill] sm:$0xff] %v3097_v49  ;;  %v508_v49 = vld [vmem:[#allocation2 + $0x190] sm:$0x1] }
 0x185   : > { %907 = vrot.lane.b32.xlu2 %v3100_v56, %s2559_s15  ;;  %526 = vst.msk [vmem:[#allocation2 + $0x191] sm:$0x1] %vm473_vm4, %v508_v49 }
 0x186   : > { %v509_v47 = vld [vmem:[#allocation2 + $0x1a8] sm:$0x1] }
 0x187   : > { %v3109_v52 = vpop.permute.xlu2 %1119  ;;  %527 = vst.msk [vmem:[#allocation2 + $0x1a9] sm:$0x1] %vm473_vm4, %v509_v47 }
 0x188   : > { %4527 = vst [vmem:[#allocation54_spill] sm:$0xff] %v3109_v52  ;;  %909 = vrot.lane.b32.xlu0 %v3105_v55, %s2559_s15  ;;  %v576_v52 = vld [vmem:[#allocation2 + $0xc1] sm:$0xff] }
 0x189   : > { %1035 = vrot.lane.b32.xlu1 %v3111_v7, %s2561_s17 }
 0x18a   : > { %v3117_v18 = vpop.permute.xlu0 %1145 }
 0x18b   : > { %4528 = vst [vmem:[#allocation55_spill] sm:$0xff] %v3117_v18  ;;  %v3119_v38 = vpop.permute.xlu1 %993  ;;  %v3138_v18 = vld [vmem:[#allocation2 + $0xb2] sm:$0xff] }
 0x18c   : > { %4529 = vst [vmem:[#allocation56_spill] sm:$0xff] %v3119_v38 }
 0x18d   : > { %1131 = vrot.lane.b32.xlu2 %v3122_v12, %s2562_s19 }
 0x18f   : > { %v3127_v37 = vpop.permute.xlu2 %995 }
 0x190   : > { %4530 = vst [vmem:[#allocation57_spill] sm:$0xff] %v3127_v37  ;;  %1009 = vrot.lane.b32.xlu0 %v3129_v30, %s2561_s17  ;;  %v3146_v37 = vld [vmem:[#allocation2 + $0xc8] sm:$0xff] }
 0x191   : > { %881 = vrot.lane.b32.xlu1 %v576_v52, %s2559_s15  ;;  %4535 = vst [vmem:[#allocation62_spill] sm:$0xff] %v3146_v37 }
 0x192   : > { %v3134_v38 = vpop.permute.xlu0 %867 }
 0x193   : > { %4531 = vst [vmem:[#allocation58_spill] sm:$0xff] %v3134_v38  ;;  %v3136_v49 = vpop.permute.xlu1 %1117 }
 0x194   : > { %4532 = vst [vmem:[#allocation59_spill] sm:$0xff] %v3136_v49 }
 0x195   : > { %1007 = vrot.lane.b32.xlu2 %v3138_v18, %s2561_s17 }
 0x197   : > { %v3144_v47 = vpop.permute.xlu2 %1025 }
 0x198   : > { %4534 = vst [vmem:[#allocation61_spill] sm:$0xff] %v3144_v47  ;;  %1163 = vrot.lane.b32.xlu0 %v3142_v24, %s2562_s19 }
 0x199   : > { %1135 = vrot.lane.b32.xlu1 %v3146_v37, %s2562_s19  ;;  %v3174_v37 = vld [vmem:[#allocation2 + $0x168] sm:$0xff] }
 0x19a   : > { %v3152_v38 = vpop.permute.xlu0 %897  ;;  %4541 = vst [vmem:[#allocation68_spill] sm:$0xff] %v3174_v37 }
 0x19b   : > { %4536 = vst [vmem:[#allocation63_spill] sm:$0xff] %v3152_v38  ;;  %v3154_v49 = vpop.permute.xlu1 %1023 }
 0x19c   : > { %4537 = vst [vmem:[#allocation64_spill] sm:$0xff] %v3154_v49 }
 0x19d   : > { %1037 = vrot.lane.b32.xlu2 %v3156_v34, %s2561_s17 }
 0x19f   : > { %v3162_v47 = vpop.permute.xlu2 %1149 }
 0x1a0   : > { %4538 = vst [vmem:[#allocation65_spill] sm:$0xff] %v3162_v47  ;;  %1133 = vrot.lane.b32.xlu0 %v3164_v29, %s2562_s19  ;;  %v3180_v47 = vld [vmem:[#allocation2 + $0x172] sm:$0xff] }
 0x1a1   : > { %911 = vrot.lane.b32.xlu1 %v3160_v19, %s2559_s15 }
 0x1a2   : > { %v3170_v24 = vpop.permute.xlu0 %1151 }
 0x1a3   : > { %4539 = vst [vmem:[#allocation66_spill] sm:$0xff] %v3170_v24  ;;  %v3172_v49 = vpop.permute.xlu1 %869 }
 0x1a4   : > { %4540 = vst [vmem:[#allocation67_spill] sm:$0xff] %v3172_v49 }
 0x1a5   : > { %1161 = vrot.lane.b32.xlu2 %v3174_v37, %s2562_s19  ;;  %v3194_v37 = vld [vmem:[#allocation2 + $0x180] sm:$0xff] }
 0x1a7   : > { %v3178_v38 = vpop.permute.xlu2 %871 }
 0x1a8   : > { %4542 = vst [vmem:[#allocation69_spill] sm:$0xff] %v3178_v38  ;;  %1039 = vrot.lane.b32.xlu0 %v3180_v47, %s2561_s17 }
 0x1a9   : > { %1241 = vrot.lane.b32.xlu1 %v2773_v26, %s2560_s16 }
 0x1aa   : > { %v3186_v16 = vpop.permute.xlu0 %997 }
 0x1ab   : > { %4543 = vst [vmem:[#allocation70_spill] sm:$0xff] %v3186_v16  ;;  %v3188_v24 = vpop.permute.xlu1 %899  ;;  %v3204_v16 = vld [vmem:[#allocation2 + $0x188] sm:$0xff] }
 0x1ad   : > { %1243 = vrot.lane.b32.xlu2 %v2800_v41, %s2560_s16 }
 0x1af   : > { %v3192_v49 = vpop.permute.xlu2 %901 }
 0x1b0   : > { %4544 = vst [vmem:[#allocation71_spill] sm:$0xff] %v3192_v49  ;;  %1239 = vrot.lane.b32.xlu0 %v2768_v25, %s2560_s16 }
 0x1b1   : > { %1165 = vrot.lane.b32.xlu1 %v3194_v37, %s2562_s19 }
 0x1b2   : > { %v3200_v38 = vpop.permute.xlu0 %1121 }
 0x1b3   : > { %4545 = vst [vmem:[#allocation72_spill] sm:$0xff] %v3200_v38  ;;  %v3202_v26 = vpop.permute.xlu1 %1123 }
 0x1b4   : > { %4546 = vst [vmem:[#allocation73_spill] sm:$0xff] %v3202_v26 }
 0x1b5   : > { %1167 = vrot.lane.b32.xlu2 %v3204_v16, %s2562_s19 }
 0x1b7   : > { %v3208_v41 = vpop.permute.xlu2 %1155 }
 0x1b8   : > { %1245 = vrot.lane.b32.xlu0 %v2858_v4, %s2560_s16 }
 0x1b9   : > { %1247 = vrot.lane.b32.xlu1 %v2864_v6, %s2560_s16 }
 0x1ba   : > { %v3214_v25 = vpop.permute.xlu0 %1027 }
 0x1bb   : > { %v3216_v49 = vpop.permute.xlu1 %999 }
 0x1bc   : > { %4547 = vst [vmem:[#allocation74_spill] sm:$0xff] %v3216_v49  ;;  %v3304_v49 = vld [vmem:[#allocation2 + $0x189] sm:$0xff] }
 0x1bd   : > { %1249 = vrot.lane.b32.xlu2 %v2897_v27, %s2560_s16  ;;  %4553 = vst [vmem:[#allocation80_spill] sm:$0xff] %v3304_v49 }
 0x1bf   : > { %v3220_v26 = vpop.permute.xlu2 %1001 }
 0x1c0   : > { %4548 = vst [vmem:[#allocation75_spill] sm:$0xff] %v3220_v26  ;;  %1251 = vrot.lane.b32.xlu0 %v2966_v10, %s2560_s16  ;;  %v671_v26 = vld [vmem:[#allocation2 + $0xc9] sm:$0xff] }
 0x1c1   : > { %1253 = vrot.lane.b32.xlu1 %v2971_v20, %s2560_s16 }
 0x1c2   : > { %v3226_v38 = vpop.permute.xlu0 %873 }
 0x1c3   : > { %4549 = vst [vmem:[#allocation76_spill] sm:$0xff] %v3226_v38  ;;  %v3228_v4 = vpop.permute.xlu1 %1029  ;;  %v3316_v38 = vld [vmem:[#allocation2 + $0x32] sm:$0xff] }
 0x1c5   : > { %1255 = vrot.lane.b32.xlu2 %v3007_v21, %s2560_s16 }
 0x1c7   : > { %v3232_v6 = vpop.permute.xlu2 %1125 }
 0x1c8   : > { %4550 = vst [vmem:[#allocation77_spill] sm:$0xff] %v3232_v6  ;;  %1257 = vrot.lane.b32.xlu0 %v3079_v43, %s2560_s16 }
 0x1c9   : > { %1259 = vrot.lane.b32.xlu1 %v3087_v54, %s2560_s16 }
 0x1ca   : > { %v3238_v27 = vpop.permute.xlu0 %903 }
 0x1cb   : > { %v3240_v10 = vpop.permute.xlu1 %1153 }
 0x1cd   : > { %1261 = vrot.lane.b32.xlu2 %v576_v52, %s2560_s16 }
 0x1cf   : > { %v3243_v20 = vpop.permute.xlu2 %1031 }
 0x1d0   : > { %1263 = vrot.lane.b32.xlu0 %v671_v26, %s2560_s16 }
 0x1d1   : > { %1265 = vrot.lane.b32.xlu1 %v2712_v53, %s2560_s16 }
 0x1d2   : > { %v3248_v21 = vpop.permute.xlu0 %1127 }
 0x1d3   : > { %4551 = vst [vmem:[#allocation78_spill] sm:$0xff] %v3248_v21  ;;  %v3250_v43 = vpop.permute.xlu1 %875  ;;  %v686_v21 = vld [vmem:[#allocation2 + $0x181] sm:$0xff] }
 0x1d5   : > { %1267 = vrot.lane.b32.xlu2 %v2737_v9, %s2560_s16 }
 0x1d7   : > { %v3254_v54 = vpop.permute.xlu2 %877 }
 0x1d8   : > { %1269 = vrot.lane.b32.xlu0 %v2782_v31, %s2560_s16 }
 0x1d9   : > { %1271 = vrot.lane.b32.xlu1 %v2788_v35, %s2560_s16 }
 0x1da   : > { %v3260_v52 = vpop.permute.xlu0 %1003 }
 0x1db   : > { %v3262_v26 = vpop.permute.xlu1 %905 }
 0x1dd   : > { %1273 = vrot.lane.b32.xlu2 %v2813_v48, %s2560_s16 }
 0x1df   : > { %v3266_v53 = vpop.permute.xlu2 %907 }
 0x1e0   : > { %1275 = vrot.lane.b32.xlu0 %v2875_v13, %s2560_s16 }
 0x1e1   : > { %1277 = vrot.lane.b32.xlu1 %v2879_v14, %s2560_s16 }
 0x1e2   : > { %v3272_v9 = vpop.permute.xlu0 %1033 }
 0x1e3   : > { %v3274_v31 = vpop.permute.xlu1 %1159 }
 0x1e5   : > { %1279 = vrot.lane.b32.xlu2 %v2913_v33, %s2560_s16 }
 0x1e7   : > { %v3278_v35 = vpop.permute.xlu2 %1131 }
 0x1e8   : > { %1281 = vrot.lane.b32.xlu0 %v2985_v8, %s2560_s16 }
 0x1e9   : > { %1283 = vrot.lane.b32.xlu1 %v2991_v28, %s2560_s16 }
 0x1ea   : > { %v3284_v48 = vpop.permute.xlu0 %1157 }
 0x1eb   : > { %v3286_v13 = vpop.permute.xlu1 %1005 }
 0x1ed   : > { %1285 = vrot.lane.b32.xlu2 %v3026_v1, %s2560_s16 }
 0x1ef   : > { %v3290_v14 = vpop.permute.xlu2 %1007 }
 0x1f0   : > { %1287 = vrot.lane.b32.xlu0 %v3100_v56, %s2560_s16  ;;  %v688_v56 = vld [vmem:[#allocation2 + $0x1a] sm:$0xff] }
 0x1f1   : > { %1289 = vrot.lane.b32.xlu1 %v3105_v55, %s2560_s16 }
 0x1f2   : > { %v3296_v33 = vpop.permute.xlu0 %879 }
 0x1f3   : > { %v3298_v8 = vpop.permute.xlu1 %1129 }
 0x1f4   : > { %4552 = vst [vmem:[#allocation79_spill] sm:$0xff] %v3298_v8 }
 0x1f5   : > { %1291 = vrot.lane.b32.xlu2 %v3160_v19, %s2560_s16  ;;  %v689_v19 = vld [vmem:[#allocation2 + $0x22] sm:$0xff] }
 0x1f7   : > { %v3302_v28 = vpop.permute.xlu2 %1037 }
 0x1f8   : > { %1293 = vrot.lane.b32.xlu0 %v686_v21, %s2560_s16 }
 0x1f9   : > { %1295 = vrot.lane.b32.xlu1 %v3304_v49, %s2560_s16 }
 0x1fa   : > { %v3309_v1 = vpop.permute.xlu0 %909 }
 0x1fb   : > { %v3311_v55 = vpop.permute.xlu1 %1035 }
 0x1fd   : > { %1361 = vrot.lane.b32.xlu2 %v688_v56, %s2563_s18 }
 0x1ff   : > { %v3314_v8 = vpop.permute.xlu2 %1161 }
 0x200   : > { %4554 = vst [vmem:[#allocation81_spill] sm:$0xff] %v3314_v8  ;;  %1363 = vrot.lane.b32.xlu0 %v689_v19, %s2563_s18 }
 0x201   : > { %1365 = vrot.lane.b32.xlu1 %v3316_v38, %s2563_s18 }
 0x202   : > { %v3321_v21 = vpop.permute.xlu0 %1009 }
 0x203   : > { %v3323_v49 = vpop.permute.xlu1 %881 }
 0x205   : > { %1367 = vrot.lane.b32.xlu2 %v2764_v23, %s2563_s18 }
 0x207   : > { %v3327_v6 = vpop.permute.xlu2 %1243 }
 0x208   : > { %4555 = vst [vmem:[#allocation82_spill] sm:$0xff] %v3327_v6  ;;  %1369 = vrot.lane.b32.xlu0 %v2809_v44, %s2563_s18 }
 0x209   : > { %1371 = vrot.lane.b32.xlu1 %v2819_v50, %s2563_s18 }
 0x20a   : > { %v3333_v56 = vpop.permute.xlu0 %1163 }
 0x20b   : > { %4556 = vst [vmem:[#allocation83_spill] sm:$0xff] %v3333_v56  ;;  %v3335_v19 = vpop.permute.xlu1 %1135 }
 0x20d   : > { %1373 = vrot.lane.b32.xlu2 %v2849_v0, %s2563_s18 }
 0x20f   : > { %v3339_v8 = vpop.permute.xlu2 %1167 }
 0x210   : > { %4557 = vst [vmem:[#allocation84_spill] sm:$0xff] %v3339_v8  ;;  %1375 = vrot.lane.b32.xlu0 %v2909_v32, %s2563_s18 }
 0x211   : > { %1377 = vrot.lane.b32.xlu1 %v2917_v36, %s2563_s18 }
 0x212   : > { %v3345_v23 = vpop.permute.xlu0 %1133 }
 0x213   : > { %v3347_v44 = vpop.permute.xlu1 %911 }
 0x214   : > { %4558 = vst [vmem:[#allocation85_spill] sm:$0xff] %v3347_v44 }
 0x215   : > { %1379 = vrot.lane.b32.xlu2 %v2958_v61, %s2563_s18 }
 0x217   : > { %v3351_v50 = vpop.permute.xlu2 %1249 }
 0x218   : > { %4559 = vst [vmem:[#allocation86_spill] sm:$0xff] %v3351_v50  ;;  %1381 = vrot.lane.b32.xlu0 %v3022_v3, %s2563_s18  ;;  %v3376_v50 = vld [vmem:[#allocation2 + $0xda] sm:$0xff] }
 0x219   : > { %1383 = vrot.lane.b32.xlu1 %v3030_v40, %s2563_s18  ;;  %v703_v40 = vld [vmem:[#allocation2 + $0xca] sm:$0xff]  ;;  %4563 = vst [vmem:[#allocation90_spill] sm:$0xff] %v3376_v50 }
 0x21a   : > { %v3357_v0 = vpop.permute.xlu0 %1039 }
 0x21b   : > { %4560 = vst [vmem:[#allocation87_spill] sm:$0xff] %v3357_v0  ;;  %v3359_v32 = vpop.permute.xlu1 %1241 }
 0x21d   : > { %1385 = vrot.lane.b32.xlu2 %v3070_v51, %s2563_s18  ;;  %v3378_v51 = vld [vmem:[#allocation2 + $0xe2] sm:$0xff] }
 0x21e   : > { %4564 = vst [vmem:[#allocation91_spill] sm:$0xff] %v3378_v51 }
 0x21f   : > { %v3363_v36 = vpop.permute.xlu2 %1255 }
 0x220   : > { %4561 = vst [vmem:[#allocation88_spill] sm:$0xff] %v3363_v36  ;;  %1387 = vrot.lane.b32.xlu0 %v3138_v18, %s2563_s18  ;;  %v3388_v36 = vld [vmem:[#allocation2 + $0xf2] sm:$0xff] }
 0x221   : > { %1389 = vrot.lane.b32.xlu1 %v3129_v30, %s2563_s18 }
 0x222   : > { %v3369_v61 = vpop.permute.xlu0 %1239 }
 0x223   : > { %4562 = vst [vmem:[#allocation89_spill] sm:$0xff] %v3369_v61  ;;  %v3371_v3 = vpop.permute.xlu1 %1165 }
 0x225   : > { %1391 = vrot.lane.b32.xlu2 %v703_v40, %s2563_s18 }
 0x227   : > { %v3374_v6 = vpop.permute.xlu2 %1261 }
 0x228   : > { %1393 = vrot.lane.b32.xlu0 %v3376_v50, %s2563_s18 }
 0x229   : > { %1395 = vrot.lane.b32.xlu1 %v3378_v51, %s2563_s18 }
 0x22a   : > { %v3384_v30 = vpop.permute.xlu0 %1245 }
 0x22b   : > { %4565 = vst [vmem:[#allocation92_spill] sm:$0xff] %v3384_v30  ;;  %v3386_v18 = vpop.permute.xlu1 %1247 }
 0x22c   : > { %4566 = vst [vmem:[#allocation93_spill] sm:$0xff] %v3386_v18  ;;  %v724_v18 = vld [vmem:[#allocation2 + $0x50] sm:$0xff] }
 0x22d   : > { %1397 = vrot.lane.b32.xlu2 %v3388_v36, %s2563_s18 }
 0x22f   : > { %v3392_v40 = vpop.permute.xlu2 %1267 }
 0x230   : > { %1399 = vrot.lane.b32.xlu0 %v2838_v60, %s2563_s18 }
 0x231   : > { %1401 = vrot.lane.b32.xlu1 %v2831_v57, %s2563_s18 }
 0x232   : > { %v3398_v50 = vpop.permute.xlu0 %1251 }
 0x233   : > { %4567 = vst [vmem:[#allocation94_spill] sm:$0xff] %v3398_v50  ;;  %v3400_v51 = vpop.permute.xlu1 %1253  ;;  %v721_v50 = vld [vmem:[#allocation2 + $0x30] sm:$0xff] }
 0x234   : > { %4568 = vst [vmem:[#allocation95_spill] sm:$0xff] %v3400_v51  ;;  %v722_v51 = vld [vmem:[#allocation2 + $0x38] sm:$0xff] }
 0x235   : > { %1403 = vrot.lane.b32.xlu2 %v2883_v17, %s2563_s18 }
 0x237   : > { %v3404_v30 = vpop.permute.xlu2 %1273 }
 0x238   : > { %1405 = vrot.lane.b32.xlu0 %v2928_v42, %s2563_s18 }
 0x239   : > { %1407 = vrot.lane.b32.xlu1 %v2954_v59, %s2563_s18 }
 0x23a   : > { %v3410_v61 = vpop.permute.xlu0 %1257 }
 0x23b   : > { %4569 = vst [vmem:[#allocation96_spill] sm:$0xff] %v3410_v61  ;;  %v3412_v60 = vpop.permute.xlu1 %1259 }
 0x23d   : > { %1409 = vrot.lane.b32.xlu2 %v2975_v39, %s2563_s18 }
 0x23f   : > { %v3416_v57 = vpop.permute.xlu2 %1279 }
 0x240   : > { %1411 = vrot.lane.b32.xlu0 %v3060_v22, %s2563_s18 }
 0x241   : > { %1413 = vrot.lane.b32.xlu1 %v3047_v63, %s2563_s18  ;;  %v3438_v63 = vld [vmem:[#allocation2 + $0x182] sm:$0xff] }
 0x242   : > { %v3422_v17 = vpop.permute.xlu0 %1263  ;;  %4570 = vst [vmem:[#allocation97_spill] sm:$0xff] %v3438_v63 }
 0x243   : > { %v3424_v42 = vpop.permute.xlu1 %1265 }
 0x245   : > { %1415 = vrot.lane.b32.xlu2 %v3111_v7, %s2563_s18  ;;  %v3444_v7 = vld [vmem:[#allocation2 + $0x18a] sm:$0xff] }
 0x246   : > { %4572 = vst [vmem:[#allocation99_spill] sm:$0xff] %v3444_v7 }
 0x247   : > { %v3428_v59 = vpop.permute.xlu2 %1285 }
 0x248   : > { %1417 = vrot.lane.b32.xlu0 %v3156_v34, %s2563_s18 }
 0x249   : > { %1419 = vrot.lane.b32.xlu1 %v3180_v47, %s2563_s18 }
 0x24a   : > { %v3434_v39 = vpop.permute.xlu0 %1269 }
 0x24b   : > { %v3436_v22 = vpop.permute.xlu1 %1271 }
 0x24d   : > { %1421 = vrot.lane.b32.xlu2 %v3438_v63, %s2563_s18  ;;  %v723_v63 = vld [vmem:[#allocation2 + $0x48] sm:$0xff] }
 0x24f   : > { %v3442_v61 = vpop.permute.xlu2 %1291 }
 0x250   : > { %4571 = vst [vmem:[#allocation98_spill] sm:$0xff] %v3442_v61  ;;  %1423 = vrot.lane.b32.xlu0 %v3444_v7, %s2563_s18  ;;  %v726_v61 = vld [vmem:[#allocation2 + $0x68] sm:$0xff] }
 0x251   : > { %1489 = vrot.lane.b32.xlu1 %v721_v50, %s2564_s20  ;;  %v725_v50 = vld [vmem:[#allocation2 + $0x60] sm:$0xff] }
 0x252   : > { %v3449_v34 = vpop.permute.xlu0 %1275 }
 0x253   : > { %v3451_v47 = vpop.permute.xlu1 %1277 }
 0x255   : > { %1491 = vrot.lane.b32.xlu2 %v722_v51, %s2564_s20 }
 0x257   : > { %v3454_v8 = vpop.permute.xlu2 %1361 }
 0x258   : > { %4573 = vst [vmem:[#allocation100_spill] sm:$0xff] %v3454_v8  ;;  %1493 = vrot.lane.b32.xlu0 %v723_v63, %s2564_s20 }
 0x259   : > { %1495 = vrot.lane.b32.xlu1 %v724_v18, %s2564_s20 }
 0x25a   : > { %v3458_v0 = vpop.permute.xlu0 %1281 }
 0x25b   : > { %v3460_v7 = vpop.permute.xlu1 %1283 }
 0x25d   : > { %1497 = vrot.lane.b32.xlu2 %v725_v50, %s2564_s20 }
 0x25f   : > { %v3463_v44 = vpop.permute.xlu2 %1367 }
 0x260   : > { %4574 = vst [vmem:[#allocation101_spill] sm:$0xff] %v3463_v44  ;;  %1499 = vrot.lane.b32.xlu0 %v726_v61, %s2564_s20  ;;  %v1845_v44 = vsel %vm417_vm3, %v2748_v15, %v2862_v5  ;;  %v1856_v15 = vsel %vm417_vm3, %v3122_v12, %v3296_v33 }
 0x261   : > { %1501 = vrot.lane.b32.xlu1 %v2934_v45, %s2564_s20 }
 0x262   : > { %v3468_v51 = vpop.permute.xlu0 %1287 }
 0x263   : > { %v3470_v63 = vpop.permute.xlu1 %1289 }
 0x264   : > { %4575 = vst [vmem:[#allocation102_spill] sm:$0xff] %v3470_v63  ;;  %v736_v63 = vld [vmem:[#allocation2 + $0xe0] sm:$0xff] }
 0x265   : > { %1503 = vrot.lane.b32.xlu2 %v2936_v46, %s2564_s20 }
 0x267   : > { %v3474_v18 = vpop.permute.xlu2 %1373 }
 0x268   : > { %4576 = vst [vmem:[#allocation103_spill] sm:$0xff] %v3474_v18  ;;  %1505 = vrot.lane.b32.xlu0 %v3041_v62, %s2564_s20  ;;  %v734_v18 = vld [vmem:[#allocation2 + $0xc8] sm:$0xff] }
 0x269   : > { %1507 = vrot.lane.b32.xlu1 %v3011_v11, %s2564_s20 }
 0x26a   : > { %v3480_v50 = vpop.permute.xlu0 %1293 }
 0x26b   : > { %v3482_v61 = vpop.permute.xlu1 %1295 }
 0x26c   : > { %4577 = vst [vmem:[#allocation104_spill] sm:$0xff] %v3482_v61  ;;  %v1878_v61 = vsel %vm1873_vm5, %v1845_v44, %v2962_v2  ;;  %v737_v44 = vld [vmem:[#allocation2 + $0xf0] sm:$0xff] }
 0x26d   : > { %1509 = vrot.lane.b32.xlu2 %v3089_v58, %s2564_s20 }
 0x26f   : > { %v3486_v45 = vpop.permute.xlu2 %1379 }
 0x270   : > { %4578 = vst [vmem:[#allocation105_spill] sm:$0xff] %v3486_v45  ;;  %1511 = vrot.lane.b32.xlu0 %v3122_v12, %s2564_s20  ;;  %v735_v45 = vld [vmem:[#allocation2 + $0xd8] sm:$0xff] }
 0x271   : > { %1513 = vrot.lane.b32.xlu1 %v3164_v29, %s2564_s20 }
 0x272   : > { %v3492_v46 = vpop.permute.xlu0 %1363 }
 0x273   : > { %v3494_v62 = vpop.permute.xlu1 %1365 }
 0x274   : > { %4579 = vst [vmem:[#allocation106_spill] sm:$0xff] %v3494_v62  ;;  %v4581_v62 = vld [vmem:[#allocation40_spill] sm:$0xff] }
 0x275   : > { %1515 = vrot.lane.b32.xlu2 %v734_v18, %s2564_s20  ;;  %v1911_v56 = vsel %vm1906_vm6, %v1878_v61, %v4581_v62  ;;  %v1889_v61 = vsel %vm1873_vm5, %v1856_v15, %v3290_v14  ;;  %v4583_v15 = vld [vmem:[#allocation18_spill] sm:$0xff] }
 0x276   : > { %v1944_v5 = vsel %vm1939_vm7, %v1911_v56, %v3359_v32  ;;  %v738_v56 = vld [vmem:[#allocation2 + $0xf8] sm:$0xff] }
 0x277   : > { %v3500_v8 = vpop.permute.xlu2 %1385 }
 0x278   : > { %4580 = vst [vmem:[#allocation107_spill] sm:$0xff] %v3500_v8  ;;  %1517 = vrot.lane.b32.xlu0 %v735_v45, %s2564_s20  ;;  %v739_v45 = vld [vmem:[#allocation2 + $0x108] sm:$0xff] }
 0x279   : > { %1519 = vrot.lane.b32.xlu1 %v736_v63, %s2564_s20  ;;  %v1922_v63 = vsel %vm1906_vm6, %v1889_v61, %v3335_v19  ;;  %v4586_v61 = vld [vmem:[#allocation42_spill] sm:$0xff] }
 0x27a   : > { %v1370_v18 = vpop.permute.xlu0 %1369  ;;  %v1955_v12 = vsel %vm1939_vm7, %v1922_v63, %v3422_v17  ;;  %v4585_v17 = vld [vmem:[#allocation20_spill] sm:$0xff] }
 0x27b   : > { %v3513_v8 = vpop.permute.xlu1 %1371  ;;  %v3516_v2 = vsel %vm1972_vm8, %v1944_v5, %v1370_v18  ;;  %v4584_v5 = vld [vmem:[#allocation3_spill] sm:$0xff] }
 0x27c   : > { %4582 = vst [vmem:[#allocation40_spill] sm:$0xff] %v3513_v8  ;;  %v1859_v19 = vsel %vm417_vm3, %v4584_v5, %v4583_v15  ;;  %v740_v18 = vld [vmem:[#allocation2 + $0x110] sm:$0xff]  ;;  %v742_v8 = vld [vmem:[#allocation2 + $0x128] sm:$0xff] }
 0x27d   : > { %1521 = vrot.lane.b32.xlu2 %v737_v44, %s2564_s20  ;;  %v1892_v44 = vsel %vm1873_vm5, %v1859_v19, %v4585_v17  ;;  %v4588_v19 = vld [vmem:[#allocation41_spill] sm:$0xff] }
 0x27e   : > { %v1925_v63 = vsel %vm1906_vm6, %v1892_v44, %v4586_v61  ;;  %v743_v44 = vld [vmem:[#allocation2 + $0x138] sm:$0xff] }
 0x27f   : > { %v1392_v33 = vpop.permute.xlu2 %1391 }
 0x280   : > { %v3526_v32 = vsel %vm1972_vm8, %v1955_v12, %v1392_v33  ;;  %1523 = vrot.lane.b32.xlu0 %v738_v56, %s2564_s20  ;;  %v1958_v12 = vsel %vm1939_vm7, %v1925_v63, %v3434_v39  ;;  %v741_v56 = vld [vmem:[#allocation2 + $0x120] sm:$0xff]  ;;  %v4590_v39 = vld [vmem:[#allocation43_spill] sm:$0xff] }
 0x281   : > { %1525 = vrot.lane.b32.xlu1 %v739_v45, %s2564_s20  ;;  %v4591_v63 = vld [vmem:[#allocation53_spill] sm:$0xff] }
 0x282   : > { %v3530_v62 = vpop.permute.xlu0 %1375 }
 0x283   : > { %v3532_v14 = vpop.permute.xlu1 %1377 }
 0x285   : > { %1527 = vrot.lane.b32.xlu2 %v740_v18, %s2564_s20  ;;  %v4589_v18 = vld [vmem:[#allocation4_spill] sm:$0xff] }
 0x286   : > { %v1862_v17 = vsel %vm417_vm3, %v4589_v18, %v4588_v19  ;;  %v1855_v19 = vsel %vm417_vm3, %v3089_v58, %v3254_v54 }
 0x287   : > { %v1398_v33 = vpop.permute.xlu2 %1397  ;;  %v1895_v61 = vsel %vm1873_vm5, %v1862_v17, %v4590_v39  ;;  %v4594_v39 = vld [vmem:[#allocation26_spill] sm:$0xff] }
 0x288   : > { %v3545_v45 = vsel %vm1972_vm8, %v1958_v12, %v1398_v33  ;;  %1529 = vrot.lane.b32.xlu0 %v741_v56, %s2564_s20  ;;  %v1928_v12 = vsel %vm1906_vm6, %v1895_v61, %v4591_v63 }
 0x289   : > { %4587 = vst [vmem:[#allocation18_spill] sm:$0xff] %v3545_v45  ;;  %1531 = vrot.lane.b32.xlu1 %v742_v8, %s2564_s20  ;;  %v1854_v8 = vsel %vm417_vm3, %v3011_v11, %v3250_v43  ;;  %v1961_v33 = vsel %vm1939_vm7, %v1928_v12, %v3449_v34  ;;  %v744_v45 = vld [vmem:[#allocation2 + $0x140] sm:$0xff]  ;;  %v1888_v43 = vsel %vm1873_vm5, %v1855_v19, %v3286_v13  ;;  %v4592_v34 = vld [vmem:[#allocation48_spill] sm:$0xff] }
 0x28a   : > { %v3549_v15 = vpop.permute.xlu0 %1381  ;;  %v1887_v18 = vsel %vm1873_vm5, %v1854_v8, %v3260_v52  ;;  %v1921_v54 = vsel %vm1906_vm6, %v1888_v43, %v3345_v23  ;;  %v4595_v8 = vld [vmem:[#allocation61_spill] sm:$0xff] }
 0x28b   : > { %v3551_v5 = vpop.permute.xlu1 %1383  ;;  %v1920_v11 = vsel %vm1906_vm6, %v1887_v18, %v3278_v35  ;;  %v1857_v35 = vsel %vm417_vm3, %v3164_v29, %v3323_v49  ;;  %v1954_v13 = vsel %vm1939_vm7, %v1921_v54, %v3374_v6  ;;  %v4599_v19 = vld [vmem:[#allocation25_spill] sm:$0xff] }
 0x28c   : > { %v1953_v52 = vsel %vm1939_vm7, %v1920_v11, %v3412_v60  ;;  %v4596_v60 = vld [vmem:[#allocation44_spill] sm:$0xff]  ;;  %v1890_v6 = vsel %vm1873_vm5, %v1857_v35, %v3321_v21 }
 0x28d   : > { %1533 = vrot.lane.b32.xlu2 %v743_v44, %s2564_s20  ;;  %v4593_v44 = vld [vmem:[#allocation63_spill] sm:$0xff]  ;;  %v4603_v21 = vld [vmem:[#allocation24_spill] sm:$0xff] }
 0x28e   : > { %v1865_v58 = vsel %vm417_vm3, %v4594_v39, %v4593_v44  ;;  %v4600_v39 = vld [vmem:[#allocation68_spill] sm:$0xff] }
 0x28f   : > { %v1404_v56 = vpop.permute.xlu2 %1403  ;;  %v1898_v23 = vsel %vm1873_vm5, %v1865_v58, %v4595_v8  ;;  %v4601_v58 = vld [vmem:[#allocation23_spill] sm:$0xff]  ;;  %v4604_v8 = vld [vmem:[#allocation36_spill] sm:$0xff] }
 0x290   : > { %v3572_v17 = vsel %vm1972_vm8, %v1961_v33, %v1404_v56  ;;  %1535 = vrot.lane.b32.xlu0 %v744_v45, %s2564_s20  ;;  %v4597_v33 = vld [vmem:[#allocation5_spill] sm:$0xff]  ;;  %v4598_v56 = vld [vmem:[#allocation62_spill] sm:$0xff]  ;;  %v1931_v49 = vsel %vm1906_vm6, %v1898_v23, %v3240_v10  ;;  %v1923_v54 = vsel %vm1906_vm6, %v1890_v6, %v4601_v58  ;;  %v4602_v10 = vld [vmem:[#allocation60_spill] sm:$0xff]  ;;  %v1868_v23 = vsel %vm417_vm3, %v4604_v8, %v3238_v27 }
 0x291   : > { %1537 = vrot.lane.b32.xlu1 %v4592_v34, %s2564_s20  ;;  %v1858_v29 = vsel %vm417_vm3, %v4598_v56, %v4597_v33  ;;  %v1964_v11 = vsel %vm1939_vm7, %v1931_v49, %v3458_v0  ;;  %v2535_v56 = vld [vmem:[#allocation2 + $0xe0] sm:$0xff] }
 0x292   : > { %v1388_v45 = vpop.permute.xlu0 %1387  ;;  %v1891_v18 = vsel %vm1873_vm5, %v1858_v29, %v4599_v19  ;;  %v4605_v29 = vld [vmem:[#allocation28_spill] sm:$0xff] }
 0x293   : > { %v1390_v61 = vpop.permute.xlu1 %1389  ;;  %v3594_v63 = vsel %vm1972_vm8, %v1953_v52, %v1388_v45  ;;  %v1924_v52 = vsel %vm1906_vm6, %v1891_v18, %v4603_v21  ;;  %v1956_v45 = vsel %vm1939_vm7, %v1923_v54, %v3424_v42  ;;  %v1860_v49 = vsel %vm417_vm3, %v2535_v56, %v4605_v29  ;;  %v769_v29 = vld [vmem:[#allocation2 + $0xf1] sm:$0xff] }
 0x294   : > { %v3597_v12 = vsel %vm1972_vm8, %v1954_v13, %v1390_v61  ;;  %v1957_v35 = vsel %vm1939_vm7, %v1924_v52, %v3392_v40  ;;  %v1901_v42 = vsel %vm1873_vm5, %v1868_v23, %v3243_v20  ;;  %v4606_v40 = vld [vmem:[#allocation34_spill] sm:$0xff]  ;;  %v751_v20 = vld [vmem:[#allocation2 + $0x198] sm:$0xff] }
 0x295   : > { %1539 = vrot.lane.b32.xlu2 %v4596_v60, %s2564_s20  ;;  %v1893_v6 = vsel %vm1873_vm5, %v1860_v49, %v4606_v40  ;;  %v1934_v19 = vsel %vm1906_vm6, %v1901_v42, %v3274_v31  ;;  %v4609_v52 = vld [vmem:[#allocation32_spill] sm:$0xff]  ;;  %v4612_v42 = vld [vmem:[#allocation50_spill] sm:$0xff] }
 0x296   : > { %v1967_v27 = vsel %vm1939_vm7, %v1934_v19, %v3468_v51  ;;  %v1926_v31 = vsel %vm1906_vm6, %v1893_v6, %v4609_v52  ;;  %v4610_v51 = vld [vmem:[#allocation55_spill] sm:$0xff]  ;;  %v4613_v40 = vld [vmem:[#allocation8_spill] sm:$0xff] }
 0x297   : > { %v1410_v43 = vpop.permute.xlu2 %1409  ;;  %v1863_v6 = vsel %vm417_vm3, %v4613_v40, %v4612_v42 }
 0x298   : > { %v3615_v44 = vsel %vm1972_vm8, %v1964_v11, %v1410_v43  ;;  %1541 = vrot.lane.b32.xlu0 %v4600_v39, %s2564_s20  ;;  %v2536_v11 = vld [vmem:[#allocation2 + $0xf0] sm:$0xff]  ;;  %v4607_v43 = vld [vmem:[#allocation29_spill] sm:$0xff] }
 0x299   : > { %1543 = vrot.lane.b32.xlu1 %v4602_v10, %s2564_s20  ;;  %v1861_v58 = vsel %vm417_vm3, %v2536_v11, %v4607_v43  ;;  %v2537_v11 = vld [vmem:[#allocation2 + $0x110] sm:$0xff] }
 0x29a   : > { %v1394_v0 = vpop.permute.xlu0 %1393  ;;  %v4615_v43 = vld [vmem:[#allocation51_spill] sm:$0xff] }
 0x29b   : > { %v1396_v13 = vpop.permute.xlu1 %1395  ;;  %v3630_v61 = vsel %vm1972_vm8, %v1956_v45, %v1394_v0  ;;  %v1871_v0 = vsel %vm417_vm3, %v4600_v39, %v3309_v1  ;;  %v529_v1 = vld [vmem:[#allocation2 + $0x8] sm:$0xff] }
 0x29c   : > { %v3636_v33 = vsel %vm1972_vm8, %v1957_v35, %v1396_v13  ;;  %v1959_v35 = vsel %vm1939_vm7, %v1926_v31, %v3436_v22  ;;  %v1904_v49 = vsel %vm1873_vm5, %v1871_v0, %v3302_v28  ;;  %v4611_v39 = vld [vmem:[#allocation14_spill] sm:$0xff]  ;;  %v4618_v31 = vld [vmem:[#allocation65_spill] sm:$0xff] }
 0x29d   : > { %1545 = vrot.lane.b32.xlu2 %v3194_v37, %s2564_s20  ;;  %v4608_v37 = vld [vmem:[#allocation39_spill] sm:$0xff]  ;;  %v1937_v22 = vsel %vm1906_vm6, %v1904_v49, %v3371_v3 }
 0x29e   : > { %v1894_v21 = vsel %vm1873_vm5, %v1861_v58, %v4608_v37  ;;  %v1970_v19 = vsel %vm1939_vm7, %v1937_v22, %v3480_v50  ;;  %v1864_v58 = vsel %vm417_vm3, %v2537_v11, %v4615_v43  ;;  %v4617_v50 = vld [vmem:[#allocation64_spill] sm:$0xff]  ;;  %v771_v11 = vld [vmem:[#allocation2 + $0x109] sm:$0xff] }
 0x29f   : > { %v1416_v18 = vpop.permute.xlu2 %1415  ;;  %v1927_v45 = vsel %vm1906_vm6, %v1894_v21, %v4610_v51  ;;  %v770_v21 = vld [vmem:[#allocation2 + $0xf9] sm:$0xff]  ;;  %v1897_v52 = vsel %vm1873_vm5, %v1864_v58, %v4617_v50 }
 0x2a0   : > { %v3653_v54 = vsel %vm1972_vm8, %v1967_v27, %v1416_v18  ;;  %1547 = vrot.lane.b32.xlu0 %v3204_v16, %s2564_s20  ;;  %v1960_v16 = vsel %vm1939_vm7, %v1927_v45, %v3404_v30  ;;  %v1842_v30 = vsel %vm417_vm3, %v529_v1, %v4611_v39  ;;  %v4614_v18 = vld [vmem:[#allocation21_spill] sm:$0xff]  ;;  %v4619_v45 = vld [vmem:[#allocation66_spill] sm:$0xff]  ;;  %v4621_v39 = vld [vmem:[#allocation16_spill] sm:$0xff] }
 0x2a1   : > { %1549 = vrot.lane.b32.xlu1 %v751_v20, %s2564_s20  ;;  %v1875_v28 = vsel %vm1873_vm5, %v1842_v30, %v4614_v18  ;;  %v4616_v20 = vld [vmem:[#allocation52_spill] sm:$0xff]  ;;  %v1930_v0 = vsel %vm1906_vm6, %v1897_v52, %v4619_v45  ;;  %v1866_v30 = vsel %vm417_vm3, %v4621_v39, %v3188_v24  ;;  %v4624_v18 = vld [vmem:[#allocation33_spill] sm:$0xff] }
 0x2a2   : > { %v1400_v13 = vpop.permute.xlu0 %1399  ;;  %v1896_v3 = vsel %vm1873_vm5, %v1863_v6, %v4616_v20  ;;  %v802_v22 = vld [vmem:[#allocation2 + $0xfa] sm:$0xff] }
 0x2a3   : > { %v1402_v8 = vpop.permute.xlu1 %1401  ;;  %v3672_v23 = vsel %vm1972_vm8, %v1959_v35, %v1400_v13  ;;  %v1929_v51 = vsel %vm1906_vm6, %v1896_v3, %v4618_v31  ;;  %v528_v45 = vld [vmem:[#allocation2] sm:$0xff] }
 0x2a4   : > { %v3675_v56 = vsel %vm1972_vm8, %v1960_v16, %v1402_v8  ;;  %v1962_v35 = vsel %vm1939_vm7, %v1929_v51, %v3451_v47  ;;  %v4620_v16 = vld [vmem:[#allocation7_spill] sm:$0xff]  ;;  %v4622_v47 = vld [vmem:[#allocation22_spill] sm:$0xff]  ;;  %v754_v51 = vld [vmem:[#allocation2 + $0x39] sm:$0xff] }
 0x2a5   : > { %1649 = vrot.lane.b32.xlu2 %v769_v29, %s2565_s21  ;;  %v1908_v8 = vsel %vm1906_vm6, %v1875_v28, %v4620_v16  ;;  %v2538_v16 = vld [vmem:[#allocation2 + $0x50] sm:$0xff] }
 0x2a6   : > { %v1941_v42 = vsel %vm1939_vm7, %v1908_v8, %v4622_v47  ;;  %v4629_v8 = vld [vmem:[#allocation46_spill] sm:$0xff] }
 0x2a7   : > { %v1422_v27 = vpop.permute.xlu2 %1421  ;;  %v1974_v40 = vsel %vm1972_vm8, %v1941_v42, %v3492_v46 }
 0x2a8   : > { %v3696_v37 = vsel %vm1972_vm8, %v1970_v19, %v1422_v27  ;;  %1777 = vrot.lane.b32.xlu0 %v3388_v36, %s2566_s22  ;;  %v1963_v36 = vsel %vm1939_vm7, %v1930_v0, %v3416_v57  ;;  %v1899_v57 = vsel %vm1873_vm5, %v1866_v30, %v3214_v25  ;;  %v753_v19 = vld [vmem:[#allocation2 + $0x31] sm:$0xff]  ;;  %v4631_v30 = vld [vmem:[#allocation49_spill] sm:$0xff] }
 0x2a9   : > { %1651 = vrot.lane.b32.xlu1 %v770_v21, %s2565_s21  ;;  %v4623_v27 = vld [vmem:[#allocation71_spill] sm:$0xff]  ;;  %v1932_v25 = vsel %vm1906_vm6, %v1899_v57, %v3208_v41  ;;  %v1869_v41 = vsel %vm417_vm3, %v4592_v34, %v3262_v26  ;;  %v4625_v26 = vld [vmem:[#allocation81_spill] sm:$0xff] }
 0x2aa   : > { %v1406_v13 = vpop.permute.xlu0 %1405  ;;  %v1867_v28 = vsel %vm417_vm3, %v4624_v18, %v4623_v27  ;;  %v1965_v58 = vsel %vm1939_vm7, %v1932_v25, %v3460_v7  ;;  %v803_v7 = vld [vmem:[#allocation2 + $0x10a] sm:$0xff]  ;;  %v1902_v52 = vsel %vm1873_vm5, %v1869_v41, %v3272_v9  ;;  %v4636_v25 = vld [vmem:[#allocation93_spill] sm:$0xff] }
 0x2ab   : > { %v1408_v29 = vpop.permute.xlu1 %1407  ;;  %v3714_v49 = vsel %vm1972_vm8, %v1962_v35, %v1406_v13  ;;  %v1900_v43 = vsel %vm1873_vm5, %v1867_v28, %v3228_v4  ;;  %v1935_v34 = vsel %vm1906_vm6, %v1902_v52, %v4625_v26  ;;  %v4627_v9 = vld [vmem:[#allocation102_spill] sm:$0xff]  ;;  %v772_v57 = vld [vmem:[#allocation2 + $0x111] sm:$0xff]  ;;  %v786_v41 = vld [vmem:[#allocation2 + $0x3a] sm:$0xff] }
 0x2ac   : > { %v3717_v1 = vsel %vm1972_vm8, %v1963_v36, %v1408_v29  ;;  %v1933_v46 = vsel %vm1906_vm6, %v1900_v43, %v3284_v48  ;;  %v1968_v0 = vsel %vm1939_vm7, %v1935_v34, %v4627_v9  ;;  %v4628_v35 = vld [vmem:[#allocation10_spill] sm:$0xff]  ;;  %v4639_v52 = vld [vmem:[#allocation11_spill] sm:$0xff]  ;;  %v2539_v34 = vld [vmem:[#allocation2 + $0x78] sm:$0xff] }
 0x2ad   : > { %1779 = vrot.lane.b32.xlu2 %v802_v22, %s2566_s22  ;;  %v1966_v3 = vsel %vm1939_vm7, %v1933_v46, %v3428_v59  ;;  %v1870_v59 = vsel %vm417_vm3, %v4596_v60, %v3266_v53  ;;  %v4626_v53 = vld [vmem:[#allocation83_spill] sm:$0xff]  ;;  %v1841_v13 = vsel %vm417_vm3, %v528_v45, %v4628_v35  ;;  %v4630_v36 = vld [vmem:[#allocation98_spill] sm:$0xff]  ;;  %v2540_v35 = vld [vmem:[#allocation2 + $0x18] sm:$0xff] }
 0x2ae   : > { %v4634_v18 = vld [vmem:[#allocation6_spill] sm:$0xff]  ;;  %v4641_v45 = vld [vmem:[#allocation67_spill] sm:$0xff] }
 0x2af   : > { %v1492_v6 = vpop.permute.xlu2 %1491  ;;  %v1874_v28 = vsel %vm1873_vm5, %v1841_v13, %v4634_v18  ;;  %v4643_v13 = vld [vmem:[#allocation9_spill] sm:$0xff] }
 0x2b0   : > { %v3733_v24 = vsel %vm2005_vm9, %v1974_v40, %v1492_v6  ;;  %1617 = vrot.lane.b32.xlu0 %v753_v19, %s2565_s21  ;;  %v4632_v40 = vld [vmem:[#allocation54_spill] sm:$0xff]  ;;  %v4633_v19 = vld [vmem:[#allocation85_spill] sm:$0xff] }
 0x2b1   : > { %1653 = vrot.lane.b32.xlu1 %v771_v11, %s2565_s21  ;;  %v1872_v27 = vsel %vm417_vm3, %v4602_v10, %v4633_v19  ;;  %v4635_v11 = vld [vmem:[#allocation87_spill] sm:$0xff]  ;;  %v2541_v18 = vld [vmem:[#allocation2 + $0x20] sm:$0xff] }
 0x2b2   : > { %v1412_v20 = vpop.permute.xlu0 %1411  ;;  %v1905_v43 = vsel %vm1873_vm5, %v1872_v27, %v4635_v11  ;;  %v4648_v19 = vld [vmem:[#allocation95_spill] sm:$0xff] }
 0x2b3   : > { %v1414_v21 = vpop.permute.xlu1 %1413  ;;  %v3748_v50 = vsel %vm1972_vm8, %v1965_v58, %v1412_v20  ;;  %v4637_v58 = vld [vmem:[#allocation19_spill] sm:$0xff] }
 0x2b4   : > { %v3751_v4 = vsel %vm1972_vm8, %v1966_v3, %v1414_v21  ;;  %v1907_v20 = vsel %vm1906_vm6, %v1874_v28, %v4637_v58  ;;  %v4649_v28 = vld [vmem:[#allocation12_spill] sm:$0xff]  ;;  %v4650_v58 = vld [vmem:[#allocation13_spill] sm:$0xff] }
 0x2b5   : > { %1745 = vrot.lane.b32.xlu2 %v3316_v38, %s2566_s22  ;;  %v1903_v38 = vsel %vm1873_vm5, %v1870_v59, %v3311_v55  ;;  %v1848_v55 = vsel %vm417_vm3, %v2538_v16, %v4629_v8  ;;  %v1843_v16 = vsel %vm417_vm3, %v2540_v35, %v4643_v13  ;;  %v4644_v8 = vld [vmem:[#allocation70_spill] sm:$0xff]  ;;  %v1844_v11 = vsel %vm417_vm3, %v2541_v18, %v4649_v28 }
 0x2b6   : > { %v1936_v60 = vsel %vm1906_vm6, %v1903_v38, %v4626_v53  ;;  %v1881_v47 = vsel %vm1873_vm5, %v1848_v55, %v4631_v30  ;;  %v4640_v38 = vld [vmem:[#allocation104_spill] sm:$0xff]  ;;  %v1851_v53 = vsel %vm417_vm3, %v2539_v34, %v4641_v45  ;;  %v4656_v35 = vld [vmem:[#allocation38_spill] sm:$0xff] }
 0x2b7   : > { %v1498_v48 = vpop.permute.xlu2 %1497  ;;  %v1969_v29 = vsel %vm1939_vm7, %v1936_v60, %v4630_v36  ;;  %v1914_v6 = vsel %vm1906_vm6, %v1881_v47, %v4632_v40  ;;  %v4642_v60 = vld [vmem:[#allocation100_spill] sm:$0xff]  ;;  %v1884_v55 = vsel %vm1873_vm5, %v1851_v53, %v4644_v8  ;;  %v4646_v47 = vld [vmem:[#allocation77_spill] sm:$0xff]  ;;  %v4647_v40 = vld [vmem:[#allocation30_spill] sm:$0xff] }
 0x2b8   : > { %v3765_v31 = vsel %vm2005_vm9, %v3516_v2, %v1498_v48  ;;  %1781 = vrot.lane.b32.xlu0 %v803_v7, %s2566_s22  ;;  %v1947_v46 = vsel %vm1939_vm7, %v1914_v6, %v4636_v25  ;;  %v804_v48 = vld [vmem:[#allocation2 + $0x112] sm:$0xff] }
 0x2b9   : > { %1619 = vrot.lane.b32.xlu1 %v754_v51, %s2565_s21  ;;  %v1980_v3 = vsel %vm1972_vm8, %v1947_v46, %v3530_v62  ;;  %v4638_v7 = vld [vmem:[#allocation84_spill] sm:$0xff]  ;;  %v1940_v51 = vsel %vm1939_vm7, %v1907_v20, %v4639_v52  ;;  %v773_v46 = vld [vmem:[#allocation2 + $0x121] sm:$0xff]  ;;  %v1877_v20 = vsel %vm1873_vm5, %v1844_v11, %v4650_v58 }
 0x2ba   : > { %v1418_v2 = vpop.permute.xlu0 %1417  ;;  %v1938_v59 = vsel %vm1906_vm6, %v1905_v43, %v4638_v7  ;;  %v1973_v9 = vsel %vm1972_vm8, %v1940_v51, %v4642_v60  ;;  %v4652_v7 = vld [vmem:[#allocation17_spill] sm:$0xff]  ;;  %v4654_v51 = vld [vmem:[#allocation106_spill] sm:$0xff]  ;;  %v756_v8 = vld [vmem:[#allocation2 + $0x51] sm:$0xff] }
 0x2bb   : > { %v1420_v22 = vpop.permute.xlu1 %1419  ;;  %v3784_v39 = vsel %vm1972_vm8, %v1968_v0, %v1418_v2  ;;  %v1971_v26 = vsel %vm1939_vm7, %v1938_v59, %v4640_v38  ;;  %v788_v11 = vld [vmem:[#allocation2 + $0x52] sm:$0xff]  ;;  %v2544_v58 = vld [vmem:[#allocation2 + $0x60] sm:$0xff] }
 0x2bc   : > { %v3789_v42 = vsel %vm1972_vm8, %v1969_v29, %v1420_v22  ;;  %v755_v29 = vld [vmem:[#allocation2 + $0x49] sm:$0xff] }
 0x2bd   : > { %1655 = vrot.lane.b32.xlu2 %v772_v57, %s2565_s21  ;;  %v4645_v22 = vld [vmem:[#allocation15_spill] sm:$0xff]  ;;  %v1917_v57 = vsel %vm1906_vm6, %v1884_v55, %v4646_v47  ;;  %v4657_v55 = vld [vmem:[#allocation37_spill] sm:$0xff] }
 0x2be   : > { %v1876_v30 = vsel %vm1873_vm5, %v1843_v16, %v4645_v22  ;;  %v1950_v27 = vsel %vm1939_vm7, %v1917_v57, %v4648_v19  ;;  %v4658_v47 = vld [vmem:[#allocation59_spill] sm:$0xff] }
 0x2bf   : > { %v1504_v21 = vpop.permute.xlu2 %1503  ;;  %v1909_v6 = vsel %vm1906_vm6, %v1876_v30, %v4647_v40  ;;  %v1983_v43 = vsel %vm1972_vm8, %v1950_v27, %v3549_v15  ;;  %v4653_v15 = vld [vmem:[#allocation89_spill] sm:$0xff]  ;;  %v774_v30 = vld [vmem:[#allocation2 + $0x129] sm:$0xff]  ;;  %v4659_v40 = vld [vmem:[#allocation92_spill] sm:$0xff] }
 0x2c0   : > { %v3808_v10 = vsel %vm2005_vm9, %v1980_v3, %v1504_v21  ;;  %1747 = vrot.lane.b32.xlu0 %v786_v41, %s2566_s22  ;;  %v787_v21 = vld [vmem:[#allocation2 + $0x4a] sm:$0xff]  ;;  %v1942_v59 = vsel %vm1939_vm7, %v1909_v6, %v4652_v7 }
 0x2c1   : > { %1783 = vrot.lane.b32.xlu1 %v804_v48, %s2566_s22  ;;  %v4651_v41 = vld [vmem:[#allocation31_spill] sm:$0xff]  ;;  %v1975_v38 = vsel %vm1972_vm8, %v1942_v59, %v4654_v51  ;;  %v4665_v51 = vld [vmem:[#allocation72_spill] sm:$0xff] }
 0x2c2   : > { %v1424_v62 = vpop.permute.xlu0 %1423  ;;  %v1910_v48 = vsel %vm1906_vm6, %v1877_v20, %v4651_v41  ;;  %v4660_v27 = vld [vmem:[#allocation103_spill] sm:$0xff]  ;;  %v4663_v41 = vld [vmem:[#allocation56_spill] sm:$0xff] }
 0x2c3   : > { %v1490_v0 = vpop.permute.xlu1 %1489  ;;  %v3823_v2 = vsel %vm1972_vm8, %v1971_v26, %v1424_v62  ;;  %v1943_v52 = vsel %vm1939_vm7, %v1910_v48, %v4653_v15  ;;  %v4655_v62 = vld [vmem:[#allocation101_spill] sm:$0xff]  ;;  %v4662_v20 = vld [vmem:[#allocation47_spill] sm:$0xff] }
 0x2c4   : > { %v3830_v36 = vsel %vm2005_vm9, %v1973_v9, %v1490_v0  ;;  %v1976_v34 = vsel %vm1972_vm8, %v1943_v52, %v4655_v62  ;;  %v805_v9 = vld [vmem:[#allocation2 + $0x122] sm:$0xff]  ;;  %v806_v59 = vld [vmem:[#allocation2 + $0x12a] sm:$0xff] }
 0x2c5   : > { %1621 = vrot.lane.b32.xlu2 %v755_v29, %s2565_s21  ;;  %v2542_v0 = vld [vmem:[#allocation2 + $0x48] sm:$0xff]  ;;  %v4664_v15 = vld [vmem:[#allocation57_spill] sm:$0xff] }
 0x2c6   : > { %v1847_v13 = vsel %vm417_vm3, %v2542_v0, %v4656_v35  ;;  %v757_v62 = vld [vmem:[#allocation2 + $0x61] sm:$0xff] }
 0x2c7   : > { %v1510_v25 = vpop.permute.xlu2 %1509  ;;  %v1880_v29 = vsel %vm1873_vm5, %v1847_v13, %v4657_v55  ;;  %v4668_v35 = vld [vmem:[#allocation94_spill] sm:$0xff] }
 0x2c8   : > { %v3848_v3 = vsel %vm2005_vm9, %v1983_v43, %v1510_v25  ;;  %1657 = vrot.lane.b32.xlu0 %v773_v46, %s2565_s21  ;;  %v1913_v57 = vsel %vm1906_vm6, %v1880_v29, %v4658_v47  ;;  %v2543_v43 = vld [vmem:[#allocation2 + $0x68] sm:$0xff] }
 0x2c9   : > { %1749 = vrot.lane.b32.xlu1 %v787_v21, %s2566_s22  ;;  %v1946_v6 = vsel %vm1939_vm7, %v1913_v57, %v4659_v40  ;;  %v4661_v25 = vld [vmem:[#allocation58_spill] sm:$0xff]  ;;  %v1849_v21 = vsel %vm417_vm3, %v2544_v58, %v4662_v20  ;;  %v775_v57 = vld [vmem:[#allocation2 + $0x139] sm:$0xff]  ;;  %v2545_v40 = vld [vmem:[#allocation2 + $0x90] sm:$0xff] }
 0x2ca   : > { %v1494_v26 = vpop.permute.xlu0 %1493  ;;  %v1979_v18 = vsel %vm1972_vm8, %v1946_v6, %v4660_v27  ;;  %v1850_v46 = vsel %vm417_vm3, %v2543_v43, %v4661_v25  ;;  %v1882_v48 = vsel %vm1873_vm5, %v1849_v21, %v4663_v41  ;;  %v4670_v6 = vld [vmem:[#allocation76_spill] sm:$0xff]  ;;  %v4673_v58 = vld [vmem:[#allocation78_spill] sm:$0xff]  ;;  %v4674_v21 = vld [vmem:[#allocation75_spill] sm:$0xff] }
 0x2cb   : > { %v1496_v45 = vpop.permute.xlu1 %1495  ;;  %v3863_v53 = vsel %vm2005_vm9, %v1975_v38, %v1494_v26  ;;  %v1883_v52 = vsel %vm1873_vm5, %v1850_v46, %v4664_v15  ;;  %v1915_v38 = vsel %vm1906_vm6, %v1882_v48, %v4665_v51  ;;  %v1853_v27 = vsel %vm417_vm3, %v2545_v40, %v4670_v6  ;;  %v789_v46 = vld [vmem:[#allocation2 + $0x62] sm:$0xff] }
 0x2cc   : > { %v3866_v60 = vsel %vm2005_vm9, %v1976_v34, %v1496_v45  ;;  %v4666_v34 = vld [vmem:[#allocation73_spill] sm:$0xff]  ;;  %v1886_v41 = vsel %vm1873_vm5, %v1853_v27, %v4674_v21 }
 0x2cd   : > { %1785 = vrot.lane.b32.xlu2 %v805_v9, %s2566_s22  ;;  %v1916_v45 = vsel %vm1906_vm6, %v1883_v52, %v4666_v34  ;;  %v4667_v9 = vld [vmem:[#allocation86_spill] sm:$0xff]  ;;  %v4676_v52 = vld [vmem:[#allocation88_spill] sm:$0xff] }
 0x2ce   : > { %v1948_v0 = vsel %vm1939_vm7, %v1915_v38, %v4667_v9  ;;  %v1949_v13 = vsel %vm1939_vm7, %v1916_v45, %v4668_v35  ;;  %v4677_v38 = vld [vmem:[#allocation96_spill] sm:$0xff]  ;;  %v808_v27 = vld [vmem:[#allocation2 + $0x142] sm:$0xff] }
 0x2cf   : > { %v1516_v16 = vpop.permute.xlu2 %1515  ;;  %v760_v21 = vld [vmem:[#allocation2 + $0x81] sm:$0xff] }
 0x2d0   : > { %v3875_v22 = vsel %vm2005_vm9, %v3594_v63, %v1516_v16  ;;  %1623 = vrot.lane.b32.xlu0 %v756_v8, %s2565_s21  ;;  %v1981_v16 = vsel %vm1972_vm8, %v1948_v0, %v3532_v14  ;;  %v4671_v14 = vld [vmem:[#allocation69_spill] sm:$0xff] }
 0x2d1   : > { %1659 = vrot.lane.b32.xlu1 %v774_v30, %s2565_s21 }
 0x2d2   : > { %v3883_v19 = vpop.permute.xlu0 %1499 }
 0x2d3   : > { %v1502_v28 = vpop.permute.xlu1 %1501 }
 0x2d4   : > { %v3888_v63 = vsel %vm2005_vm9, %v1979_v18, %v1502_v28  ;;  %v2546_v18 = vld [vmem:[#allocation2 + $0x80] sm:$0xff] }
 0x2d5   : > { %1751 = vrot.lane.b32.xlu2 %v788_v11, %s2566_s22  ;;  %v1852_v28 = vsel %vm417_vm3, %v2546_v18, %v4671_v14  ;;  %v4672_v11 = vld [vmem:[#allocation74_spill] sm:$0xff]  ;;  %v759_v18 = vld [vmem:[#allocation2 + $0x79] sm:$0xff] }
 0x2d6   : > { %v1885_v43 = vsel %vm1873_vm5, %v1852_v28, %v4672_v11  ;;  %v777_v28 = vld [vmem:[#allocation2 + $0x151] sm:$0xff] }
 0x2d7   : > { %v1522_v7 = vpop.permute.xlu2 %1521  ;;  %v1918_v20 = vsel %vm1906_vm6, %v1885_v43, %v4673_v58  ;;  %v4679_v43 = vld [vmem:[#allocation18_spill] sm:$0xff] }
 0x2d8   : > { %v3903_v26 = vsel %vm2005_vm9, %v3630_v61, %v1522_v7  ;;  %1787 = vrot.lane.b32.xlu0 %v806_v59, %s2566_s22  ;;  %v4669_v61 = vld [vmem:[#allocation105_spill] sm:$0xff]  ;;  %v4675_v59 = vld [vmem:[#allocation79_spill] sm:$0xff]  ;;  %v1951_v51 = vsel %vm1939_vm7, %v1918_v20, %v4676_v52 }
 0x2d9   : > { %1625 = vrot.lane.b32.xlu1 %v757_v62, %s2565_s21  ;;  %v1982_v55 = vsel %vm1972_vm8, %v1949_v13, %v4669_v61  ;;  %v807_v7 = vld [vmem:[#allocation2 + $0x13a] sm:$0xff]  ;;  %v1919_v15 = vsel %vm1906_vm6, %v1886_v41, %v4675_v59  ;;  %v1984_v34 = vsel %vm1972_vm8, %v1951_v51, %v3551_v5  ;;  %v790_v5 = vld [vmem:[#allocation2 + $0x6a] sm:$0xff]  ;;  %v792_v52 = vld [vmem:[#allocation2 + $0x82] sm:$0xff] }
 0x2da   : > { %v1506_v8 = vpop.permute.xlu0 %1505  ;;  %v1952_v62 = vsel %vm1939_vm7, %v1919_v15, %v4677_v38  ;;  %v776_v61 = vld [vmem:[#allocation2 + $0x141] sm:$0xff]  ;;  %v778_v15 = vld [vmem:[#allocation2 + $0x159] sm:$0xff] }
 0x2db   : > { %v1508_v29 = vpop.permute.xlu1 %1507  ;;  %v3918_v30 = vsel %vm2005_vm9, %v1981_v16, %v1506_v8  ;;  %v758_v16 = vld [vmem:[#allocation2 + $0x69] sm:$0xff]  ;;  %v810_v38 = vld [vmem:[#allocation2 + $0x15a] sm:$0xff] }
 0x2dc   : > { %v3921_v47 = vsel %vm2005_vm9, %v1982_v55, %v1508_v29 }
 0x2dd   : > { %1661 = vrot.lane.b32.xlu2 %v775_v57, %s2565_s21 }
 0x2df   : > { %v1528_v25 = vpop.permute.xlu2 %1527 }
 0x2e0   : > { %v3936_v48 = vsel %vm2005_vm9, %v3672_v23, %v1528_v25  ;;  %1753 = vrot.lane.b32.xlu0 %v789_v46, %s2566_s22  ;;  %v4678_v23 = vld [vmem:[#allocation107_spill] sm:$0xff]  ;;  %v791_v46 = vld [vmem:[#allocation2 + $0x7a] sm:$0xff] }
 0x2e1   : > { %1789 = vrot.lane.b32.xlu1 %v807_v7, %s2566_s22  ;;  %v1985_v9 = vsel %vm1972_vm8, %v1952_v62, %v4678_v23 }
 0x2e2   : > { %v1512_v45 = vpop.permute.xlu0 %1511 }
 0x2e3   : > { %v1514_v0 = vpop.permute.xlu1 %1513  ;;  %v3951_v35 = vsel %vm2005_vm9, %v1984_v34, %v1512_v45  ;;  %v752_v45 = vld [vmem:[#allocation2 + $0x1a0] sm:$0xff] }
 0x2e4   : > { %v3954_v13 = vsel %vm2005_vm9, %v1985_v9, %v1514_v0  ;;  %v779_v9 = vld [vmem:[#allocation2 + $0x169] sm:$0xff] }
 0x2e5   : > { %1627 = vrot.lane.b32.xlu2 %v758_v16, %s2565_s21 }
 0x2e7   : > { %v1534_v8 = vpop.permute.xlu2 %1533 }
 0x2e8   : > { %v3959_v55 = vsel %vm2005_vm9, %v3714_v49, %v1534_v8  ;;  %1663 = vrot.lane.b32.xlu0 %v776_v61, %s2565_s21  ;;  %v784_v8 = vld [vmem:[#allocation2 + $0x1a1] sm:$0xff] }
 0x2e9   : > { %1755 = vrot.lane.b32.xlu1 %v790_v5, %s2566_s22  ;;  %v793_v5 = vld [vmem:[#allocation2 + $0x92] sm:$0xff] }
 0x2ea   : > { %v1518_v29 = vpop.permute.xlu0 %1517 }
 0x2eb   : > { %v1520_v57 = vpop.permute.xlu1 %1519  ;;  %v3965_v40 = vsel %vm2005_vm9, %v3597_v12, %v1518_v29  ;;  %v811_v29 = vld [vmem:[#allocation2 + $0x16a] sm:$0xff] }
 0x2ec   : > { %v3969_v6 = vsel %vm2005_vm9, %v3526_v32, %v1520_v57 }
 0x2ed   : > { %1791 = vrot.lane.b32.xlu2 %v808_v27, %s2566_s22 }
 0x2ef   : > { %v1540_v49 = vpop.permute.xlu2 %1539 }
 0x2f0   : > { %v3974_v14 = vsel %vm2005_vm9, %v3748_v50, %v1540_v49  ;;  %1629 = vrot.lane.b32.xlu0 %v759_v18, %s2565_s21  ;;  %v809_v50 = vld [vmem:[#allocation2 + $0x152] sm:$0xff]  ;;  %v816_v49 = vld [vmem:[#allocation2 + $0x1a2] sm:$0xff] }
 0x2f1   : > { %1665 = vrot.lane.b32.xlu1 %v777_v28, %s2565_s21  ;;  %v783_v28 = vld [vmem:[#allocation2 + $0x199] sm:$0xff] }
 0x2f2   : > { %v1524_v12 = vpop.permute.xlu0 %1523 }
 0x2f3   : > { %v1526_v11 = vpop.permute.xlu1 %1525  ;;  %v2023_v32 = vsel %vm2005_vm9, %v3636_v33, %v1524_v12 }
 0x2f4   : > { %v3982_v25 = vsel %vm2005_vm9, %v4679_v43, %v1526_v11  ;;  %v762_v11 = vld [vmem:[#allocation2 + $0x99] sm:$0xff] }
 0x2f5   : > { %1757 = vrot.lane.b32.xlu2 %v791_v46, %s2566_s22 }
 0x2f7   : > { %v1546_v58 = vpop.permute.xlu2 %1545 }
 0x2f8   : > { %v3987_v20 = vsel %vm2005_vm9, %v3784_v39, %v1546_v58  ;;  %1793 = vrot.lane.b32.xlu0 %v809_v50, %s2566_s22  ;;  %v780_v58 = vld [vmem:[#allocation2 + $0x171] sm:$0xff] }
 0x2f9   : > { %1631 = vrot.lane.b32.xlu1 %v760_v21, %s2565_s21  ;;  %v815_v21 = vld [vmem:[#allocation2 + $0x19a] sm:$0xff] }
 0x2fa   : > { %v1530_v41 = vpop.permute.xlu0 %1529 }
 0x2fb   : > { %v1532_v33 = vpop.permute.xlu1 %1531  ;;  %v3993_v7 = vsel %vm2005_vm9, %v3675_v56, %v1530_v41 }
 0x2fc   : > { %v3997_v59 = vsel %vm2005_vm9, %v3572_v17, %v1532_v33  ;;  %v4680_v33 = vld [vmem:[#allocation80_spill] sm:$0xff] }
 0x2fd   : > { %1667 = vrot.lane.b32.xlu2 %v778_v15, %s2565_s21 }
 0x2ff   : > { %v1650_v39 = vpop.permute.xlu2 %1649 }
 0x300   : > { %v2055_v51 = vsel %vm2038_vm10, %v3903_v26, %v1650_v39  ;;  %1759 = vrot.lane.b32.xlu0 %v792_v52, %s2566_s22  ;;  %v761_v26 = vld [vmem:[#allocation2 + $0x91] sm:$0xff] }
 0x301   : > { %1795 = vrot.lane.b32.xlu1 %v810_v38, %s2566_s22  ;;  %v794_v38 = vld [vmem:[#allocation2 + $0x9a] sm:$0xff] }
 0x302   : > { %v1536_v56 = vpop.permute.xlu0 %1535 }
 0x303   : > { %v1538_v62 = vpop.permute.xlu1 %1537  ;;  %v4006_v17 = vsel %vm2005_vm9, %v3717_v1, %v1536_v56  ;;  %v812_v56 = vld [vmem:[#allocation2 + $0x172] sm:$0xff] }
 0x304   : > { %v4010_v34 = vsel %vm2005_vm9, %v3615_v44, %v1538_v62  ;;  %v4681_v62 = vld [vmem:[#allocation99_spill] sm:$0xff] }
 0x305   : > { %1551 = vrot.lane.b32.xlu2 %v752_v45, %s2564_s20 }
 0x307   : > { %v1780_v23 = vpop.permute.xlu2 %1779 }
 0x308   : > { %1633 = vrot.lane.b32.xlu0 %v761_v26, %s2565_s21  ;;  %v763_v26 = vld [vmem:[#allocation2 + $0xa9] sm:$0xff] }
 0x309   : > { %1669 = vrot.lane.b32.xlu1 %v779_v9, %s2565_s21 }
 0x30a   : > { %v1542_v0 = vpop.permute.xlu0 %1541 }
 0x30b   : > { %v1544_v16 = vpop.permute.xlu1 %1543  ;;  %v4017_v1 = vsel %vm2005_vm9, %v3751_v4, %v1542_v0  ;;  %v768_v0 = vld [vmem:[#allocation2 + $0xe1] sm:$0xff] }
 0x30c   : > { %v4021_v44 = vsel %vm2005_vm9, %v3653_v54, %v1544_v16  ;;  %v2547_v16 = vld [vmem:[#allocation2 + $0x181] sm:$0xff] }
 0x30d   : > { %1679 = vrot.lane.b32.xlu2 %v784_v8, %s2565_s21 }
 0x30f   : > { %v1746_v61 = vpop.permute.xlu2 %1745 }
 0x310   : > { %1761 = vrot.lane.b32.xlu0 %v793_v5, %s2566_s22 }
 0x311   : > { %1797 = vrot.lane.b32.xlu1 %v811_v29, %s2566_s22 }
 0x312   : > { %v1548_v57 = vpop.permute.xlu0 %1547 }
 0x313   : > { %v1550_v27 = vpop.permute.xlu1 %1549  ;;  %v4028_v4 = vsel %vm2005_vm9, %v3789_v42, %v1548_v57  ;;  %v795_v57 = vld [vmem:[#allocation2 + $0xaa] sm:$0xff] }
 0x314   : > { %v4032_v54 = vsel %vm2005_vm9, %v3696_v37, %v1550_v27 }
 0x315   : > { %1807 = vrot.lane.b32.xlu2 %v816_v49, %s2566_s22  ;;  %v4682_v49 = vld [vmem:[#allocation91_spill] sm:$0xff] }
 0x317   : > { %v1656_v18 = vpop.permute.xlu2 %1655 }
 0x318   : > { %v2058_v12 = vsel %vm2038_vm10, %v3936_v48, %v1656_v18  ;;  %1677 = vrot.lane.b32.xlu0 %v783_v28, %s2565_s21  ;;  %v4683_v18 = vld [vmem:[#allocation97_spill] sm:$0xff]  ;;  %v2548_v28 = vld [vmem:[#allocation2 + $0x38] sm:$0xff] }
 0x319   : > { %1635 = vrot.lane.b32.xlu1 %v762_v11, %s2565_s21  ;;  %v4684_v11 = vld [vmem:[#allocation27_spill] sm:$0xff] }
 0x31a   : > { %v1778_v42 = vpop.permute.xlu0 %1777 }
 0x31b   : > { %v1652_v43 = vpop.permute.xlu1 %1651  ;;  %v4040_v46 = vsel %vm2071_vm11, %v2055_v51, %v1778_v42  ;;  %v1846_v42 = vsel %vm417_vm3, %v2548_v28, %v4684_v11  ;;  %v797_v28 = vld [vmem:[#allocation2 + $0xc2] sm:$0xff] }
 0x31c   : > { %v2056_v37 = vsel %vm2038_vm10, %v2023_v32, %v1652_v43 }
 0x31d   : > { %v4044_v50 = vsel %vm2071_vm11, %v2056_v37, %v1780_v23  ;;  %1671 = vrot.lane.b32.xlu2 %v780_v58, %s2565_s21 }
 0x31f   : > { %v1622_v48 = vpop.permute.xlu2 %1621 }
 0x320   : > { %v2041_v41 = vsel %vm2038_vm10, %v3863_v53, %v1622_v48  ;;  %1805 = vrot.lane.b32.xlu0 %v815_v21, %s2566_s22  ;;  %v4686_v21 = vld [vmem:[#allocation45_spill] sm:$0xff] }
 0x321   : > { %1675 = vrot.lane.b32.xlu1 %v4680_v33, %s2565_s21 }
 0x322   : > { %v1618_v15 = vpop.permute.xlu0 %1617 }
 0x323   : > { %v1654_v39 = vpop.permute.xlu1 %1653  ;;  %v2039_v32 = vsel %vm2038_vm10, %v3830_v36, %v1618_v15 }
 0x324   : > { %v2057_v52 = vsel %vm2038_vm10, %v3982_v25, %v1654_v39  ;;  %v4057_v51 = vsel %vm2071_vm11, %v2039_v32, %v1746_v61  ;;  %v767_v39 = vld [vmem:[#allocation2 + $0xd9] sm:$0xff]  ;;  %v4687_v32 = vld [vmem:[#allocation82_spill] sm:$0xff] }
 0x325   : > { %1763 = vrot.lane.b32.xlu2 %v794_v38, %s2566_s22  ;;  %v4688_v38 = vld [vmem:[#allocation40_spill] sm:$0xff] }
 0x327   : > { %v1786_v53 = vpop.permute.xlu2 %1785 }
 0x328   : > { %1799 = vrot.lane.b32.xlu0 %v812_v56, %s2566_s22 }
 0x329   : > { %1803 = vrot.lane.b32.xlu1 %v4681_v62, %s2566_s22 }
 0x32a   : > { %v1782_v45 = vpop.permute.xlu0 %1781 }
 0x32b   : > { %v1620_v23 = vpop.permute.xlu1 %1619  ;;  %v4064_v36 = vsel %vm2071_vm11, %v2057_v52, %v1782_v45  ;;  %v764_v45 = vld [vmem:[#allocation2 + $0xb1] sm:$0xff] }
 0x32c   : > { %v2040_v25 = vsel %vm2038_vm10, %v3733_v24, %v1620_v23 }
 0x32d   : > { %1637 = vrot.lane.b32.xlu2 %v763_v26, %s2565_s21 }
 0x32f   : > { %v1752_v9 = vpop.permute.xlu2 %1751 }
 0x330   : > { %1647 = vrot.lane.b32.xlu0 %v768_v0, %s2565_s21 }
 0x331   : > { %1673 = vrot.lane.b32.xlu1 %v2547_v16, %s2565_s21 }
 0x332   : > { %v1748_v8 = vpop.permute.xlu0 %1747 }
 0x333   : > { %v1784_v61 = vpop.permute.xlu1 %1783  ;;  %v4072_v5 = vsel %vm2071_vm11, %v2040_v25, %v1748_v8 }
 0x334   : > { %v4075_v29 = vsel %vm2071_vm11, %v2058_v12, %v1784_v61  ;;  %v4685_v12 = vld [vmem:[#allocation35_spill] sm:$0xff] }
 0x335   : > { %1765 = vrot.lane.b32.xlu2 %v795_v57, %s2566_s22  ;;  %v1879_v37 = vsel %vm1873_vm5, %v1846_v42, %v4685_v12  ;;  %v796_v61 = vld [vmem:[#allocation2 + $0xb2] sm:$0xff]  ;;  %v2549_v57 = vld [vmem:[#allocation2 + $0xca] sm:$0xff]  ;;  %v2107_v42 = vsel %vm2105_vm12, %v4072_v5, 0.0 }
 0x337   : > { %v1662_v24 = vpop.permute.xlu2 %1661 }
 0x338   : > { %v2061_v27 = vsel %vm2038_vm10, %v3959_v55, %v1662_v24  ;;  %1775 = vrot.lane.b32.xlu0 %v4682_v49, %s2566_s22  ;;  %v1912_v55 = vsel %vm1906_vm6, %v1879_v37, %v4686_v21 }
 0x339   : > { %1801 = vrot.lane.b32.xlu1 %v4683_v18, %s2566_s22  ;;  %v1945_v52 = vsel %vm1939_vm7, %v1912_v55, %v4687_v32 }
 0x33a   : > { %v1658_v43 = vpop.permute.xlu0 %1657  ;;  %v1978_v56 = vsel %vm1972_vm8, %v1945_v52, %v4688_v38 }
 0x33b   : > { %v1750_v58 = vpop.permute.xlu1 %1749  ;;  %v2059_v48 = vsel %vm2038_vm10, %v3993_v7, %v1658_v43  ;;  %v2011_v7 = vsel %vm2005_vm9, %v1978_v56, %v3883_v19  ;;  %v766_v19 = vld [vmem:[#allocation2 + $0xc9] sm:$0xff] }
 0x33c   : > { %v4093_v33 = vsel %vm2071_vm11, %v2041_v41, %v1750_v58  ;;  %v4096_v15 = vsel %vm2071_vm11, %v2059_v48, %v1786_v53  ;;  %v4689_v53 = vld [vmem:[#allocation90_spill] sm:$0xff]  ;;  %v2106_v58 = vsel %vm2105_vm12, %v4057_v51, 0.0 }
 0x33d   : > { %1645 = vrot.lane.b32.xlu2 %v767_v39, %s2565_s21  ;;  %v2109_v48 = vsel %vm2105_vm12, %v4093_v33, 0.0  ;;  %v2108_v21 = vadd.f32 %v2107_v42, %v2106_v58 }
 0x33f   : > { %v1628_v62 = vpop.permute.xlu2 %1627  ;;  %v2110_v32 = vadd.f32 %v2109_v48, %v2108_v21 }
 0x340   : > { %v2044_v41 = vsel %vm2038_vm10, %v2011_v7, %v1628_v62  ;;  %1639 = vrot.lane.b32.xlu0 %v764_v45, %s2565_s21 }
 0x341   : > { %1773 = vrot.lane.b32.xlu1 %v4689_v53, %s2566_s22 }
 0x342   : > { %v1624_v23 = vpop.permute.xlu0 %1623 }
 0x343   : > { %v1660_v25 = vpop.permute.xlu1 %1659  ;;  %v2042_v26 = vsel %vm2038_vm10, %v3866_v60, %v1624_v23 }
 0x344   : > { %v2060_v0 = vsel %vm2038_vm10, %v3997_v59, %v1660_v25  ;;  %v4114_v16 = vsel %vm2071_vm11, %v2042_v26, %v1752_v9  ;;  %v765_v9 = vld [vmem:[#allocation2 + $0xc1] sm:$0xff] }
 0x345   : > { %1643 = vrot.lane.b32.xlu2 %v766_v19, %s2565_s21  ;;  %v2111_v55 = vsel %vm2105_vm12, %v4114_v16, 0.0 }
 0x346   : > { %v2112_v38 = vadd.f32 %v2111_v55, %v2110_v32 }
 0x347   : > { %v1792_v8 = vpop.permute.xlu2 %1791 }
 0x348   : > { %1767 = vrot.lane.b32.xlu0 %v796_v61, %s2566_s22 }
 0x349   : > { %1771 = vrot.lane.b32.xlu1 %v2549_v57, %s2566_s22 }
 0x34a   : > { %v1788_v24 = vpop.permute.xlu0 %1787 }
 0x34b   : > { %v1626_v49 = vpop.permute.xlu1 %1625  ;;  %v4120_v60 = vsel %vm2071_vm11, %v2060_v0, %v1788_v24 }
 0x34c   : > { %v2043_v59 = vsel %vm2038_vm10, %v3765_v31, %v1626_v49 }
 0x34d   : > { %1641 = vrot.lane.b32.xlu2 %v765_v9, %s2565_s21 }
 0x34f   : > { %v1758_v18 = vpop.permute.xlu2 %1757 }
 0x350   : > { %1769 = vrot.lane.b32.xlu0 %v797_v28, %s2566_s22 }
 0x352   : > { %v1754_v11 = vpop.permute.xlu0 %1753 }
 0x353   : > { %v1790_v43 = vpop.permute.xlu1 %1789  ;;  %v4129_v12 = vsel %vm2071_vm11, %v2043_v59, %v1754_v11 }
 0x354   : > { %v4132_v37 = vsel %vm2071_vm11, %v2061_v27, %v1790_v43  ;;  %v2466_v31 = vpack.i.bf16 %v4129_v12, %v4096_v15  ;;  %v2113_v27 = vsel %vm2105_vm12, %v4129_v12, 0.0 }
 0x355   : > { %v2114_v45 = vadd.f32 %v2113_v27, %v2112_v38  ;;  %v2458_v38 = vpack.i.bf16 %v4057_v51, %v4040_v46 }
 0x357   : > { %v1668_v39 = vpop.permute.xlu2 %1667 }
 0x358   : > { %v2064_v52 = vsel %vm2038_vm10, %v3974_v14, %v1668_v39 }
 0x35a   : > { %v1664_v56 = vpop.permute.xlu0 %1663 }
 0x35b   : > { %v1756_v7 = vpop.permute.xlu1 %1755  ;;  %v2062_v62 = vsel %vm2038_vm10, %v4006_v17, %v1664_v56 }
 0x35c   : > { %v4149_v53 = vsel %vm2071_vm11, %v2044_v41, %v1756_v7  ;;  %v4152_v23 = vsel %vm2071_vm11, %v2062_v62, %v1792_v8 }
 0x35d   : > { %v2115_v25 = vsel %vm2105_vm12, %v4149_v53, 0.0  ;;  %v2468_v14 = vpack.i.bf16 %v4149_v53, %v4120_v60 }
 0x35e   : > { %v2116_v26 = vadd.f32 %v2115_v25, %v2114_v45 }
 0x35f   : > { %v1552_v0 = vpop.permute.xlu2 %1551 }
 0x362   : > { %v1630_v19 = vpop.permute.xlu0 %1629 }
 0x363   : > { %v1666_v61 = vpop.permute.xlu1 %1665  ;;  %v2045_v17 = vsel %vm2038_vm10, %v3888_v63, %v1630_v19 }
 0x364   : > { %v2063_v41 = vsel %vm2038_vm10, %v4010_v34, %v1666_v61  ;;  %v4163_v57 = vsel %vm2071_vm11, %v2045_v17, %v1758_v18  ;;  %v2037_v34 = vsel %vm2005_vm9, %v3823_v2, %v1552_v0  ;;  %v2460_v0 = vpack.i.bf16 %v4072_v5, %v4044_v50 }
 0x365   : > { %v2117_v8 = vsel %vm2105_vm12, %v4163_v57, 0.0  ;;  %v2470_v24 = vpack.i.bf16 %v4163_v57, %v4132_v37 }
 0x366   : > { %v2118_v49 = vadd.f32 %v2117_v8, %v2116_v26 }
 0x367   : > { %v1680_v59 = vpop.permute.xlu2 %1679 }
 0x368   : > { %v2070_v18 = vsel %vm2038_vm10, %v2037_v34, %v1680_v59 }
 0x36a   : > { %v1794_v9 = vpop.permute.xlu0 %1793 }
 0x36b   : > { %v1632_v28 = vpop.permute.xlu1 %1631  ;;  %v4170_v11 = vsel %vm2071_vm11, %v2063_v41, %v1794_v9 }
 0x36c   : > { %v2046_v63 = vsel %vm2038_vm10, %v3808_v10, %v1632_v28 }
 0x36f   : > { %v1808_v42 = vpop.permute.xlu2 %1807 }
 0x370   : > { %v4178_v43 = vsel %vm2071_vm11, %v2070_v18, %v1808_v42 }
 0x371   : > { %2295 = vmatpush.msra.mxu2 %v4178_v43 }
 0x372   : > { %v1760_v58 = vpop.permute.xlu0 %1759 }
 0x373   : > { %v1796_v48 = vpop.permute.xlu1 %1795  ;;  %v4182_v21 = vsel %vm2071_vm11, %v2046_v63, %v1760_v58 }
 0x374   : > { %v2119_v55 = vsel %vm2105_vm12, %v4182_v21, 0.0  ;;  %v2472_v10 = vpack.i.bf16 %v4182_v21, %v4152_v23  ;;  %v4209_v9 = vsel %vm2071_vm11, %v2064_v52, %v1796_v48 }
 0x375   : > { %v2120_v2 = vadd.f32 %v2119_v55, %v2118_v49  ;;  %v2462_v49 = vpack.i.bf16 %v4093_v33, %v4064_v36 }
 0x377   : > { %v1672_v39 = vpop.permute.xlu2 %1671 }
 0x37a   : > { %v1634_v32 = vpop.permute.xlu0 %1633 }
 0x37b   : > { %v1670_v27 = vpop.permute.xlu1 %1669  ;;  %v2047_v7 = vsel %vm2038_vm10, %v3918_v30, %v1634_v32 }
 0x37c   : > { %v2065_v34 = vsel %vm2038_vm10, %v4017_v1, %v1670_v27 }
 0x37e   : > { %2459 = vxpose.xlu1.b32.start [1/16] (narrow) %v2458_v38, 72  ;;  %v2464_v38 = vpack.i.bf16 %v4114_v16, %v4075_v29 }
 0x37f   : > { %v1764_v56 = vpop.permute.xlu2 %1763 }
 0x382   : > { %v1762_v62 = vpop.permute.xlu0 %1761 }
 0x383   : > { %v1798_v45 = vpop.permute.xlu1 %1797  ;;  %v4193_v25 = vsel %vm2071_vm11, %v2047_v7, %v1762_v62 }
 0x384   : > { %v2121_v26 = vsel %vm2105_vm12, %v4193_v25, 0.0  ;;  %v2474_v19 = vpack.i.bf16 %v4193_v25, %v4170_v11  ;;  %v4220_v58 = vsel %vm2071_vm11, %v2065_v34, %v1798_v45 }
 0x385   : > { %v2122_v61 = vadd.f32 %v2121_v26, %v2120_v2 }
 0x386   : > { %2461 = vxpose.xlu1.b32.cont [2/16] (narrow) %v2460_v0, 72 }
 0x387   : > { %v1638_v17 = vpop.permute.xlu2 %1637 }
 0x38a   : > { %v1678_v41 = vpop.permute.xlu0 %1677 }
 0x38b   : > { %v1636_v8 = vpop.permute.xlu1 %1635  ;;  %v2069_v1 = vsel %vm2038_vm10, %v4032_v54, %v1678_v41 }
 0x38c   : > { %v2048_v30 = vsel %vm2038_vm10, %v3921_v47, %v1636_v8  ;;  %v2049_v47 = vsel %vm2038_vm10, %v3848_v3, %v1638_v17 }
 0x38d   : > { %v4206_v59 = vsel %vm2071_vm11, %v2048_v30, %v1764_v56 }
 0x38e   : > { %v2123_v28 = vsel %vm2105_vm12, %v4206_v59, 0.0  ;;  %2463 = vxpose.xlu1.b32.cont [3/16] (narrow) %v2462_v49, 72  ;;  %v2476_v63 = vpack.i.bf16 %v4206_v59, %v4209_v9 }
 0x38f   : > { %v1766_v18 = vpop.permute.xlu2 %1765  ;;  %v2124_v42 = vadd.f32 %v2123_v28, %v2122_v61 }
 0x390   : > { %v4223_v52 = vsel %vm2071_vm11, %v2049_v47, %v1766_v18 }
 0x391   : > { %v2125_v48 = vsel %vm2105_vm12, %v4223_v52, 0.0  ;;  %v2478_v55 = vpack.i.bf16 %v4223_v52, %v4220_v58 }
 0x392   : > { %v1806_v2 = vpop.permute.xlu0 %1805  ;;  %v2126_v32 = vadd.f32 %v2125_v48, %v2124_v42 }
 0x393   : > { %v1676_v3 = vpop.permute.xlu1 %1675  ;;  %v4232_v27 = vsel %vm2071_vm11, %v2069_v1, %v1806_v2 }
 0x394   : > { %2296 = vmatpush.msra.mxu2 %v4232_v27  ;;  %v2068_v7 = vsel %vm2038_vm10, %v4028_v4, %v1676_v3 }
 0x396   : > { %2465 = vxpose.xlu1.b32.cont [4/16] (narrow) %v2464_v38, 72 }
 0x397   : > { %v1646_v61 = vpop.permute.xlu2 %1645 }
 0x398   : > { %v2053_v49 = vsel %vm2038_vm10, %v3965_v40, %v1646_v61  ;;  %v2137_v61 = vsel %vm2105_vm12, %v4040_v46, 0.0 }
 0x39a   : > { %v1800_v56 = vpop.permute.xlu0 %1799 }
 0x39b   : > { %v1804_v62 = vpop.permute.xlu1 %1803 }
 0x39c   : > { %v4240_v45 = vsel %vm2071_vm11, %v2068_v7, %v1804_v62 }
 0x39d   : > { %2297 = vmatpush.msra.mxu2 %v4240_v45 }
 0x39e   : > { %2467 = vxpose.xlu1.b32.cont [5/16] (narrow) %v2466_v31, 72 }
 0x3a2   : > { %v1648_v54 = vpop.permute.xlu0 %1647 }
 0x3a3   : > { %v1674_v26 = vpop.permute.xlu1 %1673  ;;  %v2054_v0 = vsel %vm2038_vm10, %v3969_v6, %v1648_v54  ;;  %v2066_v6 = vsel %vm2038_vm10, %v4021_v44, %v1672_v39  ;;  %v1644_v39 = vpop.permute.xlu2 %1643 }
 0x3a4   : > { %v2067_v17 = vsel %vm2038_vm10, %v3987_v20, %v1674_v26  ;;  %v4269_v20 = vsel %vm2071_vm11, %v2066_v6, %v1800_v56  ;;  %v2052_v47 = vsel %vm2038_vm10, %v3875_v22, %v1644_v39 }
 0x3a6   : > { %2469 = vxpose.xlu1.b32.cont [6/16] (narrow) %v2468_v14, 72 }
 0x3aa   : > { %v1776_v4 = vpop.permute.xlu0 %1775 }
 0x3ab   : > { %v1802_v41 = vpop.permute.xlu1 %1801  ;;  %v4254_v8 = vsel %vm2071_vm11, %v2054_v0, %v1776_v4  ;;  %v1642_v2 = vpop.permute.xlu2 %1641 }
 0x3ac   : > { %2251 = vmatpush.msra.mxu1 %v4254_v8  ;;  %v4258_v31 = vsel %vm2071_vm11, %v2067_v17, %v1802_v41  ;;  %v2488_v14 = vpack.i.bf16 %v4254_v8, %v4178_v43  ;;  %v2051_v3 = vsel %vm2038_vm10, %v3954_v13, %v1642_v2  ;;  %v2135_v0 = vsel %vm2105_vm12, %v4254_v8, 0.0 }
 0x3ad   : > { %2298 = vmatpush.msra.mxu2 %v4258_v31  ;;  %v2139_v17 = vsel %vm2105_vm12, %v4044_v50, 0.0 }
 0x3ae   : > { %2471 = vxpose.xlu1.b32.cont [7/16] (narrow) %v2470_v24, 72 }
 0x3af   : > { %2299 = vmatpush.msra.mxu2 %v4269_v20 }
 0x3b1   : > { %2300 = vmatpush.msra.mxu2 %v4220_v58 }
 0x3b2   : > { %v1640_v30 = vpop.permute.xlu0 %1639 }
 0x3b3   : > { %v1774_v28 = vpop.permute.xlu1 %1773  ;;  %2301 = vmatpush.msra.mxu2 %v4209_v9  ;;  %v2050_v40 = vsel %vm2038_vm10, %v3951_v35, %v1640_v30  ;;  %v2161_v30 = vsel %vm2105_vm12, %v4258_v31, 0.0 }
 0x3b4   : > { %v4277_v44 = vsel %vm2071_vm11, %v2053_v49, %v1774_v28 }
 0x3b5   : > { %2252 = vmatpush.msra.mxu1 %v4277_v44  ;;  %2302 = vmatpush.msra.mxu2 %v4170_v11  ;;  %v2486_v24 = vpack.i.bf16 %v4277_v44, %v4232_v27  ;;  %v2133_v54 = vsel %vm2105_vm12, %v4277_v44, 0.0 }
 0x3b6   : > { %2473 = vxpose.xlu1.b32.cont [8/16] (narrow) %v2472_v10, 72 }
 0x3b7   : > { %2303 = vmatpush.msra.mxu2 %v4152_v23 }
 0x3b9   : > { %2304 = vmatpush.msra.mxu2 %v4132_v37 }
 0x3ba   : > { %v1768_v34 = vpop.permute.xlu0 %1767 }
 0x3bb   : > { %v1772_v18 = vpop.permute.xlu1 %1771  ;;  %2305 = vmatpush.msra.mxu2 %v4120_v60  ;;  %v2083_v42 = vsel %vm2071_vm11, %v2050_v40, %v1768_v34 }
 0x3bc   : > { %v4295_v48 = vsel %vm2071_vm11, %v2052_v47, %v1772_v18  ;;  %v2127_v10 = vsel %vm2105_vm12, %v2083_v42, 0.0  ;;  %v2480_v1 = vpack.i.bf16 %v2083_v42, %v4269_v20 }
 0x3bd   : > { %2253 = vmatpush.msra.mxu1 %v4295_v48  ;;  %2306 = vmatpush.msra.mxu2 %v4096_v15  ;;  %v2128_v35 = vadd.f32 %v2127_v10, %v2126_v32  ;;  %v2484_v22 = vpack.i.bf16 %v4295_v48, %v4240_v45  ;;  %v2131_v62 = vsel %vm2105_vm12, %v4295_v48, 0.0 }
 0x3be   : > { %2475 = vxpose.xlu1.b32.cont [9/16] (narrow) %v2474_v19, 72 }
 0x3bf   : > { %2307 = vmatpush.msra.mxu2 %v4075_v29 }
 0x3c1   : > { %2308 = vmatpush.msra.mxu2 %v4064_v36 }
 0x3c2   : > { %v1770_v38 = vpop.permute.xlu0 %1769 }
 0x3c3   : > { %2309 = vmatpush.msra.mxu2 %v4044_v50  ;;  %v2084_v32 = vsel %vm2071_vm11, %v2051_v3, %v1770_v38  ;;  %v2145_v50 = vsel %vm2105_vm12, %v4096_v15, 0.0 }
 0x3c4   : > { %v2129_v56 = vsel %vm2105_vm12, %v2084_v32, 0.0  ;;  %2254 = vmatpush.msra.mxu1 %v2084_v32  ;;  %v2482_v7 = vpack.i.bf16 %v2084_v32, %v4258_v31 }
 0x3c5   : > { %2310 = vmatpush.msra.mxu2 %v4040_v46  ;;  %v2130_v19 = vadd.f32 %v2129_v56, %v2128_v35  ;;  %v2143_v46 = vsel %vm2105_vm12, %v4075_v29, 0.0 }
 0x3c6   : > { %2477 = vxpose.xlu1.b32.cont [10/16] (narrow) %v2476_v63, 72  ;;  %2255 = vmatpush.msra.mxu1 %v2083_v42 }
 0x3c7   : > { %v2132_v13 = vadd.f32 %v2131_v62, %v2130_v19 }
 0x3c8   : > { %2256 = vmatpush.msra.mxu1 %v4223_v52 }
 0x3c9   : > { %v2134_v26 = vadd.f32 %v2133_v54, %v2132_v13 }
 0x3ca   : > { %2257 = vmatpush.msra.mxu1 %v4206_v59  ;;  %v2141_v59 = vsel %vm2105_vm12, %v4064_v36, 0.0 }
 0x3cb   : > { %v2136_v4 = vadd.f32 %v2135_v0, %v2134_v26 }
 0x3cc   : > { %2258 = vmatpush.msra.mxu1 %v4193_v25 }
 0x3cd   : > { %v2138_v63 = vadd.f32 %v2137_v61, %v2136_v4 }
 0x3ce   : > { %2479 = vxpose.xlu1.b32.cont [11/16] (narrow) %v2478_v55, 72  ;;  %2259 = vmatpush.msra.mxu1 %v4182_v21  ;;  %v2147_v21 = vsel %vm2105_vm12, %v4120_v60, 0.0 }
 0x3cf   : > { %v2140_v41 = vadd.f32 %v2139_v17, %v2138_v63 }
 0x3d0   : > { %2260 = vmatpush.msra.mxu1 %v4163_v57  ;;  %v2149_v57 = vsel %vm2105_vm12, %v4132_v37, 0.0 }
 0x3d1   : > { %v2142_v6 = vadd.f32 %v2141_v59, %v2140_v41  ;;  %v2178_v59 = vld [vmem:[%s4454_s3] sm:$0xff] }
 0x3d2   : > { %2261 = vmatpush.msra.mxu1 %v4149_v53  ;;  %v2151_v53 = vsel %vm2105_vm12, %v4152_v23, 0.0  ;;  %v2159_v23 = vsel %vm2105_vm12, %v4269_v20, 0.0  ;;  %v2167_v20 = vsel %vm2105_vm12, %v4178_v43, 0.0 }
 0x3d3   : > { %v2144_v25 = vadd.f32 %v2143_v46, %v2142_v6 }
 0x3d4   : > { %2262 = vmatpush.msra.mxu1 %v4129_v12  ;;  %v2153_v12 = vsel %vm2105_vm12, %v4170_v11, 0.0 }
 0x3d5   : > { %v2146_v52 = vadd.f32 %v2145_v50, %v2144_v25 }
 0x3d6   : > { %2481 = vxpose.xlu1.b32.cont [12/16] (narrow) %v2480_v1, 72  ;;  %2263 = vmatpush.msra.mxu1 %v4114_v16  ;;  %v2155_v16 = vsel %vm2105_vm12, %v4209_v9, 0.0 }
 0x3d7   : > { %v2148_v36 = vadd.f32 %v2147_v21, %v2146_v52  ;;  %v2179_v52 = vld [vmem:[%s4454_s3 + $0x8] sm:$0xff] }
 0x3d8   : > { %2264 = vmatpush.msra.mxu1 %v4093_v33  ;;  %v2157_v33 = vsel %vm2105_vm12, %v4220_v58, 0.0  ;;  %v2165_v58 = vsel %vm2105_vm12, %v4232_v27, 0.0 }
 0x3d9   : > { %v2150_v29 = vadd.f32 %v2149_v57, %v2148_v36 }
 0x3da   : > { %2265 = vmatpush.msra.mxu1 %v4072_v5 }
 0x3db   : > { %v2152_v15 = vadd.f32 %v2151_v53, %v2150_v29  ;;  %v2180_v53 = vld [vmem:[%s4454_s3 + $0x10] sm:$0xff] }
 0x3dc   : > { %2266 = vmatpush.msra.mxu1 %v4057_v51  ;;  %v2163_v51 = vsel %vm2105_vm12, %v4240_v45, 0.0  ;;  %v2104_v45 = vld [vmem:[%s4453_s2] sm:$0x1] }
 0x3dd   : > { %v2154_v60 = vadd.f32 %v2153_v12, %v2152_v15 }
 0x3de   : > { %2483 = vxpose.xlu1.b32.cont [13/16] (narrow) %v2482_v7, 72 }
 0x3df   : > { %v2156_v37 = vadd.f32 %v2155_v16, %v2154_v60 }
 0x3e1   : > { %v2158_v55 = vadd.f32 %v2157_v33, %v2156_v37  ;;  %v2181_v37 = vld [vmem:[%s4454_s3 + $0x18] sm:$0xff] }
 0x3e3   : > { %v2160_v5 = vadd.f32 %v2159_v23, %v2158_v55 }
 0x3e5   : > { %v2162_v11 = vadd.f32 %v2161_v30, %v2160_v5  ;;  %v2182_v30 = vld [vmem:[%s4454_s3 + $0x20] sm:$0xff] }
 0x3e6   : > { %2485 = vxpose.xlu1.b32.cont [14/16] (narrow) %v2484_v22, 72 }
 0x3e7   : > { %v2164_v9 = vadd.f32 %v2163_v51, %v2162_v11 }
 0x3e9   : > { %v2166_v49 = vadd.f32 %v2165_v58, %v2164_v9 }
 0x3eb   : > { %v2168_v28 = vadd.f32 %v2167_v20, %v2166_v49  ;;  %v2183_v49 = vld [vmem:[%s4454_s3 + $0x28] sm:$0xff] }
 0x3ed   : > { %v2169_v39 = vrot.slane %v2168_v28, 4 }
 0x3ee   : > { %2487 = vxpose.xlu1.b32.cont [15/16] (narrow) %v2486_v24, 72 }
 0x3ef   : > { %v2170_v31 = vadd.f32 %v2169_v39, %v2168_v28 }
 0x3f1   : > { %v2171_v40 = vrot.slane %v2170_v31, 2 }
 0x3f3   : > { %v2172_v34 = vadd.f32 %v2171_v40, %v2170_v31  ;;  %v2184_v40 = vld [vmem:[%s4454_s3 + $0x30] sm:$0xff] }
 0x3f5   : > { %v2173_v47 = vrot.slane %v2172_v34, 1 }
 0x3f6   : > { %2489 = vxpose.xlu1.b32.end [16/16] (narrow) %v2488_v14, 72 }
 0x3f7   : > { %v2174_v18 = vadd.f32 %v2173_v47, %v2172_v34 }
 0x3f9   : > { %v2175_v42 = vadd.f32 %v2174_v18, %v2104_v45 }
 0x3fb   : > { %2177 = vst.msk [vmem:[%s4453_s2] sm:$0x1] %vm2176_vm13, %v2175_v42  ;;  %v2185_v42 = vld [vmem:[%s4454_s3 + $0x38] sm:$0xff] }
 0x422   : > { %v2490_v27 = vpop.trf.xlu1 }
 0x423   : > { %v2494_v44 = vunpack.i.h.bf16 %v2490_v27  ;;  %v2491_v24 = vunpack.i.l.bf16 %v2490_v27 }
 0x425   : > { %2267 = vmatmul.f32.vlgmr.msra.gmra.mxu1 %v2494_v44  ;;  %2311 = vmatmul.f32.vlgmr.msra.gmra.mxu2 %v2491_v24 }
 0x42a   : > { %v2495_v48 = vpop.trf.xlu1 }
 0x42b   : > { %v2499_v10 = vunpack.i.h.bf16 %v2495_v48  ;;  %v2496_v1 = vunpack.i.l.bf16 %v2495_v48 }
 0x42d   : > { %2270 = vmatmul.f32.gmra.mxu1 %v2499_v10  ;;  %2314 = vmatmul.f32.gmra.mxu2 %v2496_v1  ;;  %v2186_v10 = vld [vmem:[%s4454_s3 + $0x40] sm:$0xff] }
 0x432   : > { %v2500_v35 = vpop.trf.xlu1 }
 0x433   : > { %v2504_v43 = vunpack.i.h.bf16 %v2500_v35  ;;  %v2501_v8 = vunpack.i.l.bf16 %v2500_v35 }
 0x435   : > { %2273 = vmatmul.f32.gmra.mxu1 %v2504_v43  ;;  %2317 = vmatmul.f32.gmra.mxu2 %v2501_v8 }
 0x43a   : > { %v2505_v14 = vpop.trf.xlu1 }
 0x43b   : > { %v2509_v22 = vunpack.i.h.bf16 %v2505_v14  ;;  %v2506_v2 = vunpack.i.l.bf16 %v2505_v14 }
 0x43d   : > { %2276 = vmatmul.f32.gmra.mxu1 %v2509_v22  ;;  %2320 = vmatmul.f32.gmra.mxu2 %v2506_v2 }
 0x442   : > { %v2510_v3 = vpop.trf.xlu1 }
 0x443   : > { %v2514_v38 = vunpack.i.h.bf16 %v2510_v3  ;;  %v2511_v32 = vunpack.i.l.bf16 %v2510_v3 }
 0x445   : > { %2279 = vmatmul.f32.gmra.mxu1 %v2514_v38  ;;  %2323 = vmatmul.f32.gmra.mxu2 %v2511_v32 }
 0x44a   : > { %v2515_v56 = vpop.trf.xlu1 }
 0x44b   : > { %v2519_v7 = vunpack.i.h.bf16 %v2515_v56  ;;  %v2516_v19 = vunpack.i.l.bf16 %v2515_v56 }
 0x44d   : > { %2282 = vmatmul.f32.gmra.mxu1 %v2519_v7  ;;  %2326 = vmatmul.f32.gmra.mxu2 %v2516_v19 }
 0x452   : > { %v2520_v62 = vpop.trf.xlu1 }
 0x453   : > { %v2524_v13 = vunpack.i.h.bf16 %v2520_v62  ;;  %v2521_v54 = vunpack.i.l.bf16 %v2520_v62 }
 0x455   : > { %2285 = vmatmul.f32.gmra.mxu1 %v2524_v13  ;;  %2329 = vmatmul.f32.gmra.mxu2 %v2521_v54 }
 0x45a   : > { %v2525_v26 = vpop.trf.xlu1 }
 0x45b   : > { %v2529_v0 = vunpack.i.h.bf16 %v2525_v26  ;;  %v2526_v4 = vunpack.i.l.bf16 %v2525_v26 }
 0x45d   : > { %2288 = vmatmul.f32.gmra.mxu1 %v2529_v0  ;;  %2332 = vmatmul.f32.gmra.mxu2 %v2526_v4 }
 0x462   : > { %v2530_v61 = vpop.trf.xlu1 }
 0x463   : > { %v2534_v63 = vunpack.i.h.bf16 %v2530_v61  ;;  %v2531_v17 = vunpack.i.l.bf16 %v2530_v61 }
 0x465   : > { %2291 = vmatmul.f32.gmra.mxu1 %v2534_v63  ;;  %2335 = vmatmul.f32.gmra.mxu2 %v2531_v17 }
 0x4a2   : > { %v2268_v41 = vpop.f32.mrf.mxu1 }
 0x4a8   : > { %v2312_v6 = vpop.f32.mrf.mxu2 }
 0x4a9   : > { %v2313_v46 = vadd.f32 %v2312_v6, %v2268_v41 }
 0x4aa   : > { %v2271_v25 = vpop.f32.mrf.mxu1 }
 0x4ab   : > { %v2339_v50 = vadd.f32 %v2313_v46, %v2178_v59 }
 0x4ad   : > { %2348 = vst.msk [vmem:[%s4454_s3] sm:$0xff] %vm2105_vm12, %v2339_v50 }
 0x4b0   : > { %v2315_v21 = vpop.f32.mrf.mxu2 }
 0x4b1   : > { %v2316_v36 = vadd.f32 %v2315_v21, %v2271_v25 }
 0x4b2   : > { %v2274_v57 = vpop.f32.mrf.mxu1 }
 0x4b3   : > { %v2340_v29 = vadd.f32 %v2316_v36, %v2179_v52 }
 0x4b5   : > { %2349 = vst.msk [vmem:[%s4454_s3 + $0x8] sm:$0xff] %vm2105_vm12, %v2340_v29 }
 0x4b8   : > { %v2318_v15 = vpop.f32.mrf.mxu2 }
 0x4b9   : > { %v2319_v12 = vadd.f32 %v2318_v15, %v2274_v57 }
 0x4ba   : > { %v2277_v60 = vpop.f32.mrf.mxu1 }
 0x4bb   : > { %v2341_v16 = vadd.f32 %v2319_v12, %v2180_v53 }
 0x4bd   : > { %2350 = vst.msk [vmem:[%s4454_s3 + $0x10] sm:$0xff] %vm2105_vm12, %v2341_v16 }
 0x4c0   : > { %v2321_v33 = vpop.f32.mrf.mxu2 }
 0x4c1   : > { %v2322_v55 = vadd.f32 %v2321_v33, %v2277_v60 }
 0x4c2   : > { %v2280_v23 = vpop.f32.mrf.mxu1 }
 0x4c3   : > { %v2342_v5 = vadd.f32 %v2322_v55, %v2181_v37 }
 0x4c5   : > { %2351 = vst.msk [vmem:[%s4454_s3 + $0x18] sm:$0xff] %vm2105_vm12, %v2342_v5 }
 0x4c8   : > { %v2324_v11 = vpop.f32.mrf.mxu2 }
 0x4c9   : > { %v2325_v51 = vadd.f32 %v2324_v11, %v2280_v23 }
 0x4ca   : > { %v2283_v9 = vpop.f32.mrf.mxu1 }
 0x4cb   : > { %v2343_v58 = vadd.f32 %v2325_v51, %v2182_v30 }
 0x4cd   : > { %2352 = vst.msk [vmem:[%s4454_s3 + $0x20] sm:$0xff] %vm2105_vm12, %v2343_v58 }
 0x4d0   : > { %v2327_v20 = vpop.f32.mrf.mxu2 }
 0x4d1   : > { %v2328_v28 = vadd.f32 %v2327_v20, %v2283_v9 }
 0x4d2   : > { %v2286_v31 = vpop.f32.mrf.mxu1 }
 0x4d3   : > { %v2344_v39 = vadd.f32 %v2328_v28, %v2183_v49 }
 0x4d5   : > { %2353 = vst.msk [vmem:[%s4454_s3 + $0x28] sm:$0xff] %vm2105_vm12, %v2344_v39 }
 0x4d8   : > { %v2330_v34 = vpop.f32.mrf.mxu2 }
 0x4d9   : > { %v2331_v47 = vadd.f32 %v2330_v34, %v2286_v31 }
 0x4da   : > { %v2289_v18 = vpop.f32.mrf.mxu1 }
 0x4db   : > { %v2345_v45 = vadd.f32 %v2331_v47, %v2184_v40 }
 0x4dd   : > { %2354 = vst.msk [vmem:[%s4454_s3 + $0x30] sm:$0xff] %vm2105_vm12, %v2345_v45 }
 0x4e0   : > { %v2333_v27 = vpop.f32.mrf.mxu2 }
 0x4e1   : > { %v2334_v44 = vadd.f32 %v2333_v27, %v2289_v18 }
 0x4e2   : > { %v2292_v48 = vpop.f32.mrf.mxu1 }
 0x4e3   : > { %v2346_v24 = vadd.f32 %v2334_v44, %v2185_v42 }
 0x4e5   : > { %2355 = vst.msk [vmem:[%s4454_s3 + $0x38] sm:$0xff] %vm2105_vm12, %v2346_v24 }
 0x4e8   : > { %v2336_v1 = vpop.f32.mrf.mxu2 }
 0x4e9   : > { %v2337_v35 = vadd.f32 %v2336_v1, %v2292_v48 }
 0x4eb   : > { %v2347_v43 = vadd.f32 %v2337_v35, %v2186_v10 }
 0x4ed   : > { %2356 = vst.msk [vmem:[%s4454_s3 + $0x40] sm:$0xff] %vm2105_vm12, %v2347_v43 }
 0x4ee PF: > { %s14_s12 = sadd.s32 1, %s2556_s12  }
 0x4ef   : > { %p11_p5 = scmp.ge.s32.totalorder %s14_s12, 4  }
 0x4f1   :  { %13 = sbr.rel (!%p11_p5) target bundleno = 1 (0x1), region = 69 }

// kernel: bottleneck_tppi.3
= control target key start
LH: loop header
LB: loop body
LE: loop exit
PB: predicated region body
PF: predicated region fallthrough
CT: control target
= control target key end

     0   :  { %11 = vsyncpa [#allocation4], 0  ;;  %s4955_s0 = inlined_call_operand.vmem [shape: f32[2,256,4], index: 0, kind: input, shape index: {}]   ;;  %s4956_s1 = inlined_call_operand.vmem [shape: f32[4,8], index: 1, kind: input, shape index: {}]   ;;  %s4957_s2 = inlined_call_operand.vmem [shape: f32[72,8], index: 2, kind: input, shape index: {}]   ;;  %s4958_s3 = inlined_call_operand.vmem [shape: f32[8,32], index: 3, kind: input, shape index: {}]   ;;  %s4959_s4 = inlined_call_operand.vmem [shape: f32[1,32], index: 4, kind: input, shape index: {}]   ;;  %s4960_s5 = inlined_call_operand.vmem [shape: f32[1,32], index: 5, kind: input, shape index: {}]   ;;  %s4961_s6 = inlined_call_operand.hbm [shape: f32[2,256,32], index: 6, kind: output, shape index: {}]  }
   0x1   :  { %13 = vsyncpa [#allocation4 + $0x1], 0  ;;  %s3211_s21 = smov 0   ;;  %s3213_s22 = smov 0  }
   0x2   :  { %s3215_s23 = smov 0   ;;  %s3217_s24 = smov 0  }
   0x3 LB: > { %s3232_s25 = sadd.s32 4294967295, %s3165_s24   ;;  %s2892_s26 = sadd.s32 4294967294, %s3165_s24   ;;  %s3165_s24 = sphi %s3217_s24, %s5066_s24   ;;  %s3161_s23 = sphi %s3215_s23, %s5065_s23   ;;  %s3157_s22 = sphi %s3213_s22, %s5064_s22   ;;  %s3153_s21 = sphi %s3211_s21, %s5063_s21  }
   0x4   : > { %s3236_s27 = sadd.s32 1, %s3165_s24   ;;  %s157_s28 = sadd.s32 1, %s3161_s23 }
   0x5   : > { %s154_s29 = ssub.s32 %s3165_s24, %s3236_s27  ;;  %p167_p0 = scmp.ne.s32.totalorder %s3161_s23, %s3157_s22 }
   0x6   : > { %p155_p1 = scmp.eq.s32.totalorder %s154_s29, 0  ;;  %p168_p2 = scmp.eq.s32.totalorder %s3232_s25, 1 }
   0x7   : > { %p173_p3 = scmp.ne.s32.totalorder %s3157_s22, %s3153_s21  ;;  %p174_p4 = scmp.eq.s32.totalorder %s2892_s26, 1 }
   0x8   : > { %s3247_s30 = scalar_select %p155_p1, %s3161_s23, %s157_s28  }
   0x9   : > { %p3249_p5 = por %p168_p2, %p167_p0  ;;  %p3253_p6 = por %p174_p4, %p173_p3 }
   0xa   : > { %p2895_p7 = scmp.ge.s32.totalorder %s3165_s24, 1  ;;  %p215_p8 = scmp.lt.s32.totalorder %s3165_s24, 3 }
   0xc   : > { %p216_p9 = pnand %p2895_p7, %p215_p8 }
   0xe   : > { %219 = sbr.rel (%p216_p9) target bundleno = 1234 (0x4d2), region = 44 }
  0x13   : > { %v282_v0 = vld [vmem:[%s4956_s1] sm:$0xf]  ;;  %vm380_vm0 = vcmask 1043456   ;;  %p245_p10 = scmp.lt.s32.totalorder %s3232_s25, 1  ;;  %vm283_vm1 = vcmask 31744   ;;  %vm498_vm2 = vcmask 64512  }
  0x14   : > { %2899 = vmatpush.msk.msra.mxu0 %vm380_vm0, %v282_v0  ;;  %3003 = vmatpush.msk.msra.mxu3 %vm380_vm0, %v282_v0  ;;  %vm554_vm3 = vcmask 57344   ;;  %s3167_s16 = smov 32   ;;  %s3168_s17 = smov 8   ;;  %vm1954_vm4 = vcmask 130048   ;;  %vm1987_vm5 = vcmask 195584   ;;  %vm2020_vm6 = vcmask 261120  }
  0x15   : > { %s246_s11 = scalar_select %p245_p10, %s3232_s25, 1  ;;  %vm2053_vm7 = vcmask 326656   ;;  %vm2086_vm8 = vcmask 392192   ;;  %vm2119_vm9 = vcmask 457728   ;;  %vm2152_vm10 = vcmask 523264  }
  0x16   : > { %s3169_s18 = smov 16   ;;  %s3170_s19 = smov 24   ;;  %vm2194_vm11 = vcmask 588800  }
  0x17   : > { %s3001_s12 = sshll.u32 %s246_s11, 8  ;;  %s3171_s20 = smov 40  }
  0x18   : > { %s3267_s15 = scalar_lea.vmem %s4955_s0, %s3001_s12  ;;  %s3172_s26 = smov 56  }
  0x19   : > { %v250_v1 = vld [vmem:[%s3267_s15] sm:$0xff]  ;;  %v275_v2 = vld [vmem:[%s3267_s15 + $0xc8] sm:$0xff]  ;;  %v276_v4 = vld [vmem:[%s3267_s15 + $0xd0] sm:$0xff]  ;;  %s3173_s28 = smov 48   ;;  %s3174_s29 = smov 64  }
  0x1a   : > { %2900 = vmatmul.msk.f32.vlgmr.msra.gmra.mxu0 %vm283_vm1, %v250_v1  ;;  %2925 = vmatmul.msk.f32.vlgmr.msra.gmra.mxu3 %vm283_vm1, %v275_v2  ;;  %v251_v3 = vld [vmem:[%s3267_s15 + $0x8] sm:$0xff]  ;;  %v252_v5 = vld [vmem:[%s3267_s15 + $0x10] sm:$0xff]  ;;  %v277_v6 = vld [vmem:[%s3267_s15 + $0xd8] sm:$0xff]  ;;  %s242_s14 = sand.u32 1, %s3157_s22  }
  0x1b   : > { %v253_v7 = vld [vmem:[%s3267_s15 + $0x18] sm:$0xff]  ;;  %v254_v8 = vld [vmem:[%s3267_s15 + $0x20] sm:$0xff]  ;;  %v255_v9 = vld [vmem:[%s3267_s15 + $0x28] sm:$0xff]  ;;  %s2896_s9 = sshll.u32 %s242_s14, 8 }
  0x1c   : > { %v278_v10 = vld [vmem:[%s3267_s15 + $0xe0] sm:$0xff]  ;;  %v256_v11 = vld [vmem:[%s3267_s15 + $0x30] sm:$0xff]  ;;  %v279_v12 = vld [vmem:[%s3267_s15 + $0xe8] sm:$0xff]  ;;  %s4190_s10 = scalar_lea.vmem [#allocation3], %s2896_s9 }
  0x1d   : > { %v257_v13 = vld [vmem:[%s3267_s15 + $0x38] sm:$0xff]  ;;  %v258_v14 = vld [vmem:[%s3267_s15 + $0x40] sm:$0xff]  ;;  %v259_v15 = vld [vmem:[%s3267_s15 + $0x48] sm:$0xff]  ;;  %s2827_s12 = sshll.u32 %s4190_s10, 4  ;;  %s2828_s12 = int_to_ptr.vmem [resolvable:$true] %s2827_s12 }
  0x1e   : > { %v260_v16 = vld [vmem:[%s3267_s15 + $0x50] sm:$0xff]  ;;  %v261_v17 = vld [vmem:[%s3267_s15 + $0x58] sm:$0xff]  ;;  %v262_v18 = vld [vmem:[%s3267_s15 + $0x60] sm:$0xff] }
  0x1f   : > { %v263_v19 = vld [vmem:[%s3267_s15 + $0x68] sm:$0xff]  ;;  %v264_v20 = vld [vmem:[%s3267_s15 + $0x70] sm:$0xff]  ;;  %v265_v21 = vld [vmem:[%s3267_s15 + $0x78] sm:$0xff] }
  0x20   : > { %v266_v23 = vld [vmem:[%s3267_s15 + $0x80] sm:$0xff]  ;;  %v267_v27 = vld [vmem:[%s3267_s15 + $0x88] sm:$0xff]  ;;  %v268_v37 = vld [vmem:[%s3267_s15 + $0x90] sm:$0xff] }
  0x21   : > { %v269_v44 = vld [vmem:[%s3267_s15 + $0x98] sm:$0xff]  ;;  %v270_v52 = vld [vmem:[%s3267_s15 + $0xa0] sm:$0xff]  ;;  %v271_v56 = vld [vmem:[%s3267_s15 + $0xa8] sm:$0xff] }
  0x22   : > { %2901 = vmatmul.msk.f32.gmra.mxu0 %vm283_vm1, %v251_v3  ;;  %2926 = vmatmul.msk.f32.gmra.mxu3 %vm283_vm1, %v276_v4  ;;  %v272_v62 = vld [vmem:[%s3267_s15 + $0xb0] sm:$0xff]  ;;  %v273_v3 = vld [vmem:[%s3267_s15 + $0xb8] sm:$0xff] }
  0x2a   : > { %2902 = vmatmul.msk.f32.gmra.mxu0 %vm283_vm1, %v252_v5  ;;  %2927 = vmatmul.msk.f32.gmra.mxu3 %vm283_vm1, %v277_v6 }
  0x32   : > { %2903 = vmatmul.msk.f32.gmra.mxu0 %vm283_vm1, %v253_v7  ;;  %2928 = vmatmul.msk.f32.gmra.mxu3 %vm283_vm1, %v278_v10 }
  0x3a   : > { %2904 = vmatmul.msk.f32.gmra.mxu0 %vm283_vm1, %v254_v8  ;;  %2929 = vmatmul.msk.f32.gmra.mxu3 %vm283_vm1, %v279_v12 }
  0x42   : > { %2905 = vmatmul.msk.f32.gmra.mxu0 %vm283_vm1, %v255_v9 }
  0x4a   : > { %2906 = vmatmul.msk.f32.gmra.mxu0 %vm283_vm1, %v256_v11  ;;  %v274_v11 = vld [vmem:[%s3267_s15 + $0xc0] sm:$0xff] }
  0x52   : > { %2907 = vmatmul.msk.f32.gmra.mxu0 %vm283_vm1, %v257_v13 }
  0x5a   : > { %2908 = vmatmul.msk.f32.gmra.mxu0 %vm283_vm1, %v258_v14 }
  0x62   : > { %2909 = vmatmul.msk.f32.gmra.mxu0 %vm283_vm1, %v259_v15 }
  0x6a   : > { %2910 = vmatmul.msk.f32.gmra.mxu0 %vm283_vm1, %v260_v16 }
  0x72   : > { %2911 = vmatmul.msk.f32.gmra.mxu0 %vm283_vm1, %v261_v17 }
  0x7a   : > { %2912 = vmatmul.msk.f32.gmra.mxu0 %vm283_vm1, %v262_v18 }
  0x82   : > { %2913 = vmatmul.msk.f32.gmra.mxu0 %vm283_vm1, %v263_v19 }
  0x8a   : > { %2914 = vmatmul.msk.f32.gmra.mxu0 %vm283_vm1, %v264_v20 }
  0x92   : > { %2915 = vmatmul.msk.f32.gmra.mxu0 %vm283_vm1, %v265_v21 }
  0x97   : > { %v401_v22 = vpop.f32.mrf.mxu0 }
  0x98   : > { %499 = vst.msk [vmem:[#allocation2 + $0x19] sm:$0xff] %vm498_vm2, %v401_v22 }
  0x99   : > { %531 = vst.msk [vmem:[#allocation2 + $0x1] sm:$0xff] %vm498_vm2, %v401_v22 }
  0x9a   : > { %2916 = vmatmul.msk.f32.gmra.mxu0 %vm283_vm1, %v266_v23 }
  0x9d   : > { %v476_v24 = vpop.f32.mrf.mxu3 }
  0x9e   : > { %524 = vst.msk [vmem:[#allocation2 + $0x141] sm:$0xff] %vm498_vm2, %v476_v24 }
  0x9f   : > { %v404_v25 = vpop.f32.mrf.mxu0  ;;  %v737_v26 = vld [vmem:[#allocation2 + $0x19] sm:$0xff] }
  0xa0   : > { %v536_v28 = vld [vmem:[#allocation2 + $0x1] sm:$0x1]  ;;  %500 = vst.msk [vmem:[#allocation2 + $0x21] sm:$0xff] %vm498_vm2, %v404_v25  ;;  %1314 = vrot.lane.b32.xlu2 %v737_v26, %s3167_s16  ;;  %934 = vrot.lane.b32.xlu1 %v737_v26, %s3168_s17  ;;  %v537_v30 = vld [vmem:[#allocation2 + $0x19] sm:$0x1] }
  0xa1   : > { %v641_v29 = vld [vmem:[#allocation2 + $0x1] sm:$0xff]  ;;  %555 = vst.msk [vmem:[#allocation2] sm:$0x1] %vm554_vm3, %v536_v28 }
  0xa2   : > { %930 = vrot.lane.b32.xlu0 %v641_v29, %s3168_s17  ;;  %532 = vst.msk [vmem:[#allocation2 + $0x9] sm:$0xff] %vm498_vm2, %v404_v25  ;;  %2917 = vmatmul.msk.f32.gmra.mxu0 %vm283_vm1, %v267_v27 }
  0xa3   : > { %556 = vst.msk [vmem:[#allocation2 + $0x18] sm:$0x1] %vm554_vm3, %v537_v30 }
  0xa5   : > { %v586_v31 = vld [vmem:[#allocation2 + $0x148] sm:$0x1]  ;;  %v479_v32 = vpop.f32.mrf.mxu3 }
  0xa6   : > { %604 = vst.msk [vmem:[#allocation2 + $0x149] sm:$0x1] %vm554_vm3, %v586_v31  ;;  %v668_v33 = vld [vmem:[#allocation2 + $0x141] sm:$0xff] }
  0xa7   : > { %v574_v34 = vld [vmem:[#allocation2 + $0x28] sm:$0x1]  ;;  %v407_v35 = vpop.f32.mrf.mxu0  ;;  %525 = vst.msk [vmem:[#allocation2 + $0x151] sm:$0xff] %vm498_vm2, %v479_v32  ;;  %v675_v43 = vld [vmem:[#allocation2 + $0x1a] sm:$0xff] }
  0xa8   : > { %v644_v36 = vld [vmem:[#allocation2 + $0x21] sm:$0xff]  ;;  %592 = vst.msk [vmem:[#allocation2 + $0x29] sm:$0x1] %vm554_vm3, %v574_v34 }
  0xa9   : > { %936 = vrot.lane.b32.xlu1 %v644_v36, %s3168_s17  ;;  %v573_v38 = vld [vmem:[#allocation2 + $0x10] sm:$0x1]  ;;  %501 = vst.msk [vmem:[#allocation2 + $0x31] sm:$0xff] %vm498_vm2, %v407_v35  ;;  %v673_v39 = vld [vmem:[#allocation2 + $0x2] sm:$0xff] }
  0xaa   : > { %984 = vrot.lane.b32.xlu0 %v668_v33, %s3168_s17  ;;  %591 = vst.msk [vmem:[#allocation2 + $0x11] sm:$0x1] %vm554_vm3, %v573_v38  ;;  %1058 = vrot.lane.b32.xlu2 %v673_v39, %s3169_s18  ;;  %v642_v46 = vld [vmem:[#allocation2 + $0x9] sm:$0xff]  ;;  %v3342_v47 = vld [vmem:[#allocation2 + $0x20] sm:$0xff]  ;;  %v3348_v51 = vld [vmem:[#allocation2 + $0x18] sm:$0xff] }
  0xab   : > { %2918 = vmatmul.msk.f32.gmra.mxu0 %vm283_vm1, %v268_v37 }
  0xad   : > { %v482_v40 = vpop.f32.mrf.mxu3  ;;  %v700_v53 = vld [vmem:[#allocation2 + $0x142] sm:$0xff] }
  0xae   : > { %v550_v41 = vld [vmem:[#allocation2 + $0x151] sm:$0x1]  ;;  %526 = vst.msk [vmem:[#allocation2 + $0x159] sm:$0xff] %vm498_vm2, %v482_v40 }
  0xaf   : > { %v410_v42 = vpop.f32.mrf.mxu0  ;;  %569 = vst.msk [vmem:[#allocation2 + $0x150] sm:$0x1] %vm554_vm3, %v550_v41  ;;  %v669_v59 = vld [vmem:[#allocation2 + $0x151] sm:$0xff]  ;;  %v676_v63 = vld [vmem:[#allocation2 + $0x22] sm:$0xff] }
  0xb0   : > { %v538_v45 = vld [vmem:[#allocation2 + $0x31] sm:$0x1]  ;;  %502 = vst.msk [vmem:[#allocation2 + $0x39] sm:$0xff] %vm498_vm2, %v410_v42 }
  0xb1   : > { %1062 = vrot.lane.b32.xlu1 %v675_v43, %s3169_s18  ;;  %557 = vst.msk [vmem:[#allocation2 + $0x30] sm:$0x1] %vm554_vm3, %v538_v45  ;;  %v645_v55 = vld [vmem:[#allocation2 + $0x31] sm:$0xff] }
  0xb2   : > { %932 = vrot.lane.b32.xlu0 %v642_v46, %s3168_s17  ;;  %1188 = vrot.lane.b32.xlu2 %v3342_v47, %s3170_s19  ;;  %v674_v58 = vld [vmem:[#allocation2 + $0xa] sm:$0xff] }
  0xb3   : > { %2919 = vmatmul.msk.f32.gmra.mxu0 %vm283_vm1, %v269_v44 }
  0xb5   : > { %v587_v48 = vld [vmem:[#allocation2 + $0x160] sm:$0x1]  ;;  %v485_v0 = vpop.f32.mrf.mxu3  ;;  %v701_v5 = vld [vmem:[#allocation2 + $0x152] sm:$0xff] }
  0xb6   : > { %605 = vst.msk [vmem:[#allocation2 + $0x161] sm:$0x1] %vm554_vm3, %v587_v48  ;;  %v670_v17 = vld [vmem:[#allocation2 + $0x159] sm:$0xff] }
  0xb7   : > { %v575_v49 = vld [vmem:[#allocation2 + $0x40] sm:$0x1]  ;;  %v413_v50 = vpop.f32.mrf.mxu0  ;;  %527 = vst.msk [vmem:[#allocation2 + $0x169] sm:$0xff] %vm498_vm2, %v485_v0  ;;  %v3373_v2 = vld [vmem:[#allocation2 + $0x38] sm:$0xff] }
  0xb8   : > { %593 = vst.msk [vmem:[#allocation2 + $0x41] sm:$0x1] %vm554_vm3, %v575_v49  ;;  %v3385_v10 = vld [vmem:[#allocation2 + $0x30] sm:$0xff]  ;;  %v835_v15 = vld [vmem:[#allocation2 + $0x39] sm:$0xff] }
  0xb9   : > { %1186 = vrot.lane.b32.xlu1 %v3348_v51, %s3170_s19  ;;  %503 = vst.msk [vmem:[#allocation2 + $0x49] sm:$0xff] %vm498_vm2, %v413_v50  ;;  %v677_v12 = vld [vmem:[#allocation2 + $0x32] sm:$0xff] }
  0xba   : > { %1442 = vrot.lane.b32.xlu0 %v675_v43, %s3171_s20  ;;  %1112 = vrot.lane.b32.xlu2 %v700_v53, %s3169_s18 }
  0xbb   : > { %2920 = vmatmul.msk.f32.gmra.mxu0 %vm283_vm1, %v270_v52 }
  0xbd   : > { %v488_v7 = vpop.f32.mrf.mxu3  ;;  %v702_v21 = vld [vmem:[#allocation2 + $0x15a] sm:$0xff] }
  0xbe   : > { %v551_v6 = vld [vmem:[#allocation2 + $0x169] sm:$0x1]  ;;  %528 = vst.msk [vmem:[#allocation2 + $0x171] sm:$0xff] %vm498_vm2, %v488_v7  ;;  %v2191_v7 = vld [vmem:[%s4957_s2 + $0x30] sm:$0xff] }
  0xbf   : > { %v416_v54 = vpop.f32.mrf.mxu0  ;;  %570 = vst.msk [vmem:[#allocation2 + $0x168] sm:$0x1] %vm554_vm3, %v551_v6  ;;  %v671_v23 = vld [vmem:[#allocation2 + $0x169] sm:$0xff]  ;;  %v867_v26 = vld [vmem:[#allocation2 + $0x3a] sm:$0xff] }
  0xc0   : > { %v539_v57 = vld [vmem:[#allocation2 + $0x49] sm:$0x1]  ;;  %504 = vst.msk [vmem:[#allocation2 + $0x51] sm:$0xff] %vm498_vm2, %v416_v54 }
  0xc1   : > { %1316 = vrot.lane.b32.xlu1 %v644_v36, %s3167_s16  ;;  %558 = vst.msk [vmem:[#allocation2 + $0x48] sm:$0x1] %vm554_vm3, %v539_v57  ;;  %v741_v28 = vld [vmem:[#allocation2 + $0x49] sm:$0xff] }
  0xc2   : > { %1060 = vrot.lane.b32.xlu0 %v674_v58, %s3169_s18  ;;  %938 = vrot.lane.b32.xlu2 %v645_v55, %s3168_s17 }
  0xc3   : > { %2921 = vmatmul.msk.f32.gmra.mxu0 %vm283_vm1, %v271_v56 }
  0xc5   : > { %v588_v13 = vld [vmem:[#allocation2 + $0x178] sm:$0x1]  ;;  %v703_v31 = vld [vmem:[#allocation2 + $0x16a] sm:$0xff] }
  0xc6   : > { %606 = vst.msk [vmem:[#allocation2 + $0x179] sm:$0x1] %vm554_vm3, %v588_v13  ;;  %v672_v33 = vld [vmem:[#allocation2 + $0x171] sm:$0xff]  ;;  %v2189_v13 = vld [vmem:[%s4957_s2 + $0x20] sm:$0xff] }
  0xc7   : > { %v576_v60 = vld [vmem:[#allocation2 + $0x58] sm:$0x1]  ;;  %v419_v61 = vpop.f32.mrf.mxu0  ;;  %v679_v36 = vld [vmem:[#allocation2 + $0x4a] sm:$0xff] }
  0xc8   : > { %594 = vst.msk [vmem:[#allocation2 + $0x59] sm:$0x1] %vm554_vm3, %v576_v60  ;;  %v648_v38 = vld [vmem:[#allocation2 + $0x51] sm:$0xff]  ;;  %v3438_v41 = vld [vmem:[#allocation2 + $0x48] sm:$0xff] }
  0xc9   : > { %986 = vrot.lane.b32.xlu1 %v669_v59, %s3168_s17  ;;  %505 = vst.msk [vmem:[#allocation2 + $0x61] sm:$0xff] %vm498_vm2, %v419_v61  ;;  %v3449_v48 = vld [vmem:[#allocation2 + $0x50] sm:$0xff] }
  0xca   : > { %1318 = vrot.lane.b32.xlu0 %v645_v55, %s3167_s16  ;;  %1064 = vrot.lane.b32.xlu2 %v676_v63, %s3169_s18 }
  0xcb   : > { %2922 = vmatmul.msk.f32.gmra.mxu0 %vm283_vm1, %v272_v62 }
  0xcd   : > { %v704_v61 = vld [vmem:[#allocation2 + $0x172] sm:$0xff] }
  0xcf   : > { %v422_v1 = vpop.f32.mrf.mxu0 }
  0xd0   : > { %v540_v4 = vld [vmem:[#allocation2 + $0x61] sm:$0x1]  ;;  %506 = vst.msk [vmem:[#allocation2 + $0x69] sm:$0xff] %vm498_vm2, %v422_v1 }
  0xd1   : > { %1192 = vrot.lane.b32.xlu1 %v3373_v2, %s3170_s19  ;;  %559 = vst.msk [vmem:[#allocation2 + $0x60] sm:$0x1] %vm554_vm3, %v540_v4  ;;  %v838_v58 = vld [vmem:[#allocation2 + $0x61] sm:$0xff]  ;;  %v680_v4 = vld [vmem:[#allocation2 + $0x52] sm:$0xff] }
  0xd2   : > { %1114 = vrot.lane.b32.xlu0 %v701_v5, %s3169_s18  ;;  %1698 = vrot.lane.b32.xlu2 %v645_v55, %s3172_s26  ;;  %v2193_v1 = vld [vmem:[%s4957_s2 + $0x40] sm:$0xff]  ;;  %v2192_v5 = vld [vmem:[%s4957_s2 + $0x38] sm:$0xff] }
  0xd3   : > { %2923 = vmatmul.msk.f32.gmra.mxu0 %vm283_vm1, %v273_v3  ;;  %2298 = vmatpush.msra.mxu1 %v2193_v1 }
  0xd4   : > { %3004 = vmatpush.msrb.mxu3 %v2193_v1 }
  0xd5   : > { %2299 = vmatpush.msra.mxu1 %v2192_v5 }
  0xd6   : > { %3005 = vmatpush.msrb.mxu3 %v2192_v5  ;;  %v610_v5 = vld [vmem:[#allocation2 + $0x8] sm:$0xff] }
  0xd7   : > { %v577_v8 = vld [vmem:[#allocation2 + $0x70] sm:$0x1]  ;;  %v425_v9 = vpop.f32.mrf.mxu0  ;;  %2300 = vmatpush.msra.mxu1 %v2191_v7 }
  0xd8   : > { %595 = vst.msk [vmem:[#allocation2 + $0x71] sm:$0x1] %vm554_vm3, %v577_v8  ;;  %3006 = vmatpush.msrb.mxu3 %v2191_v7 }
  0xd9   : > { %1570 = vrot.lane.b32.xlu1 %v3385_v10, %s3173_s28  ;;  %507 = vst.msk [vmem:[#allocation2 + $0x79] sm:$0xff] %vm498_vm2, %v425_v9 }
  0xda   : > { %1066 = vrot.lane.b32.xlu0 %v677_v12, %s3169_s18  ;;  %1444 = vrot.lane.b32.xlu2 %v676_v63, %s3171_s20 }
  0xdb   : > { %2924 = vmatmul.msk.f32.gmra.mxu0 %vm283_vm1, %v274_v11  ;;  %v2190_v11 = vld [vmem:[%s4957_s2 + $0x28] sm:$0xff] }
  0xdc   : > { %2301 = vmatpush.msra.mxu1 %v2190_v11  ;;  %3007 = vmatpush.msrb.mxu3 %v2190_v11 }
  0xde   : > { %2302 = vmatpush.msra.mxu1 %v2189_v13  ;;  %3008 = vmatpush.msrb.mxu3 %v2189_v13 }
  0xdf   : > { %v428_v14 = vpop.f32.mrf.mxu0 }
  0xe0   : > { %v541_v16 = vld [vmem:[#allocation2 + $0x79] sm:$0x1]  ;;  %508 = vst.msk [vmem:[#allocation2 + $0x81] sm:$0xff] %vm498_vm2, %v428_v14 }
  0xe1   : > { %1700 = vrot.lane.b32.xlu1 %v835_v15, %s3172_s26  ;;  %560 = vst.msk [vmem:[#allocation2 + $0x78] sm:$0x1] %vm554_vm3, %v541_v16  ;;  %v3512_v16 = vld [vmem:[#allocation2 + $0x62] sm:$0xff] }
  0xe2   : > { %1190 = vrot.lane.b32.xlu0 %v3385_v10, %s3170_s19  ;;  %988 = vrot.lane.b32.xlu2 %v670_v17, %s3168_s17  ;;  %v2188_v17 = vld [vmem:[%s4957_s2 + $0x18] sm:$0xff] }
  0xe3   : > { %2303 = vmatpush.msra.mxu1 %v2188_v17  ;;  %3009 = vmatpush.msrb.mxu3 %v2188_v17 }
  0xe7   : > { %v578_v18 = vld [vmem:[#allocation2 + $0x88] sm:$0x1]  ;;  %v431_v19 = vpop.f32.mrf.mxu0 }
  0xe8   : > { %596 = vst.msk [vmem:[#allocation2 + $0x89] sm:$0x1] %vm554_vm3, %v578_v18  ;;  %v2187_v18 = vld [vmem:[%s4957_s2 + $0x10] sm:$0xff] }
  0xe9   : > { %1446 = vrot.lane.b32.xlu1 %v677_v12, %s3171_s20  ;;  %509 = vst.msk [vmem:[#allocation2 + $0x91] sm:$0xff] %vm498_vm2, %v431_v19  ;;  %2304 = vmatpush.msra.mxu1 %v2187_v18 }
  0xea   : > { %1826 = vrot.lane.b32.xlu0 %v677_v12, %s3174_s29  ;;  %940 = vrot.lane.b32.xlu2 %v835_v15, %s3168_s17 }
  0xeb   : > { %3010 = vmatpush.msrb.mxu3 %v2187_v18  ;;  %v3614_v18 = vld [vmem:[#allocation2 + $0x7a] sm:$0xff] }
  0xef   : > { %v434_v20 = vpop.f32.mrf.mxu0 }
  0xf0   : > { %v542_v22 = vld [vmem:[#allocation2 + $0x91] sm:$0x1]  ;;  %510 = vst.msk [vmem:[#allocation2 + $0x99] sm:$0xff] %vm498_vm2, %v434_v20 }
  0xf1   : > { %1116 = vrot.lane.b32.xlu1 %v702_v21, %s3169_s18  ;;  %561 = vst.msk [vmem:[#allocation2 + $0x90] sm:$0x1] %vm554_vm3, %v542_v22  ;;  %v2186_v21 = vld [vmem:[%s4957_s2 + $0x8] sm:$0xff] }
  0xf2   : > { %1572 = vrot.lane.b32.xlu0 %v3373_v2, %s3173_s28  ;;  %1320 = vrot.lane.b32.xlu2 %v835_v15, %s3167_s16 }
  0xf3   : > { %2305 = vmatpush.msra.mxu1 %v2186_v21  ;;  %3011 = vmatpush.msrb.mxu3 %v2186_v21 }
  0xf7   : > { %v579_v24 = vld [vmem:[#allocation2 + $0xa0] sm:$0x1]  ;;  %v437_v25 = vpop.f32.mrf.mxu0 }
  0xf8   : > { %597 = vst.msk [vmem:[#allocation2 + $0xa1] sm:$0x1] %vm554_vm3, %v579_v24 }
  0xf9   : > { %1068 = vrot.lane.b32.xlu1 %v867_v26, %s3169_s18  ;;  %511 = vst.msk [vmem:[#allocation2 + $0xa9] sm:$0xff] %vm498_vm2, %v437_v25  ;;  %v3538_v25 = vld [vmem:[#allocation2 + $0x60] sm:$0xff] }
  0xfa   : > { %990 = vrot.lane.b32.xlu0 %v671_v23, %s3168_s17  ;;  %1828 = vrot.lane.b32.xlu2 %v867_v26, %s3174_s29  ;;  %v3418_v27 = vpop.permute.xlu2 %1314  ;;  %v2185_v23 = vld [vmem:[%s4957_s2] sm:$0xff] }
  0xfb   : > { %2306 = vmatpush.msra.mxu1 %v2185_v23  ;;  %3012 = vmatpush.msrb.mxu3 %v2185_v23 }
  0xff   : > { %v440_v29 = vpop.f32.mrf.mxu0 }
 0x100   : > { %v543_v30 = vld [vmem:[#allocation2 + $0xa9] sm:$0x1]  ;;  %512 = vst.msk [vmem:[#allocation2 + $0xb1] sm:$0xff] %vm498_vm2, %v440_v29 }
 0x101   : > { %1322 = vrot.lane.b32.xlu1 %v741_v28, %s3167_s16  ;;  %562 = vst.msk [vmem:[#allocation2 + $0xa8] sm:$0x1] %vm554_vm3, %v543_v30  ;;  %v3544_v29 = vld [vmem:[#allocation2 + $0x68] sm:$0xff] }
 0x102   : > { %942 = vrot.lane.b32.xlu0 %v741_v28, %s3168_s17  ;;  %1118 = vrot.lane.b32.xlu2 %v703_v31, %s3169_s18 }
 0x104   : > { %v3425_v32 = vpop.permute.xlu2 %1058 }
 0x107   : > { %v580_v34 = vld [vmem:[#allocation2 + $0xb8] sm:$0x1]  ;;  %v443_v35 = vpop.f32.mrf.mxu0 }
 0x108   : > { %598 = vst.msk [vmem:[#allocation2 + $0xb9] sm:$0x1] %vm554_vm3, %v580_v34 }
 0x109   : > { %992 = vrot.lane.b32.xlu1 %v672_v33, %s3168_s17  ;;  %513 = vst.msk [vmem:[#allocation2 + $0xc1] sm:$0xff] %vm498_vm2, %v443_v35 }
 0x10a   : > { %1702 = vrot.lane.b32.xlu0 %v741_v28, %s3172_s26  ;;  %1070 = vrot.lane.b32.xlu2 %v679_v36, %s3169_s18  ;;  %v650_v28 = vld [vmem:[#allocation2 + $0x69] sm:$0xff] }
 0x10c   : > { %v3432_v37 = vpop.permute.xlu2 %1188 }
 0x10f   : > { %v446_v39 = vpop.f32.mrf.mxu0 }
 0x110   : > { %v544_v40 = vld [vmem:[#allocation2 + $0xc1] sm:$0x1]  ;;  %514 = vst.msk [vmem:[#allocation2 + $0xc9] sm:$0xff] %vm498_vm2, %v446_v39 }
 0x111   : > { %944 = vrot.lane.b32.xlu1 %v648_v38, %s3168_s17  ;;  %563 = vst.msk [vmem:[#allocation2 + $0xc0] sm:$0x1] %vm554_vm3, %v544_v40  ;;  %v609_v39 = vld [vmem:[#allocation2] sm:$0xff] }
 0x112   : > { %1448 = vrot.lane.b32.xlu0 %v867_v26, %s3171_s20  ;;  %1194 = vrot.lane.b32.xlu2 %v3438_v41, %s3170_s19  ;;  %v3442_v42 = vpop.permute.xlu1 %934 }
 0x114   : > { %v3444_v43 = vpop.permute.xlu0 %930  ;;  %v3446_v44 = vpop.permute.xlu2 %1112 }
 0x115   : > { %4977 = vst [vmem:[#allocation6_spill] sm:$0xff] %v3446_v44 }
 0x117   : > { %v581_v45 = vld [vmem:[#allocation2 + $0xd0] sm:$0x1]  ;;  %v449_v46 = vpop.f32.mrf.mxu0 }
 0x118   : > { %599 = vst.msk [vmem:[#allocation2 + $0xd1] sm:$0x1] %vm554_vm3, %v581_v45  ;;  %v1922_v45 = vsel %vm498_vm2, %v609_v39, %v3444_v43  ;;  %v3650_v39 = vld [vmem:[#allocation2 + $0x81] sm:$0xff] }
 0x119   : > { %1830 = vrot.lane.b32.xlu1 %v679_v36, %s3174_s29  ;;  %515 = vst.msk [vmem:[#allocation2 + $0xd9] sm:$0xff] %vm498_vm2, %v449_v46  ;;  %v3568_v46 = vld [vmem:[#allocation2 + $0x79] sm:$0xff] }
 0x11a   : > { %1196 = vrot.lane.b32.xlu0 %v3449_v48, %s3170_s19  ;;  %1574 = vrot.lane.b32.xlu2 %v3438_v41, %s3173_s28 }
 0x11b   : > { %v3457_v49 = vpop.permute.xlu1 %936 }
 0x11c   : > { %v3459_v50 = vpop.permute.xlu0 %984  ;;  %v3461_v52 = vpop.permute.xlu2 %938 }
 0x11d   : > { %4978 = vst [vmem:[#allocation7_spill] sm:$0xff] %v3459_v50 }
 0x11f   : > { %v452_v53 = vpop.f32.mrf.mxu0 }
 0x120   : > { %v545_v54 = vld [vmem:[#allocation2 + $0xd9] sm:$0x1]  ;;  %516 = vst.msk [vmem:[#allocation2 + $0xe1] sm:$0xff] %vm498_vm2, %v452_v53 }
 0x121   : > { %1576 = vrot.lane.b32.xlu1 %v3449_v48, %s3173_s28  ;;  %564 = vst.msk [vmem:[#allocation2 + $0xd8] sm:$0x1] %vm554_vm3, %v545_v54  ;;  %v1955_v54 = vsel %vm1954_vm4, %v1922_v45, %v3425_v32 }
 0x122   : > { %1324 = vrot.lane.b32.xlu0 %v648_v38, %s3167_s16  ;;  %1704 = vrot.lane.b32.xlu2 %v648_v38, %s3172_s26 }
 0x123   : > { %v3469_v55 = vpop.permute.xlu1 %1062 }
 0x124   : > { %v3471_v56 = vpop.permute.xlu0 %932  ;;  %v3473_v57 = vpop.permute.xlu2 %1064 }
 0x127   : > { %v582_v59 = vld [vmem:[#allocation2 + $0xe8] sm:$0x1] }
 0x128   : > { %v455_v60 = vpop.f32.mrf.mxu0  ;;  %600 = vst.msk [vmem:[#allocation2 + $0xe9] sm:$0x1] %vm554_vm3, %v582_v59  ;;  %v3779_v44 = vld [vmem:[#allocation2 + $0xe1] sm:$0xff] }
 0x129   : > { %1706 = vrot.lane.b32.xlu1 %v838_v58, %s3172_s26  ;;  %517 = vst.msk [vmem:[#allocation2 + $0xf1] sm:$0xff] %vm498_vm2, %v455_v60 }
 0x12a   : > { %1120 = vrot.lane.b32.xlu0 %v704_v61, %s3169_s18  ;;  %1450 = vrot.lane.b32.xlu2 %v679_v36, %s3171_s20 }
 0x12b   : > { %v3480_v62 = vpop.permute.xlu1 %1186 }
 0x12c   : > { %v3482_v63 = vpop.permute.xlu0 %1442  ;;  %v3484_v0 = vpop.permute.xlu2 %1698  ;;  %v1988_v59 = vsel %vm1987_vm5, %v1955_v54, %v3480_v62 }
 0x12d   : > { %v2021_v32 = vsel %vm2020_vm6, %v1988_v59, %v3418_v27  ;;  %v1923_v27 = vsel %vm498_vm2, %v610_v5, %v3471_v56  ;;  %v3660_v59 = vld [vmem:[#allocation2 + $0x91] sm:$0xff]  ;;  %v1924_v5 = vsel %vm498_vm2, %v3348_v51, %v3442_v42  ;;  %v3703_v42 = vld [vmem:[#allocation2 + $0x9a] sm:$0xff] }
 0x12e   : > { %v2054_v1 = vsel %vm2053_vm7, %v2021_v32, %v3482_v63 }
 0x130   : > { %v458_v3 = vpop.f32.mrf.mxu0  ;;  %v546_v6 = vld [vmem:[#allocation2 + $0xf1] sm:$0x1] }
 0x131   : > { %518 = vst.msk [vmem:[#allocation2 + $0xf9] sm:$0xff] %vm498_vm2, %v458_v3  ;;  %1452 = vrot.lane.b32.xlu1 %v680_v4, %s3171_s20 }
 0x132   : > { %565 = vst.msk [vmem:[#allocation2 + $0xf0] sm:$0x1] %vm554_vm3, %v546_v6  ;;  %1072 = vrot.lane.b32.xlu0 %v680_v4, %s3169_s18  ;;  %946 = vrot.lane.b32.xlu2 %v838_v58, %s3168_s17 }
 0x133   : > { %v3500_v8 = vpop.permute.xlu1 %1316 }
 0x134   : > { %v3502_v9 = vpop.permute.xlu0 %1060  ;;  %v3507_v12 = vpop.permute.xlu2 %1444 }
 0x135   : > { %v1956_v63 = vsel %vm1954_vm4, %v1923_v27, %v3502_v9  ;;  %v1957_v27 = vsel %vm1954_vm4, %v1924_v5, %v3469_v55  ;;  %v3737_v5 = vld [vmem:[#allocation2 + $0xc8] sm:$0xff] }
 0x138   : > { %v583_v14 = vld [vmem:[#allocation2 + $0x100] sm:$0x1]  ;;  %v461_v15 = vpop.f32.mrf.mxu0 }
 0x139   : > { %601 = vst.msk [vmem:[#allocation2 + $0x101] sm:$0x1] %vm554_vm3, %v583_v14  ;;  %1074 = vrot.lane.b32.xlu1 %v3512_v16, %s3169_s18 }
 0x13a   : > { %519 = vst.msk [vmem:[#allocation2 + $0x109] sm:$0xff] %vm498_vm2, %v461_v15  ;;  %1832 = vrot.lane.b32.xlu0 %v680_v4, %s3174_s29  ;;  %1326 = vrot.lane.b32.xlu2 %v838_v58, %s3167_s16  ;;  %v682_v4 = vld [vmem:[#allocation2 + $0x6a] sm:$0xff]  ;;  %v1989_v15 = vsel %vm1987_vm5, %v1956_v63, %v3432_v37 }
 0x13b   : > { %v3526_v19 = vpop.permute.xlu1 %986  ;;  %v2022_v9 = vsel %vm2020_vm6, %v1989_v15, %v3500_v8  ;;  %v3699_v15 = vld [vmem:[#allocation2 + $0xa8] sm:$0xff] }
 0x13c   : > { %4979 = vst [vmem:[#allocation8_spill] sm:$0xff] %v3526_v19  ;;  %v3528_v20 = vpop.permute.xlu0 %1318  ;;  %v3533_v22 = vpop.permute.xlu2 %988 }
 0x13d   : > { %4980 = vst [vmem:[#allocation9_spill] sm:$0xff] %v3533_v22 }
 0x140   : > { %v464_v24 = vpop.f32.mrf.mxu0 }
 0x141   : > { %v547_v26 = vld [vmem:[#allocation2 + $0x109] sm:$0x1]  ;;  %520 = vst.msk [vmem:[#allocation2 + $0x111] sm:$0xff] %vm498_vm2, %v464_v24  ;;  %1198 = vrot.lane.b32.xlu1 %v3538_v25, %s3170_s19 }
 0x142   : > { %566 = vst.msk [vmem:[#allocation2 + $0x108] sm:$0x1] %vm554_vm3, %v547_v26  ;;  %948 = vrot.lane.b32.xlu0 %v650_v28, %s3168_s17  ;;  %1200 = vrot.lane.b32.xlu2 %v3544_v29, %s3170_s19 }
 0x143   : > { %v3549_v30 = vpop.permute.xlu1 %1192 }
 0x144   : > { %v3551_v31 = vpop.permute.xlu0 %1114  ;;  %v3553_v33 = vpop.permute.xlu2 %940 }
 0x145   : > { %4981 = vst [vmem:[#allocation10_spill] sm:$0xff] %v3551_v31 }
 0x148   : > { %v584_v34 = vld [vmem:[#allocation2 + $0x118] sm:$0x1]  ;;  %v467_v35 = vpop.f32.mrf.mxu0 }
 0x149   : > { %602 = vst.msk [vmem:[#allocation2 + $0x119] sm:$0x1] %vm554_vm3, %v584_v34  ;;  %1328 = vrot.lane.b32.xlu1 %v650_v28, %s3167_s16 }
 0x14a   : > { %521 = vst.msk [vmem:[#allocation2 + $0x121] sm:$0xff] %vm498_vm2, %v467_v35  ;;  %1578 = vrot.lane.b32.xlu0 %v3538_v25, %s3173_s28  ;;  %1834 = vrot.lane.b32.xlu2 %v3512_v16, %s3174_s29 }
 0x14b   : > { %v1571_v36 = vpop.permute.xlu1 %1570 }
 0x14c   : > { %v3562_v38 = vpop.permute.xlu0 %1066  ;;  %v3564_v40 = vpop.permute.xlu2 %1320  ;;  %v2087_v6 = vsel %vm2086_vm8, %v2054_v1, %v1571_v36  ;;  %v3644_v36 = vld [vmem:[#allocation2 + $0x82] sm:$0xff] }
 0x14d   : > { %v2120_v13 = vsel %vm2119_vm9, %v2087_v6, %v3484_v0  ;;  %v2055_v0 = vsel %vm2053_vm7, %v2022_v9, %v3507_v12 }
 0x150   : > { %v470_v53 = vpop.f32.mrf.mxu0 }
 0x151   : > { %v548_v58 = vld [vmem:[#allocation2 + $0x121] sm:$0x1]  ;;  %522 = vst.msk [vmem:[#allocation2 + $0x129] sm:$0xff] %vm498_vm2, %v470_v53  ;;  %950 = vrot.lane.b32.xlu1 %v3568_v46, %s3168_s17 }
 0x152   : > { %567 = vst.msk [vmem:[#allocation2 + $0x120] sm:$0x1] %vm554_vm3, %v548_v58  ;;  %1708 = vrot.lane.b32.xlu0 %v650_v28, %s3172_s26  ;;  %1580 = vrot.lane.b32.xlu2 %v3544_v29, %s3173_s28  ;;  %v3631_v28 = vld [vmem:[#allocation2 + $0x78] sm:$0xff] }
 0x153   : > { %v1701_v43 = vpop.permute.xlu1 %1700  ;;  %4984 = vst [vmem:[#allocation13_spill] sm:$0xff] %v3631_v28  ;;  %v3658_v58 = vld [vmem:[#allocation2 + $0x99] sm:$0xff] }
 0x154   : > { %v3581_v60 = vpop.permute.xlu0 %1190  ;;  %v1829_v61 = vpop.permute.xlu2 %1828 }
 0x158   : > { %v585_v62 = vld [vmem:[#allocation2 + $0x130] sm:$0x1]  ;;  %v473_v3 = vpop.f32.mrf.mxu0 }
 0x159   : > { %603 = vst.msk [vmem:[#allocation2 + $0x131] sm:$0x1] %vm554_vm3, %v585_v62  ;;  %1836 = vrot.lane.b32.xlu1 %v682_v4, %s3174_s29  ;;  %v3674_v62 = vld [vmem:[#allocation2 + $0xaa] sm:$0xff] }
 0x15a   : > { %523 = vst.msk [vmem:[#allocation2 + $0x139] sm:$0xff] %vm498_vm2, %v473_v3  ;;  %1454 = vrot.lane.b32.xlu0 %v3512_v16, %s3171_s20  ;;  %1076 = vrot.lane.b32.xlu2 %v682_v4, %s3169_s18  ;;  %v3608_v16 = vld [vmem:[#allocation2 + $0x80] sm:$0xff]  ;;  %v3676_v3 = vld [vmem:[#allocation2 + $0x98] sm:$0xff] }
 0x15b   : > { %v3598_v7 = vpop.permute.xlu1 %1446 }
 0x15c   : > { %v1827_v11 = vpop.permute.xlu0 %1826  ;;  %v3602_v14 = vpop.permute.xlu2 %1118 }
 0x15d   : > { %4982 = vst [vmem:[#allocation11_spill] sm:$0xff] %v3602_v14  ;;  %v2153_v56 = vsel %vm2152_vm10, %v2120_v13, %v1827_v11  ;;  %v1990_v11 = vsel %vm1987_vm5, %v1957_v27, %v3581_v60  ;;  %v3710_v60 = vld [vmem:[#allocation2 + $0xa9] sm:$0xff] }
 0x15e   : > { %2932 = vmatmul.msk.f32.vlgmr.msra.gmra.mxu1 %vm2194_vm11, %v2153_v56  ;;  %v2023_v56 = vsel %vm2020_vm6, %v1990_v11, %v3528_v20  ;;  %v3741_v27 = vld [vmem:[#allocation2 + $0xc2] sm:$0xff]  ;;  %v3743_v11 = vld [vmem:[#allocation2 + $0xb2] sm:$0xff] }
 0x15f   : > { %v2056_v51 = vsel %vm2053_vm7, %v2023_v56, %v3598_v7 }
 0x161   : > { %v549_v17 = vld [vmem:[#allocation2 + $0x139] sm:$0x1]  ;;  %1204 = vrot.lane.b32.xlu1 %v3608_v16, %s3170_s19 }
 0x162   : > { %568 = vst.msk [vmem:[#allocation2 + $0x138] sm:$0x1] %vm554_vm3, %v549_v17  ;;  %1078 = vrot.lane.b32.xlu0 %v3614_v18, %s3169_s18  ;;  %1710 = vrot.lane.b32.xlu2 %v3568_v46, %s3172_s26 }
 0x163   : > { %v3621_v37 = vpop.permute.xlu1 %1116 }
 0x164   : > { %4983 = vst [vmem:[#allocation12_spill] sm:$0xff] %v3621_v37  ;;  %v1573_v8 = vpop.permute.xlu0 %1572  ;;  %v3626_v23 = vpop.permute.xlu2 %1070 }
 0x165   : > { %v2088_v21 = vsel %vm2086_vm8, %v2055_v0, %v1573_v8  ;;  %v3721_v8 = vld [vmem:[#allocation2 + $0xc1] sm:$0xff] }
 0x166   : > { %v2121_v24 = vsel %vm2119_vm9, %v2088_v21, %v1701_v43  ;;  %v3666_v43 = vld [vmem:[#allocation2 + $0x92] sm:$0xff] }
 0x167   : > { %v2154_v26 = vsel %vm2152_vm10, %v2121_v24, %v1829_v61  ;;  %v3723_v21 = vld [vmem:[#allocation2 + $0xb1] sm:$0xff] }
 0x168   : > { %2933 = vmatmul.msk.f32.gmra.mxu1 %vm2194_vm11, %v2154_v26  ;;  %v3727_v24 = vld [vmem:[#allocation2 + $0xb0] sm:$0xff] }
 0x169   : > { %1582 = vrot.lane.b32.xlu1 %v3631_v28, %s3173_s28  ;;  %4987 = vst [vmem:[#allocation16_spill] sm:$0xff] %v3727_v24 }
 0x16a   : > { %1202 = vrot.lane.b32.xlu0 %v3631_v28, %s3170_s19  ;;  %1456 = vrot.lane.b32.xlu2 %v682_v4, %s3171_s20  ;;  %v3682_v4 = vld [vmem:[#allocation2 + $0x90] sm:$0xff]  ;;  %v3782_v28 = vld [vmem:[#allocation2 + $0xd9] sm:$0xff] }
 0x16b   : > { %v3638_v12 = vpop.permute.xlu1 %1068 }
 0x16c   : > { %v3640_v34 = vpop.permute.xlu0 %990  ;;  %v3642_v35 = vpop.permute.xlu2 %1194 }
 0x16d   : > { %4985 = vst [vmem:[#allocation14_spill] sm:$0xff] %v3640_v34 }
 0x171   : > { %1080 = vrot.lane.b32.xlu1 %v3644_v36, %s3169_s18 }
 0x172   : > { %1838 = vrot.lane.b32.xlu0 %v3614_v18, %s3174_s29  ;;  %952 = vrot.lane.b32.xlu2 %v3650_v39, %s3168_s17 }
 0x173   : > { %v3654_v45 = vpop.permute.xlu1 %1322 }
 0x174   : > { %v3656_v53 = vpop.permute.xlu0 %942  ;;  %v1575_v54 = vpop.permute.xlu2 %1574 }
 0x175   : > { %v2089_v55 = vsel %vm2086_vm8, %v2056_v51, %v1575_v54 }
 0x179   : > { %956 = vrot.lane.b32.xlu1 %v3658_v58, %s3168_s17 }
 0x17a   : > { %954 = vrot.lane.b32.xlu0 %v3660_v59, %s3168_s17  ;;  %1082 = vrot.lane.b32.xlu2 %v3666_v43, %s3169_s18 }
 0x17b   : > { %v3670_v32 = vpop.permute.xlu1 %992 }
 0x17c   : > { %4986 = vst [vmem:[#allocation15_spill] sm:$0xff] %v3670_v32  ;;  %v1703_v61 = vpop.permute.xlu0 %1702  ;;  %v3672_v1 = vpop.permute.xlu2 %1704 }
 0x17d   : > { %v2122_v9 = vsel %vm2119_vm9, %v2089_v55, %v1703_v61 }
 0x181   : > { %1086 = vrot.lane.b32.xlu1 %v3674_v62, %s3169_s18 }
 0x182   : > { %1208 = vrot.lane.b32.xlu0 %v3676_v3, %s3170_s19  ;;  %1206 = vrot.lane.b32.xlu2 %v3682_v4, %s3170_s19 }
 0x183   : > { %v3689_v6 = vpop.permute.xlu1 %944 }
 0x184   : > { %v1449_v63 = vpop.permute.xlu0 %1448  ;;  %v3695_v13 = vpop.permute.xlu2 %1450 }
 0x189   : > { %1210 = vrot.lane.b32.xlu1 %v3699_v15, %s3170_s19 }
 0x18a   : > { %1084 = vrot.lane.b32.xlu0 %v3703_v42, %s3169_s18  ;;  %958 = vrot.lane.b32.xlu2 %v3710_v60, %s3168_s17 }
 0x18b   : > { %v1831_v20 = vpop.permute.xlu1 %1830 }
 0x18c   : > { %v3715_v17 = vpop.permute.xlu0 %1196  ;;  %v2155_v7 = vsel %vm2152_vm10, %v2122_v9, %v1831_v20  ;;  %v3718_v0 = vpop.permute.xlu2 %946  ;;  %v3753_v9 = vld [vmem:[#allocation2 + $0xca] sm:$0xff]  ;;  %v3755_v20 = vld [vmem:[#allocation2 + $0xc0] sm:$0xff] }
 0x18d   : > { %2934 = vmatmul.msk.f32.gmra.mxu1 %vm2194_vm11, %v2155_v7  ;;  %v3761_v7 = vld [vmem:[#allocation2 + $0xc9] sm:$0xff] }
 0x191   : > { %962 = vrot.lane.b32.xlu1 %v3721_v8, %s3168_s17 }
 0x192   : > { %960 = vrot.lane.b32.xlu0 %v3723_v21, %s3168_s17  ;;  %1212 = vrot.lane.b32.xlu2 %v3727_v24, %s3170_s19 }
 0x193   : > { %v1577_v26 = vpop.permute.xlu1 %1576 }
 0x194   : > { %v3733_v54 = vpop.permute.xlu0 %1324  ;;  %v3735_v61 = vpop.permute.xlu2 %1326 }
 0x199   : > { %1216 = vrot.lane.b32.xlu1 %v3737_v5, %s3170_s19 }
 0x19a   : > { %1090 = vrot.lane.b32.xlu0 %v3741_v27, %s3169_s18  ;;  %1088 = vrot.lane.b32.xlu2 %v3743_v11, %s3169_s18 }
 0x19b   : > { %v1707_v56 = vpop.permute.xlu1 %1706 }
 0x19c   : > { %v3749_v51 = vpop.permute.xlu0 %1120  ;;  %v3751_v55 = vpop.permute.xlu2 %1200 }
 0x19d   : > { %4988 = vst [vmem:[#allocation17_spill] sm:$0xff] %v3749_v51  ;;  %v1925_v51 = vsel %vm498_vm2, %v3342_v47, %v3457_v49  ;;  %v3788_v47 = vld [vmem:[#allocation2 + $0xda] sm:$0xff] }
 0x19e   : > { %v1958_v34 = vsel %vm1954_vm4, %v1925_v51, %v3473_v57  ;;  %v3819_v51 = vld [vmem:[#allocation2 + $0xf0] sm:$0xff] }
 0x19f   : > { %v1991_v22 = vsel %vm1987_vm5, %v1958_v34, %v3549_v30  ;;  %v3806_v34 = vld [vmem:[#allocation2 + $0xd8] sm:$0xff]  ;;  %4991 = vst [vmem:[#allocation20_spill] sm:$0xff] %v3819_v51 }
 0x1a0   : > { %v2024_v31 = vsel %vm2020_vm6, %v1991_v22, %v3564_v40  ;;  %v3800_v40 = vld [vmem:[#allocation2 + $0xe0] sm:$0xff] }
 0x1a1   : > { %1092 = vrot.lane.b32.xlu1 %v3753_v9, %s3169_s18  ;;  %v2057_v19 = vsel %vm2053_vm7, %v2024_v31, %v1449_v63  ;;  %v3798_v31 = vld [vmem:[#allocation2 + $0xf2] sm:$0xff] }
 0x1a2   : > { %1214 = vrot.lane.b32.xlu0 %v3755_v20, %s3170_s19  ;;  %964 = vrot.lane.b32.xlu2 %v3761_v7, %s3168_s17  ;;  %v2090_v50 = vsel %vm2086_vm8, %v2057_v19, %v1577_v26  ;;  %4989 = vst [vmem:[#allocation18_spill] sm:$0xff] %v3798_v31  ;;  %v1926_v26 = vsel %vm498_vm2, %v3385_v10, %v3461_v52 }
 0x1a3   : > { %v3765_v32 = vpop.permute.xlu1 %1452  ;;  %v2123_v22 = vsel %vm2119_vm9, %v2090_v50, %v3672_v1 }
 0x1a4   : > { %v3770_v14 = vpop.permute.xlu0 %1072  ;;  %v1835_v37 = vpop.permute.xlu2 %1834 }
 0x1a9   : > { %968 = vrot.lane.b32.xlu1 %v3779_v44, %s3168_s17 }
 0x1aa   : > { %966 = vrot.lane.b32.xlu0 %v3782_v28, %s3168_s17  ;;  %1094 = vrot.lane.b32.xlu2 %v3788_v47, %s3169_s18 }
 0x1ab   : > { %v3792_v49 = vpop.permute.xlu1 %1074 }
 0x1ac   : > { %v1833_v57 = vpop.permute.xlu0 %1832  ;;  %v1581_v19 = vpop.permute.xlu2 %1580 }
 0x1ad   : > { %v2156_v30 = vsel %vm2152_vm10, %v2123_v22, %v1833_v57  ;;  %v1959_v57 = vsel %vm1954_vm4, %v1926_v26, %v3562_v38  ;;  %v3823_v22 = vld [vmem:[#allocation2 + $0xe2] sm:$0xff] }
 0x1ae   : > { %2935 = vmatmul.msk.f32.gmra.mxu1 %vm2194_vm11, %v2156_v30  ;;  %v1992_v30 = vsel %vm1987_vm5, %v1959_v57, %v3642_v35  ;;  %v2404_v38 = vld [vmem:[%s4958_s3] sm:$0xff] }
 0x1af   : > { %v2025_v10 = vsel %vm2020_vm6, %v1992_v30, %v3654_v45  ;;  %2516 = vmatpush.msra.mxu2 %v2404_v38  ;;  %3013 = vmatpush.msra.mxu3 %v2404_v38  ;;  %v3848_v30 = vld [vmem:[#allocation2 + $0x109] sm:$0xff] }
 0x1b0   : > { %v2058_v35 = vsel %vm2053_vm7, %v2025_v10, %v3695_v13  ;;  %4993 = vst [vmem:[#allocation22_spill] sm:$0xff] %v3848_v30  ;;  %v3856_v13 = vld [vmem:[#allocation2 + $0xf8] sm:$0xff] }
 0x1b1   : > { %1098 = vrot.lane.b32.xlu1 %v3798_v31, %s3169_s18  ;;  %v3831_v31 = vld [vmem:[#allocation2 + $0xf1] sm:$0xff] }
 0x1b2   : > { %1220 = vrot.lane.b32.xlu0 %v3800_v40, %s3170_s19  ;;  %1218 = vrot.lane.b32.xlu2 %v3806_v34, %s3170_s19  ;;  %4992 = vst [vmem:[#allocation21_spill] sm:$0xff] %v3831_v31 }
 0x1b3   : > { %v3810_v50 = vpop.permute.xlu1 %1198 }
 0x1b4   : > { %v3812_v1 = vpop.permute.xlu0 %948  ;;  %v3814_v63 = vpop.permute.xlu2 %1076 }
 0x1b5   : > { %4990 = vst [vmem:[#allocation19_spill] sm:$0xff] %v3814_v63 }
 0x1b9   : > { %1222 = vrot.lane.b32.xlu1 %v3819_v51, %s3170_s19  ;;  %v3852_v51 = vld [vmem:[#allocation2 + $0xf9] sm:$0xff] }
 0x1ba   : > { %1096 = vrot.lane.b32.xlu0 %v3823_v22, %s3169_s18  ;;  %970 = vrot.lane.b32.xlu2 %v3831_v31, %s3168_s17 }
 0x1bb   : > { %v3837_v52 = vpop.permute.xlu1 %1328 }
 0x1bc   : > { %v1579_v26 = vpop.permute.xlu0 %1578  ;;  %v3845_v63 = vpop.permute.xlu2 %1710 }
 0x1bd   : > { %v2091_v57 = vsel %vm2086_vm8, %v2058_v35, %v1579_v26 }
 0x1be   : > { %v2124_v45 = vsel %vm2119_vm9, %v2091_v57, %v1707_v56  ;;  %v3875_v57 = vld [vmem:[#allocation2 + $0x110] sm:$0xff] }
 0x1bf   : > { %v2157_v31 = vsel %vm2152_vm10, %v2124_v45, %v1835_v37  ;;  %v1927_v37 = vsel %vm498_vm2, %v3373_v2, %v3553_v33  ;;  %v3881_v2 = vld [vmem:[#allocation2 + $0x10a] sm:$0xff] }
 0x1c0   : > { %2936 = vmatmul.msk.f32.gmra.mxu1 %vm2194_vm11, %v2157_v31  ;;  %v1960_v38 = vsel %vm1954_vm4, %v1927_v37, %v3638_v12  ;;  %4994 = vst [vmem:[#allocation23_spill] sm:$0xff] %v3881_v2 }
 0x1c1   : > { %974 = vrot.lane.b32.xlu1 %v3848_v30, %s3168_s17  ;;  %v1993_v35 = vsel %vm1987_vm5, %v1960_v38, %v3715_v17  ;;  %v3884_v30 = vld [vmem:[#allocation2 + $0xfa] sm:$0xff]  ;;  %v3895_v38 = vld [vmem:[#allocation2 + $0x112] sm:$0xff] }
 0x1c2   : > { %972 = vrot.lane.b32.xlu0 %v3852_v51, %s3168_s17  ;;  %1224 = vrot.lane.b32.xlu2 %v3856_v13, %s3170_s19  ;;  %v2026_v26 = vsel %vm2020_vm6, %v1993_v35, %v3733_v54  ;;  %4995 = vst [vmem:[#allocation24_spill] sm:$0xff] %v3884_v30 }
 0x1c3   : > { %v3862_v56 = vpop.permute.xlu1 %950  ;;  %v2059_v45 = vsel %vm2053_vm7, %v2026_v26, %v3765_v32  ;;  %4996 = vst [vmem:[#allocation25_spill] sm:$0xff] %v3895_v38 }
 0x1c4   : > { %v1709_v10 = vpop.permute.xlu0 %1708  ;;  %v3867_v31 = vpop.permute.xlu2 %1456  ;;  %v2092_v33 = vsel %vm2086_vm8, %v2059_v45, %v1581_v19  ;;  %v3897_v19 = vld [vmem:[#allocation2 + $0x108] sm:$0xff] }
 0x1c5   : > { %v2125_v12 = vsel %vm2119_vm9, %v2092_v33, %v1709_v10  ;;  %v3903_v10 = vld [vmem:[#allocation2 + $0x111] sm:$0xff]  ;;  %v3913_v33 = vld [vmem:[#allocation2 + $0x129] sm:$0xff] }
 0x1c6   : > { %4997 = vst [vmem:[#allocation26_spill] sm:$0xff] %v3903_v10 }
 0x1c9   : > { %1228 = vrot.lane.b32.xlu1 %v3875_v57, %s3170_s19 }
 0x1ca   : > { %1102 = vrot.lane.b32.xlu0 %v3881_v2, %s3169_s18  ;;  %1100 = vrot.lane.b32.xlu2 %v3884_v30, %s3169_s18 }
 0x1cb   : > { %v1837_v17 = vpop.permute.xlu1 %1836 }
 0x1cc   : > { %v1455_v54 = vpop.permute.xlu0 %1454  ;;  %v2158_v32 = vsel %vm2152_vm10, %v2125_v12, %v1837_v17  ;;  %v3892_v37 = vpop.permute.xlu2 %952  ;;  %v1928_v12 = vsel %vm498_vm2, %v3438_v41, %v3656_v53  ;;  %v665_v17 = vld [vmem:[#allocation2 + $0x121] sm:$0xff] }
 0x1cd   : > { %2937 = vmatmul.msk.f32.gmra.mxu1 %vm2194_vm11, %v2158_v32  ;;  %v697_v32 = vld [vmem:[#allocation2 + $0x122] sm:$0xff] }
 0x1d1   : > { %1104 = vrot.lane.b32.xlu1 %v3895_v38, %s3169_s18  ;;  %v1961_v38 = vsel %vm1954_vm4, %v1928_v12, %v3626_v23  ;;  %v3935_v12 = vld [vmem:[#allocation2 + $0x128] sm:$0xff] }
 0x1d2   : > { %1226 = vrot.lane.b32.xlu0 %v3897_v19, %s3170_s19  ;;  %976 = vrot.lane.b32.xlu2 %v3903_v10, %s3168_s17 }
 0x1d3   : > { %v3907_v35 = vpop.permute.xlu1 %1204 }
 0x1d4   : > { %v3909_v26 = vpop.permute.xlu0 %1078  ;;  %v3911_v45 = vpop.permute.xlu2 %1082 }
 0x1d5   : > { %4998 = vst [vmem:[#allocation27_spill] sm:$0xff] %v3911_v45  ;;  %v1994_v45 = vsel %vm1987_vm5, %v1961_v38, %v3810_v50  ;;  %v3941_v50 = vld [vmem:[#allocation2 + $0x120] sm:$0xff] }
 0x1d9   : > { %980 = vrot.lane.b32.xlu1 %v3913_v33, %s3168_s17 }
 0x1da   : > { %978 = vrot.lane.b32.xlu0 %v665_v17, %s3168_s17  ;;  %1106 = vrot.lane.b32.xlu2 %v697_v32, %s3169_s18  ;;  %v2027_v17 = vsel %vm2020_vm6, %v1994_v45, %v3735_v61  ;;  %v3954_v45 = vld [vmem:[#allocation2 + $0x13a] sm:$0xff] }
 0x1db   : > { %v2308_v10 = vpop.f32.mrf.mxu1  ;;  %v1583_v2 = vpop.permute.xlu1 %1582  ;;  %v2060_v30 = vsel %vm2053_vm7, %v2027_v17, %v1455_v54  ;;  %v3956_v32 = vld [vmem:[#allocation2 + $0x139] sm:$0xff]  ;;  %v3958_v17 = vld [vmem:[#allocation2 + $0x12a] sm:$0xff] }
 0x1dc   : > { %2964 = vmatmul.msk.f32.vlgmr.msra.gmra.mxu2 %vm498_vm2, %v2308_v10  ;;  %v3927_v41 = vpop.permute.xlu0 %1202  ;;  %v3929_v53 = vpop.permute.xlu2 %1206  ;;  %v2093_v23 = vsel %vm2086_vm8, %v2060_v30, %v1583_v2 }
 0x1dd   : > { %v2126_v54 = vsel %vm2119_vm9, %v2093_v23, %v3845_v63 }
 0x1e1   : > { %1712 = vrot.lane.b32.xlu1 %v3650_v39, %s3172_s26 }
 0x1e2   : > { %1232 = vrot.lane.b32.xlu0 %v3935_v12, %s3170_s19  ;;  %1230 = vrot.lane.b32.xlu2 %v3941_v50, %s3170_s19 }
 0x1e3   : > { %v3945_v38 = vpop.permute.xlu1 %1080 }
 0x1e4   : > { %v1839_v61 = vpop.permute.xlu0 %1838  ;;  %v3949_v30 = vpop.permute.xlu2 %958 }
 0x1e5   : > { %4999 = vst [vmem:[#allocation28_spill] sm:$0xff] %v3949_v30  ;;  %v2311_v2 = vpop.f32.mrf.mxu1  ;;  %v2159_v10 = vsel %vm2152_vm10, %v2126_v54, %v1839_v61  ;;  %v3972_v54 = vld [vmem:[#allocation2 + $0x138] sm:$0xff] }
 0x1e6   : > { %2938 = vmatmul.msk.f32.gmra.mxu1 %vm2194_vm11, %v2159_v10  ;;  %2965 = vmatmul.msk.f32.gmra.mxu2 %vm498_vm2, %v2311_v2 }
 0x1e9   : > { %1110 = vrot.lane.b32.xlu1 %v3954_v45, %s3169_s18 }
 0x1ea   : > { %1108 = vrot.lane.b32.xlu0 %v3958_v17, %s3169_s18  ;;  %982 = vrot.lane.b32.xlu2 %v3956_v32, %s3168_s17 }
 0x1eb   : > { %v3966_v63 = vpop.permute.xlu1 %956 }
 0x1ec   : > { %5000 = vst [vmem:[#allocation29_spill] sm:$0xff] %v3966_v63  ;;  %v3968_v23 = vpop.permute.xlu0 %954  ;;  %v3970_v61 = vpop.permute.xlu2 %1212 }
 0x1ed   : > { %5001 = vst [vmem:[#allocation30_spill] sm:$0xff] %v3968_v23 }
 0x1ee   : > { %5002 = vst [vmem:[#allocation31_spill] sm:$0xff] %v3970_v61 }
 0x1f1   : > { %1234 = vrot.lane.b32.xlu1 %v3972_v54, %s3170_s19 }
 0x1f2   : > { %1584 = vrot.lane.b32.xlu0 %v3608_v16, %s3173_s28  ;;  %1840 = vrot.lane.b32.xlu2 %v3644_v36, %s3174_s29 }
 0x1f3   : > { %v3980_v2 = vpop.permute.xlu1 %1086 }
 0x1f4   : > { %5003 = vst [vmem:[#allocation32_spill] sm:$0xff] %v3980_v2  ;;  %v3982_v10 = vpop.permute.xlu0 %1208  ;;  %v3984_v30 = vpop.permute.xlu2 %1088 }
 0x1f5   : > { %5004 = vst [vmem:[#allocation33_spill] sm:$0xff] %v3984_v30 }
 0x1f9   : > { %1458 = vrot.lane.b32.xlu1 %v3614_v18, %s3171_s20 }
 0x1fa   : > { %1330 = vrot.lane.b32.xlu0 %v3568_v46, %s3167_s16  ;;  %1586 = vrot.lane.b32.xlu2 %v3682_v4, %s3173_s28 }
 0x1fb   : > { %v3992_v61 = vpop.permute.xlu1 %1210 }
 0x1fc   : > { %v3994_v63 = vpop.permute.xlu0 %1084  ;;  %v3996_v23 = vpop.permute.xlu2 %964 }
 0x1fd   : > { %5005 = vst [vmem:[#allocation34_spill] sm:$0xff] %v3996_v23 }
 0x201   : > { %1842 = vrot.lane.b32.xlu1 %v3666_v43, %s3174_s29 }
 0x202   : > { %1714 = vrot.lane.b32.xlu0 %v3660_v59, %s3172_s26  ;;  %1332 = vrot.lane.b32.xlu2 %v3650_v39, %s3167_s16 }
 0x203   : > { %v4004_v18 = vpop.permute.xlu1 %962 }
 0x204   : > { %5006 = vst [vmem:[#allocation35_spill] sm:$0xff] %v4004_v18  ;;  %v4006_v46 = vpop.permute.xlu0 %960  ;;  %v4008_v30 = vpop.permute.xlu2 %1094 }
 0x205   : > { %5007 = vst [vmem:[#allocation36_spill] sm:$0xff] %v4008_v30 }
 0x209   : > { %1588 = vrot.lane.b32.xlu1 %v3676_v3, %s3173_s28 }
 0x20a   : > { %1460 = vrot.lane.b32.xlu0 %v3644_v36, %s3171_s20  ;;  %v2314_v23 = vpop.f32.mrf.mxu1  ;;  %1716 = vrot.lane.b32.xlu2 %v3658_v58, %s3172_s26 }
 0x20b   : > { %2966 = vmatmul.msk.f32.gmra.mxu2 %vm498_vm2, %v2314_v23  ;;  %v4017_v2 = vpop.permute.xlu1 %1216 }
 0x20c   : > { %5008 = vst [vmem:[#allocation37_spill] sm:$0xff] %v4017_v2  ;;  %v4019_v39 = vpop.permute.xlu0 %1090  ;;  %v4021_v18 = vpop.permute.xlu2 %1218 }
 0x20d   : > { %5009 = vst [vmem:[#allocation38_spill] sm:$0xff] %v4019_v39 }
 0x20e   : > { %5010 = vst [vmem:[#allocation39_spill] sm:$0xff] %v4021_v18 }
 0x211   : > { %1334 = vrot.lane.b32.xlu1 %v3660_v59, %s3167_s16 }
 0x212   : > { %1844 = vrot.lane.b32.xlu0 %v3703_v42, %s3174_s29  ;;  %1462 = vrot.lane.b32.xlu2 %v3666_v43, %s3171_s20 }
 0x213   : > { %v4029_v36 = vpop.permute.xlu1 %1092 }
 0x214   : > { %5011 = vst [vmem:[#allocation40_spill] sm:$0xff] %v4029_v36  ;;  %v4031_v30 = vpop.permute.xlu0 %1214  ;;  %v4033_v23 = vpop.permute.xlu2 %970 }
 0x215   : > { %5012 = vst [vmem:[#allocation41_spill] sm:$0xff] %v4033_v23 }
 0x219   : > { %1718 = vrot.lane.b32.xlu1 %v3710_v60, %s3172_s26 }
 0x21a   : > { %1590 = vrot.lane.b32.xlu0 %v3699_v15, %s3173_s28  ;;  %1846 = vrot.lane.b32.xlu2 %v3674_v62, %s3174_s29 }
 0x21b   : > { %v4041_v59 = vpop.permute.xlu1 %968 }
 0x21c   : > { %5013 = vst [vmem:[#allocation42_spill] sm:$0xff] %v4041_v59  ;;  %v4043_v18 = vpop.permute.xlu0 %966  ;;  %v4045_v43 = vpop.permute.xlu2 %1224 }
 0x21d   : > { %5014 = vst [vmem:[#allocation43_spill] sm:$0xff] %v4043_v18 }
 0x21e   : > { %5015 = vst [vmem:[#allocation44_spill] sm:$0xff] %v4045_v43 }
 0x221   : > { %1464 = vrot.lane.b32.xlu1 %v3703_v42, %s3171_s20 }
 0x222   : > { %1336 = vrot.lane.b32.xlu0 %v3658_v58, %s3167_s16  ;;  %1592 = vrot.lane.b32.xlu2 %v3727_v24, %s3173_s28 }
 0x223   : > { %v4053_v23 = vpop.permute.xlu1 %1098 }
 0x224   : > { %5016 = vst [vmem:[#allocation45_spill] sm:$0xff] %v4053_v23  ;;  %v4055_v36 = vpop.permute.xlu0 %1220  ;;  %v1101_v39 = vpop.permute.xlu2 %1100 }
 0x225   : > { %5017 = vst [vmem:[#allocation46_spill] sm:$0xff] %v4055_v36 }
 0x229   : > { %1848 = vrot.lane.b32.xlu1 %v3743_v11, %s3174_s29 }
 0x22a   : > { %1720 = vrot.lane.b32.xlu0 %v3723_v21, %s3172_s26  ;;  %1338 = vrot.lane.b32.xlu2 %v3710_v60, %s3167_s16 }
 0x22b   : > { %v2317_v42 = vpop.f32.mrf.mxu1  ;;  %v4063_v43 = vpop.permute.xlu1 %1222 }
 0x22c   : > { %5018 = vst [vmem:[#allocation47_spill] sm:$0xff] %v4063_v43  ;;  %2967 = vmatmul.msk.f32.gmra.mxu2 %vm498_vm2, %v2317_v42  ;;  %v4066_v58 = vpop.permute.xlu0 %1096  ;;  %v977_v23 = vpop.permute.xlu2 %976 }
 0x22d   : > { %5019 = vst [vmem:[#allocation48_spill] sm:$0xff] %v4066_v58 }
 0x231   : > { %1594 = vrot.lane.b32.xlu1 %v3755_v20, %s3173_s28 }
 0x232   : > { %1466 = vrot.lane.b32.xlu0 %v3674_v62, %s3171_s20  ;;  %1722 = vrot.lane.b32.xlu2 %v3721_v8, %s3172_s26 }
 0x233   : > { %v975_v59 = vpop.permute.xlu1 %974 }
 0x234   : > { %v973_v18 = vpop.permute.xlu0 %972  ;;  %v1107_v60 = vpop.permute.xlu2 %1106  ;;  %v1944_v42 = vsel %vm498_vm2, %v3897_v19, %v975_v59 }
 0x235   : > { %v1943_v43 = vsel %vm498_vm2, %v3856_v13, %v973_v18 }
 0x236   : > { %v1976_v62 = vsel %vm1954_vm4, %v1943_v43, %v1101_v39  ;;  %v1945_v39 = vsel %vm498_vm2, %v3875_v57, %v977_v23 }
 0x239   : > { %1340 = vrot.lane.b32.xlu1 %v3723_v21, %s3167_s16 }
 0x23a   : > { %1850 = vrot.lane.b32.xlu0 %v3741_v27, %s3174_s29  ;;  %1468 = vrot.lane.b32.xlu2 %v3743_v11, %s3171_s20  ;;  %v280_v11 = vld [vmem:[%s3267_s15 + $0xf0] sm:$0xff] }
 0x23b   : > { %v1229_v20 = vpop.permute.xlu1 %1228  ;;  %2930 = vmatmul.msk.f32.gmra.mxu3 %vm283_vm1, %v280_v11 }
 0x23c   : > { %v4086_v58 = vsel %vm1987_vm5, %v1976_v62, %v1229_v20  ;;  %v1103_v36 = vpop.permute.xlu0 %1102  ;;  %v1231_v2 = vpop.permute.xlu2 %1230 }
 0x23d   : > { %v1977_v18 = vsel %vm1954_vm4, %v1944_v42, %v1103_v36  ;;  %v2320_v21 = vpop.f32.mrf.mxu1 }
 0x23e   : > { %v4090_v24 = vsel %vm1987_vm5, %v1977_v18, %v1231_v2  ;;  %2968 = vmatmul.msk.f32.gmra.mxu2 %vm498_vm2, %v2320_v21  ;;  %v281_v21 = vld [vmem:[%s3267_s15 + $0xf8] sm:$0xff] }
 0x241   : > { %1724 = vrot.lane.b32.xlu1 %v3761_v7, %s3172_s26 }
 0x242   : > { %1596 = vrot.lane.b32.xlu0 %v3737_v5, %s3173_s28  ;;  %1852 = vrot.lane.b32.xlu2 %v3753_v9, %s3174_s29 }
 0x243   : > { %v1105_v2 = vpop.permute.xlu1 %1104  ;;  %2931 = vmatmul.msk.f32.gmra.mxu3 %vm283_vm1, %v281_v21 }
 0x244   : > { %v4103_v36 = vpop.permute.xlu0 %1226  ;;  %v1978_v59 = vsel %vm1954_vm4, %v1945_v39, %v1105_v2  ;;  %v983_v43 = vpop.permute.xlu2 %982 }
 0x249   : > { %1470 = vrot.lane.b32.xlu1 %v3741_v27, %s3171_s20 }
 0x24a   : > { %1342 = vrot.lane.b32.xlu0 %v3721_v8, %s3167_s16  ;;  %v2323_v5 = vpop.f32.mrf.mxu1  ;;  %1598 = vrot.lane.b32.xlu2 %v3806_v34, %s3173_s28 }
 0x24b   : > { %2969 = vmatmul.msk.f32.gmra.mxu2 %vm498_vm2, %v2323_v5  ;;  %v981_v23 = vpop.permute.xlu1 %980 }
 0x24c   : > { %v979_v62 = vpop.permute.xlu0 %978  ;;  %v1841_v42 = vpop.permute.xlu2 %1840  ;;  %v1947_v39 = vsel %vm498_vm2, %v3935_v12, %v981_v23  ;;  %v4158_v12 = vld [vmem:[%s4960_s5] ss:$0 sm:$0xff] }
 0x24d   : > { %v1946_v20 = vsel %vm498_vm2, %v3941_v50, %v979_v62 }
 0x24e   : > { %v1979_v18 = vsel %vm1954_vm4, %v1946_v20, %v1107_v60  ;;  %v1948_v60 = vsel %vm498_vm2, %v3972_v54, %v983_v43 }
 0x251   : > { %1854 = vrot.lane.b32.xlu1 %v3788_v47, %s3174_s29 }
 0x252   : > { %1726 = vrot.lane.b32.xlu0 %v3782_v28, %s3172_s26  ;;  %1344 = vrot.lane.b32.xlu2 %v3761_v7, %s3167_s16 }
 0x253   : > { %v1713_v8 = vpop.permute.xlu1 %1712 }
 0x254   : > { %v1233_v27 = vpop.permute.xlu0 %1232  ;;  %v4127_v11 = vpop.permute.xlu2 %1586 }
 0x255   : > { %v4125_v34 = vsel %vm1987_vm5, %v1978_v59, %v1233_v27 }
 0x259   : > { %1360 = vrot.lane.b32.xlu1 %v3913_v33, %s3167_s16 }
 0x25a   : > { %1472 = vrot.lane.b32.xlu0 %v3753_v9, %s3171_s20  ;;  %1600 = vrot.lane.b32.xlu2 %v3800_v40, %s3173_s28  ;;  %v4145_v9 = vld [vmem:[%s4959_s4] ss:$0 sm:$0xff]  ;;  %v1929_v40 = vsel %vm498_vm2, %v3449_v48, %v3689_v6 }
 0x25b   : > { %v1111_v7 = vpop.permute.xlu1 %1110  ;;  %v1962_v43 = vsel %vm1954_vm4, %v1929_v40, %v3770_v14  ;;  %v4173_v6 = vld [vmem:[#allocation2 + $0x140] sm:$0xff] }
 0x25c   : > { %v1109_v2 = vpop.permute.xlu0 %1108  ;;  %v4140_v59 = vsel %vm1954_vm4, %v1948_v60, %v1111_v7  ;;  %v4150_v54 = vpop.permute.xlu2 %1332  ;;  %v1995_v62 = vsel %vm1987_vm5, %v1962_v43, %v3751_v55  ;;  %v3064_v14 = vld [vmem:[%s3267_s15] sm:$0xff] }
 0x25d   : > { %v4148_v33 = vsel %vm1954_vm4, %v1947_v39, %v1109_v2  ;;  %v2718_v20 = vsel %vm283_vm1, %v3064_v14, 0.0  ;;  %v2028_v21 = vsel %vm2020_vm6, %v1995_v62, %v3837_v52 }
 0x25e   : > { %v2061_v60 = vsel %vm2053_vm7, %v2028_v21, %v3867_v31  ;;  %v4195_v31 = vld [vmem:[#allocation2 + $0x141] sm:$0xff] }
 0x25f   : > { %v2518_v5 = vpop.f32.mrf.mxu2  ;;  %v3065_v21 = vld [vmem:[%s3267_s15 + $0x8] sm:$0xff] }
 0x260   : > { %v2618_v23 = vmul.f32 %v4145_v9, %v2518_v5 }
 0x261   : > { %1728 = vrot.lane.b32.xlu1 %v3779_v44, %s3172_s26 }
 0x262   : > { %v2654_v48 = vadd.f32 %v4158_v12, %v2618_v23  ;;  %1488 = vrot.lane.b32.xlu0 %v3958_v17, %s3171_s20  ;;  %1616 = vrot.lane.b32.xlu2 %v4173_v6, %s3173_s28 }
 0x263   : > { %v2326_v27 = vpop.f32.mrf.mxu1  ;;  %v1235_v55 = vpop.permute.xlu1 %1234 }
 0x264   : > { %v2686_v7 = vmax.f32 %v2654_v48, 0.0  ;;  %2970 = vmatmul.msk.f32.gmra.mxu2 %vm498_vm2, %v2326_v27  ;;  %v1585_v17 = vpop.permute.xlu0 %1584  ;;  %v4185_v39 = vsel %vm1987_vm5, %v1979_v18, %v1235_v55  ;;  %v1717_v40 = vpop.permute.xlu2 %1716  ;;  %v2719_v27 = vsel %vm283_vm1, %v3065_v21, 0.0  ;;  %v4254_v21 = vld [vmem:[#allocation2 + $0x151] sm:$0xff] }
 0x265   : > { %v2094_v2 = vsel %vm2086_vm8, %v2061_v60, %v1585_v17 }
 0x266   : > { %v2750_v43 = vadd.f32 %v2718_v20, %v2686_v7  ;;  %v2127_v52 = vsel %vm2119_vm9, %v2094_v2, %v1713_v8  ;;  %v1930_v8 = vsel %vm498_vm2, %v3538_v25, %v3718_v0 }
 0x267   : > { %v2160_v5 = vsel %vm2152_vm10, %v2127_v52, %v1841_v42  ;;  %v4202_v42 = vld [vmem:[#allocation2 + $0x142] sm:$0xff]  ;;  %v1963_v48 = vsel %vm1954_vm4, %v1930_v8, %v3792_v49 }
 0x268   : > { %2782 = vst.msk [vmem:[%s4190_s10] sm:$0xff] %vm2020_vm6, %v2750_v43  ;;  %2939 = vmatmul.msk.f32.gmra.mxu1 %vm2194_vm11, %v2160_v5  ;;  %v1996_v55 = vsel %vm1987_vm5, %v1963_v48, %v3927_v41 }
 0x269   : > { %v2521_v18 = vpop.f32.mrf.mxu2  ;;  %1744 = vrot.lane.b32.xlu1 %v4195_v31, %s3172_s26 }
 0x26a   : > { %v2619_v23 = vmul.f32 %v4145_v9, %v2521_v18  ;;  %1856 = vrot.lane.b32.xlu0 %v3823_v22, %s3174_s29  ;;  %1872 = vrot.lane.b32.xlu2 %v4202_v42, %s3174_s29  ;;  %v5022_v18 = vld [vmem:[#allocation21_spill] sm:$0xff] }
 0x26b   : > { %v1459_v62 = vpop.permute.xlu1 %1458 }
 0x26c   : > { %v2655_v14 = vadd.f32 %v4158_v12, %v2619_v23  ;;  %v1331_v20 = vpop.permute.xlu0 %1330  ;;  %v1463_v60 = vpop.permute.xlu2 %1462 }
 0x26d   : > { %v2029_v25 = vsel %vm2020_vm6, %v1996_v55, %v1331_v20  ;;  %v5023_v20 = vld [vmem:[#allocation18_spill] sm:$0xff] }
 0x26e   : > { %v2687_v7 = vmax.f32 %v2655_v14, 0.0  ;;  %v2062_v17 = vsel %vm2053_vm7, %v2029_v25, %v1459_v62  ;;  %v4248_v14 = vld [vmem:[#allocation2 + $0x150] sm:$0xff]  ;;  %v5024_v25 = vld [vmem:[#allocation13_spill] sm:$0xff] }
 0x26f   : > { %v2095_v2 = vsel %vm2086_vm8, %v2062_v17, %v4127_v11 }
 0x270   : > { %v2751_v0 = vadd.f32 %v2719_v27, %v2687_v7 }
 0x271   : > { %1474 = vrot.lane.b32.xlu1 %v3788_v47, %s3171_s20  ;;  %v1931_v47 = vsel %vm498_vm2, %v3544_v29, %v3812_v1 }
 0x272   : > { %2783 = vst.msk [vmem:[%s4190_s10 + $0x8] sm:$0xff] %vm2020_vm6, %v2751_v0  ;;  %1346 = vrot.lane.b32.xlu0 %v3782_v28, %s3167_s16  ;;  %1362 = vrot.lane.b32.xlu2 %v3956_v32, %s3167_s16  ;;  %v5020_v28 = vld [vmem:[#allocation20_spill] sm:$0xff]  ;;  %v5021_v32 = vld [vmem:[#allocation19_spill] sm:$0xff]  ;;  %v1932_v0 = vsel %vm498_vm2, %v5024_v25, %v3862_v56 }
 0x273   : > { %v1843_v49 = vpop.permute.xlu1 %1842  ;;  %v1964_v11 = vsel %vm1954_vm4, %v1931_v47, %v5021_v32  ;;  %v1965_v17 = vsel %vm1954_vm4, %v1932_v0, %v3909_v26  ;;  %v4318_v25 = vld [vmem:[#allocation2 + $0x159] sm:$0xff] }
 0x274   : > { %v1715_v41 = vpop.permute.xlu0 %1714  ;;  %v1847_v52 = vpop.permute.xlu2 %1846  ;;  %v1997_v8 = vsel %vm1987_vm5, %v1964_v11, %v3907_v35  ;;  %v3066_v11 = vld [vmem:[%s3267_s15 + $0x10] sm:$0xff]  ;;  %v5026_v0 = vld [vmem:[#allocation24_spill] sm:$0xff] }
 0x275   : > { %v2128_v43 = vsel %vm2119_vm9, %v2095_v2, %v1715_v41  ;;  %v2030_v29 = vsel %vm2020_vm6, %v1997_v8, %v4150_v54  ;;  %v4269_v2 = vld [vmem:[#allocation2 + $0x152] sm:$0xff] }
 0x276   : > { %v2161_v5 = vsel %vm2152_vm10, %v2128_v43, %v1843_v49  ;;  %v1998_v49 = vsel %vm1987_vm5, %v1965_v17, %v3929_v53  ;;  %v5027_v17 = vld [vmem:[#allocation27_spill] sm:$0xff] }
 0x277   : > { %2940 = vmatmul.msk.f32.gmra.mxu1 %vm2194_vm11, %v2161_v5 }
 0x279   : > { %1490 = vrot.lane.b32.xlu1 %v3954_v45, %s3171_s20 }
 0x27a   : > { %1602 = vrot.lane.b32.xlu0 %v5020_v28, %s3173_s28  ;;  %1730 = vrot.lane.b32.xlu2 %v5022_v18, %s3172_s26 }
 0x27b   : > { %v1589_v23 = vpop.permute.xlu1 %1588 }
 0x27c   : > { %v1461_v62 = vpop.permute.xlu0 %1460  ;;  %v1593_v1 = vpop.permute.xlu2 %1592 }
 0x27d   : > { %v2063_v45 = vsel %vm2053_vm7, %v2030_v29, %v1461_v62 }
 0x27e   : > { %v2096_v48 = vsel %vm2086_vm8, %v2063_v45, %v1589_v23  ;;  %v1933_v23 = vsel %vm498_vm2, %v3608_v16, %v3892_v37 }
 0x27f   : > { %v2129_v27 = vsel %vm2119_vm9, %v2096_v48, %v1717_v40  ;;  %v1966_v62 = vsel %vm1954_vm4, %v1933_v23, %v3945_v38 }
 0x281   : > { %1858 = vrot.lane.b32.xlu1 %v5023_v20, %s3174_s29 }
 0x282   : > { %1618 = vrot.lane.b32.xlu0 %v4248_v14, %s3173_s28  ;;  %1746 = vrot.lane.b32.xlu2 %v4254_v21, %s3172_s26 }
 0x283   : > { %v1335_v35 = vpop.permute.xlu1 %1334 }
 0x284   : > { %v1845_v54 = vpop.permute.xlu0 %1844  ;;  %v1339_v55 = vpop.permute.xlu2 %1338  ;;  %v2031_v41 = vsel %vm2020_vm6, %v1998_v49, %v1335_v35 }
 0x285   : > { %v2162_v7 = vsel %vm2152_vm10, %v2129_v27, %v1845_v54  ;;  %v2064_v26 = vsel %vm2053_vm7, %v2031_v41, %v1463_v60  ;;  %v2720_v60 = vsel %vm283_vm1, %v3066_v11, 0.0 }
 0x286   : > { %2941 = vmatmul.msk.f32.gmra.mxu1 %vm2194_vm11, %v2162_v7  ;;  %v5025_v7 = vld [vmem:[#allocation30_spill] sm:$0xff] }
 0x289   : > { %1348 = vrot.lane.b32.xlu1 %v3779_v44, %s3167_s16 }
 0x28a   : > { %1874 = vrot.lane.b32.xlu0 %v4269_v2, %s3174_s29  ;;  %1236 = vrot.lane.b32.xlu2 %v4173_v6, %s3170_s19 }
 0x28b   : > { %v1719_v56 = vpop.permute.xlu1 %1718 }
 0x28c   : > { %v1591_v40 = vpop.permute.xlu0 %1590  ;;  %v1723_v43 = vpop.permute.xlu2 %1722 }
 0x28d   : > { %v2097_v53 = vsel %vm2086_vm8, %v2064_v26, %v1591_v40 }
 0x28e   : > { %v2130_v5 = vsel %vm2119_vm9, %v2097_v53, %v1719_v56  ;;  %v2524_v47 = vpop.f32.mrf.mxu2 }
 0x28f   : > { %v2620_v28 = vmul.f32 %v4145_v9, %v2524_v47  ;;  %v2163_v44 = vsel %vm2152_vm10, %v2130_v5, %v1847_v52 }
 0x290   : > { %2942 = vmatmul.msk.f32.gmra.mxu1 %vm2194_vm11, %v2163_v44 }
 0x291   : > { %v2656_v32 = vadd.f32 %v4158_v12, %v2620_v28  ;;  %1364 = vrot.lane.b32.xlu1 %v4195_v31, %s3167_s16  ;;  %v1999_v31 = vsel %vm1987_vm5, %v1966_v62, %v3982_v10 }
 0x292   : > { %1476 = vrot.lane.b32.xlu0 %v3823_v22, %s3171_s20  ;;  %1604 = vrot.lane.b32.xlu2 %v3856_v13, %s3173_s28  ;;  %v4307_v13 = vld [vmem:[#allocation2 + $0x158] sm:$0xff] }
 0x293   : > { %v2688_v8 = vmax.f32 %v2656_v32, 0.0  ;;  %v1465_v52 = vpop.permute.xlu1 %1464 }
 0x294   : > { %v1337_v29 = vpop.permute.xlu0 %1336  ;;  %v1469_v48 = vpop.permute.xlu2 %1468 }
 0x295   : > { %v2752_v45 = vadd.f32 %v2720_v60, %v2688_v8  ;;  %v2032_v22 = vsel %vm2020_vm6, %v1999_v31, %v1337_v29 }
 0x296   : > { %v2065_v16 = vsel %vm2053_vm7, %v2032_v22, %v1465_v52 }
 0x297   : > { %2784 = vst.msk [vmem:[%s4190_s10 + $0x10] sm:$0xff] %vm2020_vm6, %v2752_v45  ;;  %v2098_v10 = vsel %vm2086_vm8, %v2065_v16, %v1593_v1  ;;  %v4324_v1 = vld [vmem:[#allocation2 + $0x15a] sm:$0xff] }
 0x299   : > { %1732 = vrot.lane.b32.xlu1 %v3852_v51, %s3172_s26 }
 0x29a   : > { %1492 = vrot.lane.b32.xlu0 %v4202_v42, %s3171_s20  ;;  %1620 = vrot.lane.b32.xlu2 %v4307_v13, %s3173_s28  ;;  %v1934_v42 = vsel %vm498_vm2, %v3682_v4, %v5025_v7 }
 0x29b   : > { %v1849_v37 = vpop.permute.xlu1 %1848  ;;  %v1967_v49 = vsel %vm1954_vm4, %v1934_v42, %v5027_v17 }
 0x29c   : > { %v1721_v38 = vpop.permute.xlu0 %1720  ;;  %v1853_v54 = vpop.permute.xlu2 %1852  ;;  %v2000_v4 = vsel %vm1987_vm5, %v1967_v49, %v3992_v61  ;;  %v5028_v61 = vld [vmem:[#allocation29_spill] sm:$0xff] }
 0x29d   : > { %v2131_v35 = vsel %vm2119_vm9, %v2098_v10, %v1721_v38  ;;  %v2033_v40 = vsel %vm2020_vm6, %v2000_v4, %v1339_v55  ;;  %v1935_v55 = vsel %vm498_vm2, %v3676_v3, %v5028_v61  ;;  %v5032_v10 = vld [vmem:[#allocation23_spill] sm:$0xff] }
 0x29e   : > { %v2164_v27 = vsel %vm2152_vm10, %v2131_v35, %v1849_v37  ;;  %v1968_v32 = vsel %vm1954_vm4, %v1935_v55, %v3994_v63  ;;  %v4373_v37 = vld [vmem:[#allocation2 + $0x168] sm:$0xff]  ;;  %v3068_v55 = vld [vmem:[%s3267_s15 + $0x20] sm:$0xff] }
 0x29f   : > { %2943 = vmatmul.msk.f32.gmra.mxu1 %vm2194_vm11, %v2164_v27 }
 0x2a1   : > { %1748 = vrot.lane.b32.xlu1 %v4318_v25, %s3172_s26 }
 0x2a2   : > { %1860 = vrot.lane.b32.xlu0 %v5026_v0, %s3174_s29  ;;  %1876 = vrot.lane.b32.xlu2 %v4324_v1, %s3174_s29 }
 0x2a3   : > { %v1595_v41 = vpop.permute.xlu1 %1594 }
 0x2a4   : > { %v1467_v56 = vpop.permute.xlu0 %1466  ;;  %v1599_v26 = vpop.permute.xlu2 %1598 }
 0x2a5   : > { %v2066_v53 = vsel %vm2053_vm7, %v2033_v40, %v1467_v56  ;;  %v4394_v56 = vld [vmem:[#allocation2 + $0x169] sm:$0xff] }
 0x2a6   : > { %v2099_v5 = vsel %vm2086_vm8, %v2066_v53, %v1595_v41  ;;  %v4391_v41 = vld [vmem:[#allocation2 + $0x16a] sm:$0xff] }
 0x2a7   : > { %v2132_v44 = vsel %vm2119_vm9, %v2099_v5, %v1723_v43  ;;  %v3067_v43 = vld [vmem:[%s3267_s15 + $0x18] sm:$0xff] }
 0x2a8   : > { %v2721_v8 = vsel %vm283_vm1, %v3067_v43, 0.0 }
 0x2a9   : > { %1238 = vrot.lane.b32.xlu1 %v4248_v14, %s3170_s19 }
 0x2aa   : > { %1350 = vrot.lane.b32.xlu0 %v5022_v18, %s3167_s16  ;;  %1478 = vrot.lane.b32.xlu2 %v5023_v20, %s3171_s20  ;;  %v5029_v20 = vld [vmem:[#allocation31_spill] sm:$0xff] }
 0x2ab   : > { %v1341_v47 = vpop.permute.xlu1 %1340  ;;  %v2001_v60 = vsel %vm1987_vm5, %v1968_v32, %v5029_v20 }
 0x2ac   : > { %v1851_v28 = vpop.permute.xlu0 %1850  ;;  %v4347_v11 = vpop.permute.xlu2 %1344  ;;  %v2034_v3 = vsel %vm2020_vm6, %v2001_v60, %v1341_v47 }
 0x2ad   : > { %v2165_v14 = vsel %vm2152_vm10, %v2132_v44, %v1851_v28  ;;  %v2067_v31 = vsel %vm2053_vm7, %v2034_v3, %v1469_v48  ;;  %v5031_v48 = vld [vmem:[#allocation28_spill] sm:$0xff]  ;;  %v2722_v28 = vsel %vm283_vm1, %v3068_v55, 0.0 }
 0x2ae   : > { %2944 = vmatmul.msk.f32.gmra.mxu1 %vm2194_vm11, %v2165_v14  ;;  %v1936_v38 = vsel %vm498_vm2, %v3699_v15, %v5031_v48 }
 0x2af   : > { %v2527_v18 = vpop.f32.mrf.mxu2 }
 0x2b0   : > { %v2621_v23 = vmul.f32 %v4145_v9, %v2527_v18 }
 0x2b1   : > { %1606 = vrot.lane.b32.xlu1 %v3897_v19, %s3173_s28 }
 0x2b2   : > { %v2657_v63 = vadd.f32 %v4158_v12, %v2621_v23  ;;  %1366 = vrot.lane.b32.xlu0 %v4254_v21, %s3167_s16  ;;  %1494 = vrot.lane.b32.xlu2 %v4269_v2, %s3171_s20  ;;  %v5030_v2 = vld [vmem:[#allocation22_spill] sm:$0xff] }
 0x2b3   : > { %v1725_v52 = vpop.permute.xlu1 %1724 }
 0x2b4   : > { %v2689_v62 = vmax.f32 %v2657_v63, 0.0  ;;  %v1597_v29 = vpop.permute.xlu0 %1596  ;;  %v4366_v22 = vpop.permute.xlu2 %1600 }
 0x2b5   : > { %v2100_v45 = vsel %vm2086_vm8, %v2067_v31, %v1597_v29  ;;  %v5035_v29 = vld [vmem:[#allocation26_spill] sm:$0xff] }
 0x2b6   : > { %v2753_v19 = vadd.f32 %v2721_v8, %v2689_v62  ;;  %v2133_v16 = vsel %vm2119_vm9, %v2100_v45, %v1725_v52  ;;  %v5034_v8 = vld [vmem:[#allocation16_spill] sm:$0xff] }
 0x2b7   : > { %v2166_v21 = vsel %vm2152_vm10, %v2133_v16, %v1853_v54  ;;  %v5033_v54 = vld [vmem:[#allocation32_spill] sm:$0xff]  ;;  %v1937_v52 = vsel %vm498_vm2, %v5034_v8, %v4006_v46  ;;  %v5037_v46 = vld [vmem:[#allocation37_spill] sm:$0xff] }
 0x2b8   : > { %2785 = vst.msk [vmem:[%s4190_s10 + $0x18] sm:$0xff] %vm2020_vm6, %v2753_v19  ;;  %2945 = vmatmul.msk.f32.gmra.mxu1 %vm2194_vm11, %v2166_v21  ;;  %v1969_v27 = vsel %vm1954_vm4, %v1936_v38, %v5033_v54  ;;  %v4453_v54 = vld [vmem:[#allocation2 + $0x170] sm:$0xff] }
 0x2b9   : > { %1622 = vrot.lane.b32.xlu1 %v4373_v37, %s3173_s28  ;;  %v2002_v42 = vsel %vm1987_vm5, %v1969_v27, %v4031_v30  ;;  %v5038_v27 = vld [vmem:[#allocation25_spill] sm:$0xff] }
 0x2ba   : > { %1734 = vrot.lane.b32.xlu0 %v5030_v2, %s3172_s26  ;;  %1862 = vrot.lane.b32.xlu2 %v5032_v10, %s3174_s29 }
 0x2bb   : > { %v1471_v35 = vpop.permute.xlu1 %1470 }
 0x2bc   : > { %v1343_v7 = vpop.permute.xlu0 %1342  ;;  %v4388_v17 = vpop.permute.xlu2 %1616 }
 0x2bd   : > { %v2035_v49 = vsel %vm2020_vm6, %v2002_v42, %v1343_v7  ;;  %v4459_v7 = vld [vmem:[#allocation2 + $0x171] sm:$0xff] }
 0x2be   : > { %v2068_v15 = vsel %vm2053_vm7, %v2035_v49, %v1471_v35  ;;  %v491_v30 = vpop.f32.mrf.mxu3 }
 0x2bf   : > { %529 = vst.msk [vmem:[#allocation2 + $0x181] sm:$0xff] %vm498_vm2, %v491_v30  ;;  %v2101_v61 = vsel %vm2086_vm8, %v2068_v15, %v1599_v26 }
 0x2c0   : > { %534 = vst.msk [vmem:[#allocation2 + $0x199] sm:$0xff] %vm498_vm2, %v491_v30 }
 0x2c1   : > { %v2530_v4 = vpop.f32.mrf.mxu2  ;;  %1878 = vrot.lane.b32.xlu1 %v4391_v41, %s3174_s29 }
 0x2c2   : > { %v2622_v40 = vmul.f32 %v4145_v9, %v2530_v4  ;;  %1750 = vrot.lane.b32.xlu0 %v4394_v56, %s3172_s26  ;;  %1352 = vrot.lane.b32.xlu2 %v3852_v51, %s3167_s16 }
 0x2c3   : > { %v1855_v53 = vpop.permute.xlu1 %1854 }
 0x2c4   : > { %v2658_v5 = vadd.f32 %v4158_v12, %v2622_v40  ;;  %v1727_v47 = vpop.permute.xlu0 %1726  ;;  %v1873_v32 = vpop.permute.xlu2 %1872 }
 0x2c5   : > { %v2134_v44 = vsel %vm2119_vm9, %v2101_v61, %v1727_v47  ;;  %v4477_v47 = vld [vmem:[#allocation2 + $0x172] sm:$0xff] }
 0x2c6   : > { %v2690_v14 = vmax.f32 %v2658_v5, 0.0  ;;  %v2167_v51 = vsel %vm2152_vm10, %v2134_v44, %v1855_v53  ;;  %v552_v26 = vld [vmem:[#allocation2 + $0x181] sm:$0x1]  ;;  %v494_v45 = vpop.f32.mrf.mxu3 }
 0x2c7   : > { %2946 = vmatmul.msk.f32.gmra.mxu1 %vm2194_vm11, %v2167_v51  ;;  %v553_v60 = vld [vmem:[#allocation2 + $0x199] sm:$0x1]  ;;  %571 = vst.msk [vmem:[#allocation2 + $0x180] sm:$0x1] %vm554_vm3, %v552_v26  ;;  %v5040_v26 = vld [vmem:[#allocation38_spill] sm:$0xff] }
 0x2c8   : > { %v2754_v18 = vadd.f32 %v2722_v28, %v2690_v14  ;;  %572 = vst.msk [vmem:[#allocation2 + $0x198] sm:$0x1] %vm554_vm3, %v553_v60  ;;  %v5039_v14 = vld [vmem:[#allocation35_spill] sm:$0xff] }
 0x2c9   : > { %1480 = vrot.lane.b32.xlu1 %v5026_v0, %s3171_s20  ;;  %530 = vst.msk [vmem:[#allocation2 + $0x189] sm:$0xff] %vm498_vm2, %v494_v45 }
 0x2ca   : > { %2786 = vst.msk [vmem:[%s4190_s10 + $0x20] sm:$0xff] %vm2020_vm6, %v2754_v18  ;;  %1240 = vrot.lane.b32.xlu0 %v4307_v13, %s3170_s19  ;;  %1368 = vrot.lane.b32.xlu2 %v4318_v25, %s3167_s16  ;;  %v3069_v13 = vld [vmem:[%s3267_s15 + $0x28] sm:$0xff] }
 0x2cb   : > { %v1361_v20 = vpop.permute.xlu1 %1360  ;;  %v2723_v25 = vsel %vm283_vm1, %v3069_v13, 0.0  ;;  %535 = vst.msk [vmem:[#allocation2 + $0x1a1] sm:$0xff] %vm498_vm2, %v494_v45 }
 0x2cc   : > { %v1473_v23 = vpop.permute.xlu0 %1472  ;;  %v4422_v3 = vpop.permute.xlu2 %1362  ;;  %v2044_v38 = vsel %vm2020_vm6, %v4125_v34, %v1361_v20 }
 0x2ce   : > { %v2533_v63 = vpop.f32.mrf.mxu2 }
 0x2cf   : > { %v2623_v0 = vmul.f32 %v4145_v9, %v2533_v63  ;;  %v3071_v63 = vld [vmem:[%s3267_s15 + $0x30] sm:$0xff] }
 0x2d0   : > { %v589_v49 = vld [vmem:[#allocation2 + $0x190] sm:$0x1] }
 0x2d1   : > { %v2659_v43 = vadd.f32 %v4158_v12, %v2623_v0  ;;  %1496 = vrot.lane.b32.xlu1 %v4324_v1, %s3171_s20  ;;  %v5036_v1 = vld [vmem:[#allocation33_spill] sm:$0xff]  ;;  %607 = vst.msk [vmem:[#allocation2 + $0x191] sm:$0x1] %vm554_vm3, %v589_v49  ;;  %v2724_v0 = vsel %vm283_vm1, %v3071_v63, 0.0  ;;  %v758_v49 = vld [vmem:[#allocation2 + $0x111] sm:$0xff] }
 0x2d2   : > { %1608 = vrot.lane.b32.xlu0 %v3875_v57, %s3173_s28  ;;  %1736 = vrot.lane.b32.xlu2 %v5035_v29, %s3172_s26  ;;  %v1970_v16 = vsel %vm1954_vm4, %v1937_v52, %v5036_v1  ;;  %v590_v30 = vld [vmem:[#allocation2 + $0x1a8] sm:$0x1]  ;;  %v855_v63 = vld [vmem:[#allocation2 + $0x129] sm:$0xff] }
 0x2d3   : > { %v2691_v62 = vmax.f32 %v2659_v43, 0.0  ;;  %v1729_v31 = vpop.permute.xlu1 %1728  ;;  %v2003_v57 = vsel %vm1987_vm5, %v1970_v16, %v5037_v46  ;;  %608 = vst.msk [vmem:[#allocation2 + $0x1a9] sm:$0x1] %vm554_vm3, %v590_v30  ;;  %v5041_v43 = vld [vmem:[#allocation39_spill] sm:$0xff]  ;;  %v4511_v1 = vld [vmem:[#allocation2 + $0x121] sm:$0xff] }
 0x2d4   : > { %v1489_v19 = vpop.permute.xlu0 %1488  ;;  %v4440_v2 = vpop.permute.xlu2 %1730  ;;  %v2036_v48 = vsel %vm2020_vm6, %v2003_v57, %v4347_v11 }
 0x2d5   : > { %v2755_v21 = vadd.f32 %v2723_v25, %v2691_v62  ;;  %v2069_v10 = vsel %vm2053_vm7, %v2036_v48, %v1473_v23  ;;  %v2077_v35 = vsel %vm2053_vm7, %v2044_v38, %v1489_v19  ;;  %v789_v23 = vld [vmem:[#allocation2 + $0x10a] sm:$0xff]  ;;  %v4509_v19 = vld [vmem:[#allocation2 + $0x180] sm:$0xff] }
 0x2d6   : > { %v2102_v11 = vsel %vm2086_vm8, %v2069_v10, %v4366_v22  ;;  %v2110_v34 = vsel %vm2086_vm8, %v2077_v35, %v4388_v17  ;;  %v757_v17 = vld [vmem:[#allocation2 + $0x109] sm:$0xff]  ;;  %v4524_v38 = vld [vmem:[#allocation2 + $0x181] sm:$0xff] }
 0x2d7   : > { %2787 = vst.msk [vmem:[%s4190_s10 + $0x28] sm:$0xff] %vm2020_vm6, %v2755_v21  ;;  %v2135_v15 = vsel %vm2119_vm9, %v2102_v11, %v1729_v31  ;;  %v4530_v35 = vld [vmem:[#allocation2 + $0x182] sm:$0xff] }
 0x2d9   : > { %1864 = vrot.lane.b32.xlu1 %v5038_v27, %s3174_s29  ;;  %v4533_v27 = vld [vmem:[#allocation2 + $0x122] sm:$0xff] }
 0x2da   : > { %1624 = vrot.lane.b32.xlu0 %v4453_v54, %s3173_s28  ;;  %1752 = vrot.lane.b32.xlu2 %v4459_v7, %s3172_s26 }
 0x2db   : > { %v1745_v42 = vpop.permute.xlu1 %1744 }
 0x2dc   : > { %v1857_v4 = vpop.permute.xlu0 %1856  ;;  %v2143_v40 = vsel %vm2119_vm9, %v2110_v34, %v1745_v42  ;;  %v4470_v53 = vpop.permute.xlu2 %1746 }
 0x2dd   : > { %v2168_v22 = vsel %vm2152_vm10, %v2135_v15, %v1857_v4  ;;  %v2176_v5 = vsel %vm2152_vm10, %v2143_v40, %v1873_v32  ;;  %v3070_v32 = vld [vmem:[#allocation2 + $0xc0] sm:$0xff]  ;;  %v790_v15 = vld [vmem:[#allocation2 + $0x112] sm:$0xff] }
 0x2de   : > { %2947 = vmatmul.msk.f32.gmra.mxu1 %vm2194_vm11, %v2168_v22  ;;  %2955 = vmatmul.msk.f32.vlgmr.msrb.gmra.mxu3 %vm2194_vm11, %v2176_v5  ;;  %v1938_v51 = vsel %vm498_vm2, %v3070_v32, %v5039_v14  ;;  %v823_v22 = vld [vmem:[#allocation2 + $0x128] sm:$0xff] }
 0x2df   : > { %v1971_v20 = vsel %vm1954_vm4, %v1938_v51, %v5040_v26  ;;  %v3072_v5 = vld [vmem:[#allocation2 + $0xc8] sm:$0xff] }
 0x2e0   : > { %v2004_v13 = vsel %vm1987_vm5, %v1971_v20, %v5041_v43 }
 0x2e1   : > { %1354 = vrot.lane.b32.xlu1 %v757_v17, %s3167_s16  ;;  %v5042_v17 = vld [vmem:[#allocation34_spill] sm:$0xff] }
 0x2e2   : > { %1880 = vrot.lane.b32.xlu0 %v4477_v47, %s3174_s29  ;;  %1242 = vrot.lane.b32.xlu2 %v4373_v37, %s3170_s19 }
 0x2e3   : > { %v1475_v61 = vpop.permute.xlu1 %1474 }
 0x2e4   : > { %v1347_v55 = vpop.permute.xlu0 %1346  ;;  %v4484_v28 = vpop.permute.xlu2 %1236 }
 0x2e5   : > { %v2329_v44 = vpop.f32.mrf.mxu1  ;;  %v2037_v8 = vsel %vm2020_vm6, %v2004_v13, %v1347_v55 }
 0x2e6   : > { %2971 = vmatmul.msk.f32.gmra.mxu2 %vm498_vm2, %v2329_v44  ;;  %v2070_v31 = vsel %vm2053_vm7, %v2037_v8, %v1475_v61  ;;  %v1939_v61 = vsel %vm498_vm2, %v3072_v5, %v5042_v17  ;;  %v5043_v44 = vld [vmem:[#allocation40_spill] sm:$0xff]  ;;  %v832_v5 = vld [vmem:[#allocation2 + $0x198] sm:$0xff] }
 0x2e7   : > { %v2536_v18 = vpop.f32.mrf.mxu2  ;;  %v1972_v32 = vsel %vm1954_vm4, %v1939_v61, %v5043_v44  ;;  %v864_v17 = vld [vmem:[#allocation2 + $0x199] sm:$0xff] }
 0x2e8   : > { %v2624_v60 = vmul.f32 %v4145_v9, %v2536_v18  ;;  %v5044_v18 = vld [vmem:[#allocation46_spill] sm:$0xff] }
 0x2e9   : > { %1370 = vrot.lane.b32.xlu1 %v4394_v56, %s3167_s16  ;;  %v2005_v26 = vsel %vm1987_vm5, %v1972_v32, %v5044_v18 }
 0x2ea   : > { %v2660_v37 = vadd.f32 %v4158_v12, %v2624_v60  ;;  %1482 = vrot.lane.b32.xlu0 %v789_v23, %s3171_s20  ;;  %1610 = vrot.lane.b32.xlu2 %v3941_v50, %s3173_s28 }
 0x2eb   : > { %v1491_v25 = vpop.permute.xlu1 %1490 }
 0x2ec   : > { %v2692_v52 = vmax.f32 %v2660_v37, 0.0  ;;  %v1603_v62 = vpop.permute.xlu0 %1602  ;;  %v4503_v29 = vpop.permute.xlu2 %1604  ;;  %v4571_v37 = vld [vmem:[#allocation2 + $0x188] sm:$0xff] }
 0x2ed   : > { %v2103_v45 = vsel %vm2086_vm8, %v2070_v31, %v1603_v62  ;;  %v863_v31 = vld [vmem:[#allocation2 + $0x189] sm:$0xff] }
 0x2ee   : > { %v2756_v56 = vadd.f32 %v2724_v0, %v2692_v52  ;;  %v2136_v16 = vsel %vm2119_vm9, %v2103_v45, %v4440_v2  ;;  %v887_v0 = vld [vmem:[#allocation2 + $0x12a] sm:$0xff] }
 0x2f0   : > { %2788 = vst.msk [vmem:[%s4190_s10 + $0x30] sm:$0xff] %vm2020_vm6, %v2756_v56 }
 0x2f1   : > { %1738 = vrot.lane.b32.xlu1 %v4511_v1, %s3172_s26 }
 0x2f2   : > { %1498 = vrot.lane.b32.xlu0 %v4391_v41, %s3171_s20  ;;  %1626 = vrot.lane.b32.xlu2 %v4509_v19, %s3173_s28  ;;  %v2045_v41 = vsel %vm2020_vm6, %v4185_v39, %v4422_v3 }
 0x2f3   : > { %v1859_v50 = vpop.permute.xlu1 %1858  ;;  %v2078_v10 = vsel %vm2053_vm7, %v2045_v41, %v1491_v25 }
 0x2f4   : > { %v1619_v21 = vpop.permute.xlu0 %1618  ;;  %v2332_v46 = vpop.f32.mrf.mxu1  ;;  %v2169_v57 = vsel %vm2152_vm10, %v2136_v16, %v1859_v50 }
 0x2f5   : > { %v1621_v48 = vpop.permute.xlu2 %1620  ;;  %2972 = vmatmul.msk.f32.gmra.mxu2 %vm498_vm2, %v2332_v46  ;;  %2948 = vmatmul.msk.f32.gmra.mxu1 %vm2194_vm11, %v2169_v57  ;;  %v2111_v2 = vsel %vm2086_vm8, %v2078_v10, %v1619_v21  ;;  %v3073_v46 = vld [vmem:[#allocation2 + $0xd8] sm:$0xff] }
 0x2f6   : > { %v2144_v39 = vsel %vm2119_vm9, %v2111_v2, %v4470_v53  ;;  %v5045_v57 = vld [vmem:[#allocation43_spill] sm:$0xff]  ;;  %v5046_v2 = vld [vmem:[#allocation36_spill] sm:$0xff] }
 0x2f9   : > { %1754 = vrot.lane.b32.xlu1 %v4524_v38, %s3172_s26 }
 0x2fa   : > { %1866 = vrot.lane.b32.xlu0 %v4533_v27, %s3174_s29  ;;  %1882 = vrot.lane.b32.xlu2 %v4530_v35, %s3174_s29 }
 0x2fb   : > { %v1349_v11 = vpop.permute.xlu1 %1348 }
 0x2fc   : > { %v1875_v34 = vpop.permute.xlu0 %1874 }
 0x2fd   : > { %v1877_v3 = vpop.permute.xlu2 %1876  ;;  %v2177_v42 = vsel %vm2152_vm10, %v2144_v39, %v1875_v34  ;;  %v5047_v34 = vld [vmem:[#allocation47_spill] sm:$0xff] }
 0x2fe   : > { %2956 = vmatmul.msk.f32.gmra.mxu3 %vm2194_vm11, %v2177_v42 }
 0x301   : > { %1244 = vrot.lane.b32.xlu1 %v4453_v54, %s3170_s19 }
 0x302   : > { %1356 = vrot.lane.b32.xlu0 %v758_v49, %s3167_s16  ;;  %1484 = vrot.lane.b32.xlu2 %v790_v15, %s3171_s20 }
 0x303   : > { %v2335_v4 = vpop.f32.mrf.mxu1  ;;  %v1365_v40 = vpop.permute.xlu1 %1364 }
 0x304   : > { %v1477_v30 = vpop.permute.xlu0 %1476  ;;  %2973 = vmatmul.msk.f32.gmra.mxu2 %vm498_vm2, %v2335_v4 }
 0x305   : > { %v1479_v53 = vpop.permute.xlu2 %1478 }
 0x309   : > { %1612 = vrot.lane.b32.xlu1 %v823_v22, %s3173_s28 }
 0x30a   : > { %1372 = vrot.lane.b32.xlu0 %v4459_v7, %s3167_s16  ;;  %1500 = vrot.lane.b32.xlu2 %v4477_v47, %s3171_s20  ;;  %v2013_v7 = vsel %vm1987_vm5, %v4148_v33, %v4484_v28  ;;  %v2038_v47 = vsel %vm2020_vm6, %v2005_v26, %v1349_v11 }
 0x30b   : > { %v1733_v54 = vpop.permute.xlu1 %1732  ;;  %v2046_v20 = vsel %vm2020_vm6, %v2013_v7, %v1365_v40  ;;  %v2071_v60 = vsel %vm2053_vm7, %v2038_v47, %v1477_v30  ;;  %v896_v7 = vld [vmem:[#allocation2 + $0x19a] sm:$0xff] }
 0x30c   : > { %v1493_v55 = vpop.permute.xlu0 %1492  ;;  %v2104_v33 = vsel %vm2086_vm8, %v2071_v60, %v4503_v29  ;;  %v4586_v29 = vld [vmem:[#allocation2 + $0x18a] sm:$0xff]  ;;  %v3074_v60 = vld [vmem:[#allocation2 + $0xe0] sm:$0xff] }
 0x30d   : > { %v4559_v14 = vpop.permute.xlu2 %1494  ;;  %v2338_v51 = vpop.f32.mrf.mxu1  ;;  %v2079_v23 = vsel %vm2053_vm7, %v2046_v20, %v1493_v55  ;;  %v2137_v13 = vsel %vm2119_vm9, %v2104_v33, %v1733_v54  ;;  %v888_v54 = vld [vmem:[#allocation2 + $0x13a] sm:$0xff] }
 0x30e   : > { %2974 = vmatmul.msk.f32.gmra.mxu2 %vm498_vm2, %v2338_v51  ;;  %v2112_v28 = vsel %vm2086_vm8, %v2079_v23, %v1621_v48  ;;  %v1940_v48 = vsel %vm498_vm2, %v3073_v46, %v5045_v57  ;;  %v833_v20 = vld [vmem:[#allocation2 + $0x1a0] sm:$0xff]  ;;  %v5048_v23 = vld [vmem:[#allocation42_spill] sm:$0xff] }
 0x30f   : > { %v1973_v11 = vsel %vm1954_vm4, %v1940_v48, %v5046_v2 }
 0x311   : > { %1628 = vrot.lane.b32.xlu1 %v4571_v37, %s3173_s28 }
 0x312   : > { %1740 = vrot.lane.b32.xlu0 %v855_v63, %s3172_s26  ;;  %1868 = vrot.lane.b32.xlu2 %v887_v0, %s3174_s29  ;;  %v1941_v63 = vsel %vm498_vm2, %v3074_v60, %v5048_v23  ;;  %v5049_v0 = vld [vmem:[#allocation48_spill] sm:$0xff] }
 0x313   : > { %v1749_v43 = vpop.permute.xlu1 %1748  ;;  %v1974_v33 = vsel %vm1954_vm4, %v1941_v63, %v5049_v0 }
 0x314   : > { %v1861_v25 = vpop.permute.xlu0 %1860  ;;  %v2145_v8 = vsel %vm2119_vm9, %v2112_v28, %v1749_v43  ;;  %v865_v43 = vld [vmem:[#allocation2 + $0x1a1] sm:$0xff] }
 0x315   : > { %v1863_v52 = vpop.permute.xlu2 %1862  ;;  %v2170_v62 = vsel %vm2152_vm10, %v2137_v13, %v1861_v25  ;;  %v2178_v56 = vsel %vm2152_vm10, %v2145_v8, %v1877_v3  ;;  %v856_v3 = vld [vmem:[#allocation2 + $0x139] sm:$0xff] }
 0x316   : > { %2949 = vmatmul.msk.f32.gmra.mxu1 %vm2194_vm11, %v2170_v62  ;;  %2957 = vmatmul.msk.f32.gmra.mxu3 %vm2194_vm11, %v2178_v56  ;;  %v5050_v8 = vld [vmem:[#allocation44_spill] sm:$0xff] }
 0x319   : > { %1884 = vrot.lane.b32.xlu1 %v4586_v29, %s3174_s29 }
 0x31a   : > { %1756 = vrot.lane.b32.xlu0 %v863_v31, %s3172_s26  ;;  %1358 = vrot.lane.b32.xlu2 %v4511_v1, %s3167_s16 }
 0x31b   : > { %v1239_v45 = vpop.permute.xlu1 %1238 }
 0x31c   : > { %v1351_v50 = vpop.permute.xlu0 %1350  ;;  %v2341_v16 = vpop.f32.mrf.mxu1 }
 0x31d   : > { %v4593_v21 = vpop.permute.xlu2 %1352  ;;  %2975 = vmatmul.msk.f32.gmra.mxu2 %vm498_vm2, %v2341_v16  ;;  %v5052_v16 = vld [vmem:[#allocation6_spill] sm:$0xff] }
 0x321   : > { %1486 = vrot.lane.b32.xlu1 %v4533_v27, %s3171_s20  ;;  %v2006_v27 = vsel %vm1987_vm5, %v1973_v11, %v5047_v34 }
 0x322   : > { %1246 = vrot.lane.b32.xlu0 %v4509_v19, %s3170_s19  ;;  %1374 = vrot.lane.b32.xlu2 %v4524_v38, %s3167_s16  ;;  %v2039_v39 = vsel %vm2020_vm6, %v2006_v27, %v1351_v50  ;;  %v824_v19 = vld [vmem:[#allocation2 + $0x138] sm:$0xff]  ;;  %v897_v50 = vld [vmem:[#allocation2 + $0x1a2] sm:$0xff] }
 0x323   : > { %v1607_v1 = vpop.permute.xlu1 %1606  ;;  %v2072_v38 = vsel %vm2053_vm7, %v2039_v39, %v1479_v53 }
 0x324   : > { %v1367_v41 = vpop.permute.xlu0 %1366  ;;  %v2105_v15 = vsel %vm2086_vm8, %v2072_v38, %v1607_v1 }
 0x325   : > { %v4604_v10 = vpop.permute.xlu2 %1368 }
 0x329   : > { %1502 = vrot.lane.b32.xlu1 %v4530_v35, %s3171_s20  ;;  %v2014_v35 = vsel %vm1987_vm5, %v4140_v59, %v1239_v45 }
 0x32a   : > { %1614 = vrot.lane.b32.xlu0 %v824_v19, %s3173_s28  ;;  %1742 = vrot.lane.b32.xlu2 %v856_v3, %s3172_s26  ;;  %v2047_v53 = vsel %vm2020_vm6, %v2014_v35, %v1367_v41  ;;  %v3075_v35 = vld [vmem:[#allocation2 + $0xf0] sm:$0xff] }
 0x32b   : > { %v2344_v42 = vpop.f32.mrf.mxu1  ;;  %v1623_v49 = vpop.permute.xlu1 %1622  ;;  %v2080_v61 = vsel %vm2053_vm7, %v2047_v53, %v4559_v14  ;;  %v5054_v53 = vld [vmem:[#allocation41_spill] sm:$0xff] }
 0x32c   : > { %v1735_v4 = vpop.permute.xlu0 %1734  ;;  %2976 = vmatmul.msk.f32.gmra.mxu2 %vm498_vm2, %v2344_v42  ;;  %v2113_v44 = vsel %vm2086_vm8, %v2080_v61, %v1623_v49 }
 0x32d   : > { %v2138_v40 = vsel %vm2119_vm9, %v2105_v15, %v1735_v4  ;;  %v1737_v30 = vpop.permute.xlu2 %1736 }
 0x32e   : > { %v2171_v22 = vsel %vm2152_vm10, %v2138_v40, %v1863_v52  ;;  %v2007_v52 = vsel %vm1987_vm5, %v1974_v33, %v5050_v8 }
 0x32f   : > { %2950 = vmatmul.msk.f32.gmra.mxu1 %vm2194_vm11, %v2171_v22  ;;  %v2040_v62 = vsel %vm2020_vm6, %v2007_v52, %v4593_v21 }
 0x331   : > { %1870 = vrot.lane.b32.xlu1 %v888_v54, %s3174_s29  ;;  %v1942_v54 = vsel %vm498_vm2, %v3075_v35, %v5054_v53  ;;  %v3080_v53 = vld [vmem:[%s3267_s15 + $0x48] sm:$0xff] }
 0x332   : > { %1630 = vrot.lane.b32.xlu0 %v832_v5, %s3173_s28  ;;  %1758 = vrot.lane.b32.xlu2 %v864_v17, %s3172_s26  ;;  %v5055_v17 = vld [vmem:[#allocation10_spill] sm:$0xff] }
 0x333   : > { %v1879_v55 = vpop.permute.xlu1 %1878 }
 0x334   : > { %v1751_v59 = vpop.permute.xlu0 %1750 }
 0x335   : > { %v2146_v32 = vsel %vm2119_vm9, %v2113_v44, %v1751_v59  ;;  %v2347_v51 = vpop.f32.mrf.mxu1  ;;  %v1753_v26 = vpop.permute.xlu2 %1752 }
 0x336   : > { %2977 = vmatmul.msk.f32.gmra.mxu2 %vm498_vm2, %v2347_v51  ;;  %v2179_v18 = vsel %vm2152_vm10, %v2146_v32, %v1879_v55  ;;  %v5056_v55 = vld [vmem:[#allocation45_spill] sm:$0xff] }
 0x337   : > { %2958 = vmatmul.msk.f32.gmra.mxu3 %vm2194_vm11, %v2179_v18  ;;  %v1975_v44 = vsel %vm1954_vm4, %v1942_v54, %v5056_v55  ;;  %v2727_v54 = vsel %vm283_vm1, %v3080_v53, 0.0 }
 0x338   : > { %v2008_v59 = vsel %vm1987_vm5, %v1975_v44, %v4103_v36 }
 0x339   : > { %1248 = vrot.lane.b32.xlu1 %v4571_v37, %s3170_s19 }
 0x33a   : > { %1886 = vrot.lane.b32.xlu0 %v896_v7, %s3174_s29  ;;  %1376 = vrot.lane.b32.xlu2 %v863_v31, %s3167_s16  ;;  %v5051_v31 = vld [vmem:[#allocation7_spill] sm:$0xff] }
 0x33b   : > { %v1481_v14 = vpop.permute.xlu1 %1480  ;;  %v1949_v45 = vsel %vm498_vm2, %v4173_v6, %v5051_v31 }
 0x33c   : > { %v1241_v47 = vpop.permute.xlu0 %1240  ;;  %v2073_v56 = vsel %vm2053_vm7, %v2040_v62, %v1481_v14  ;;  %v1982_v46 = vsel %vm1954_vm4, %v1949_v45, %v5052_v16 }
 0x33d   : > { %v1243_v28 = vpop.permute.xlu2 %1242  ;;  %v2015_v1 = vsel %vm1987_vm5, %v1982_v46, %v1241_v47 }
 0x33e   : > { %v2048_v6 = vsel %vm2020_vm6, %v2015_v1, %v4604_v10  ;;  %v637_v10 = vld [vmem:[#allocation2 + $0x150] sm:$0xff] }
 0x341   : > { %1632 = vrot.lane.b32.xlu1 %v833_v20, %s3173_s28  ;;  %s3002_s28 = sshll.u32 %s3232_s25, 8  ;;  %s2815_s25 = scalar_lea.sflag [#allocation4], %s242_s14 }
 0x342   : > { %1504 = vrot.lane.b32.xlu0 %v4586_v29, %s3171_s20  ;;  %1760 = vrot.lane.b32.xlu2 %v865_v43, %s3172_s26  ;;  %v3076_v43 = vld [vmem:[%s3267_s15 + $0x38] sm:$0xff]  ;;  %s2826_s11 = scalar_lea.hbm %s4961_s6, %s3002_s28  ;;  %s3123_s20 = scalar_lea.hbm %s4961_s6, 512 }
 0x343   : > { %v1497_v37 = vpop.permute.xlu1 %1496  ;;  %s2829_s13 = sshll.u32 %s2826_s11, 4  ;;  %s2830_s13 = int_to_ptr.hbm [resolvable:$true] %s2829_s13 }
 0x344   : > { %v1609_v13 = vpop.permute.xlu0 %1608  ;;  %v2350_v25 = vpop.f32.mrf.mxu1  ;;  %v2081_v11 = vsel %vm2053_vm7, %v2048_v6, %v1497_v37  ;;  %v2725_v37 = vsel %vm283_vm1, %v3076_v43, 0.0  ;;  %s3117_s9 = sshra.s32 %s2830_s13, 4  ;;  %s3118_s9 = int_to_ptr.hbm [resolvable:$true] %s3117_s9 }
 0x345   : > { %2978 = vmatmul.msk.f32.gmra.mxu2 %vm498_vm2, %v2350_v25  ;;  %v2106_v29 = vsel %vm2086_vm8, %v2073_v56, %v1609_v13  ;;  %v1611_v21 = vpop.permute.xlu2 %1610  ;;  %s3119_s16 = scalar_lea.hbm %s3118_s9, 256  ;;  %p3124_p0 = scmp.lt.s32.totalorder %s3118_s9, %s4961_s6 }
 0x346   : > { %v2139_v48 = vsel %vm2119_vm9, %v2106_v29, %v1737_v30  ;;  %v5053_v30 = vld [vmem:[#allocation8_spill] sm:$0xff]  ;;  %p3120_p11 = scmp.ne.s32.totalorder %s3118_s9, %s3119_s16  ;;  %p3125_p1 = scmp.lt.s32.totalorder %s3123_s20, %s3119_s16 }
 0x347   : > { %v1950_v22 = vsel %vm498_vm2, %v637_v10, %v5053_v30 }
 0x348   : > { %v1983_v61 = vsel %vm1954_vm4, %v1950_v22, %v5055_v17  ;;  %v4729_v22 = vld [vmem:[%s4960_s5] ss:$0 sm:$0xff]  ;;  %p3121_p12 = pnand %p3120_p11, %p3249_p5  ;;  %p3126_p2 = por %p3125_p1, %p3124_p0 }
 0x349   : > { %v2016_v32 = vsel %vm1987_vm5, %v1983_v61, %v1243_v28 }
 0x34a   : > { %1888 = vrot.lane.b32.xlu0 %v897_v50, %s3174_s29  ;;  %p3122_p13 = pneg %p3121_p12 }
 0x34b   : > { %v1865_v57 = vpop.permute.xlu1 %1864 }
 0x34c   : > { %v1625_v41 = vpop.permute.xlu0 %1624  ;;  %v2172_v2 = vsel %vm2152_vm10, %v2139_v48, %v1865_v57  ;;  %v3077_v57 = vld [vmem:[%s3267_s15 + $0x40] sm:$0xff]  ;;  %p3127_p3 = pnand %p3126_p2, %p3122_p13 }
 0x34d   : > { %2951 = vmatmul.msk.f32.gmra.mxu1 %vm2194_vm11, %v2172_v2  ;;  %v2114_v34 = vsel %vm2086_vm8, %v2081_v11, %v1625_v41  ;;  %v1627_v38 = vpop.permute.xlu2 %1626  ;;  %v2726_v48 = vsel %vm283_vm1, %v3077_v57, 0.0 }
 0x34e   : > { %v2147_v19 = vsel %vm2119_vm9, %v2114_v34, %v1753_v26 }
 0x353   : > { %v1355_v27 = vpop.permute.xlu1 %1354 }
 0x354   : > { %v1881_v39 = vpop.permute.xlu0 %1880  ;;  %v2041_v51 = vsel %vm2020_vm6, %v2008_v59, %v1355_v27  ;;  %v638_v27 = vld [vmem:[#allocation2 + $0x158] sm:$0xff] }
 0x355   : > { %v2180_v3 = vsel %vm2152_vm10, %v2147_v19, %v1881_v39  ;;  %v1883_v4 = vpop.permute.xlu2 %1882  ;;  %v5057_v39 = vld [vmem:[#allocation9_spill] sm:$0xff] }
 0x356   : > { %2959 = vmatmul.msk.f32.gmra.mxu3 %vm2194_vm11, %v2180_v3  ;;  %v1951_v19 = vsel %vm498_vm2, %v638_v27, %v5057_v39 }
 0x35b   : > { %v2353_v42 = vpop.f32.mrf.mxu1  ;;  %v1371_v49 = vpop.permute.xlu1 %1370 }
 0x35c   : > { %v1483_v15 = vpop.permute.xlu0 %1482  ;;  %2979 = vmatmul.msk.f32.gmra.mxu2 %vm498_vm2, %v2353_v42  ;;  %v2049_v18 = vsel %vm2020_vm6, %v2016_v32, %v1371_v49 }
 0x35d   : > { %v2074_v26 = vsel %vm2053_vm7, %v2041_v51, %v1483_v15  ;;  %v1485_v47 = vpop.permute.xlu2 %1484 }
 0x35e   : > { %v2107_v60 = vsel %vm2086_vm8, %v2074_v26, %v1611_v21 }
 0x363   : > { %v1739_v40 = vpop.permute.xlu1 %1738 }
 0x364   : > { %v1499_v5 = vpop.permute.xlu0 %1498  ;;  %v2140_v63 = vsel %vm2119_vm9, %v2107_v60, %v1739_v40  ;;  %v4723_v40 = vld [vmem:[%s4959_s4] ss:$0 sm:$0xff] }
 0x365   : > { %v2082_v7 = vsel %vm2053_vm7, %v2049_v18, %v1499_v5  ;;  %v1501_v31 = vpop.permute.xlu2 %1500 }
 0x366   : > { %v2115_v36 = vsel %vm2086_vm8, %v2082_v7, %v1627_v38  ;;  %v5058_v38 = vld [vmem:[#allocation12_spill] sm:$0xff] }
 0x367   : > { %v1984_v42 = vsel %vm1954_vm4, %v1951_v19, %v5058_v38  ;;  %v640_v38 = vld [vmem:[#allocation2 + $0x170] sm:$0xff] }
 0x369   : > { %v2539_v14 = vpop.f32.mrf.mxu2 }
 0x36a   : > { %v2625_v20 = vmul.f32 %v4145_v9, %v2539_v14 }
 0x36b   : > { %v1755_v23 = vpop.permute.xlu1 %1754 }
 0x36c   : > { %v2661_v0 = vadd.f32 %v4158_v12, %v2625_v20  ;;  %v1867_v33 = vpop.permute.xlu0 %1866  ;;  %v2148_v28 = vsel %vm2119_vm9, %v2115_v36, %v1755_v23  ;;  %v3081_v36 = vld [vmem:[%s3267_s15 + $0x50] sm:$0xff] }
 0x36d   : > { %v2173_v13 = vsel %vm2152_vm10, %v2140_v63, %v1867_v33  ;;  %v2181_v25 = vsel %vm2152_vm10, %v2148_v28, %v1883_v4  ;;  %v1869_v41 = vpop.permute.xlu2 %1868  ;;  %v2728_v23 = vsel %vm283_vm1, %v3081_v36, 0.0  ;;  %v3084_v36 = vld [vmem:[%s3267_s15 + $0x68] sm:$0xff] }
 0x36e   : > { %v2693_v8 = vmax.f32 %v2661_v0, 0.0  ;;  %2952 = vmatmul.msk.f32.gmra.mxu1 %vm2194_vm11, %v2173_v13  ;;  %2960 = vmatmul.msk.f32.gmra.mxu3 %vm2194_vm11, %v2181_v25  ;;  %v639_v13 = vld [vmem:[#allocation2 + $0x168] sm:$0xff] }
 0x370   : > { %v2757_v52 = vadd.f32 %v2725_v37, %v2693_v8  ;;  %v5059_v8 = vld [vmem:[#allocation14_spill] sm:$0xff] }
 0x372   : > { %2789 = vst.msk [vmem:[%s4190_s10 + $0x38] sm:$0xff] %vm2020_vm6, %v2757_v52  ;;  %v2356_v62 = vpop.f32.mrf.mxu1  ;;  %v1952_v52 = vsel %vm498_vm2, %v639_v13, %v5059_v8 }
 0x373   : > { %2980 = vmatmul.msk.f32.gmra.mxu2 %vm498_vm2, %v2356_v62  ;;  %v1245_v56 = vpop.permute.xlu1 %1244 }
 0x374   : > { %v1357_v45 = vpop.permute.xlu0 %1356  ;;  %v2017_v49 = vsel %vm1987_vm5, %v1984_v42, %v1245_v56 }
 0x375   : > { %v2042_v6 = vsel %vm2020_vm6, %v4086_v58, %v1357_v45  ;;  %v1359_v4 = vpop.permute.xlu2 %1358  ;;  %v5060_v45 = vld [vmem:[#allocation11_spill] sm:$0xff] }
 0x376   : > { %v2075_v11 = vsel %vm2053_vm7, %v2042_v6, %v1485_v47  ;;  %v2043_v37 = vsel %vm2020_vm6, %v4090_v24, %v1359_v4  ;;  %v5062_v4 = vld [vmem:[#allocation17_spill] sm:$0xff] }
 0x378   : > { %v2542_v29 = vpop.f32.mrf.mxu2 }
 0x379   : > { %v2626_v50 = vmul.f32 %v4145_v9, %v2542_v29  ;;  %v1985_v29 = vsel %vm1954_vm4, %v1952_v52, %v5060_v45  ;;  %v3085_v52 = vld [vmem:[%s3267_s15 + $0x70] sm:$0xff] }
 0x37b   : > { %v2662_v16 = vadd.f32 %v4158_v12, %v2626_v50  ;;  %v1613_v46 = vpop.permute.xlu1 %1612 }
 0x37c   : > { %v1373_v1 = vpop.permute.xlu0 %1372  ;;  %v2108_v9 = vsel %vm2086_vm8, %v2075_v11, %v1613_v46  ;;  %v3082_v46 = vld [vmem:[%s3267_s15 + $0x58] sm:$0xff] }
 0x37d   : > { %v2694_v21 = vmax.f32 %v2662_v16, 0.0  ;;  %v2050_v10 = vsel %vm2020_vm6, %v2017_v49, %v1373_v1  ;;  %v1375_v26 = vpop.permute.xlu2 %1374  ;;  %v2729_v57 = vsel %vm283_vm1, %v3082_v46, 0.0  ;;  %v3086_v46 = vld [vmem:[%s3267_s15 + $0x78] sm:$0xff] }
 0x37e   : > { %v2083_v5 = vsel %vm2053_vm7, %v2050_v10, %v1501_v31 }
 0x37f   : > { %v2758_v2 = vadd.f32 %v2726_v48, %v2694_v21 }
 0x381   : > { %2790 = vst.msk [vmem:[%s4190_s10 + $0x40] sm:$0xff] %vm2020_vm6, %v2758_v2 }
 0x383   : > { %v1629_v34 = vpop.permute.xlu1 %1628 }
 0x384   : > { %v1741_v12 = vpop.permute.xlu0 %1740  ;;  %v2116_v61 = vsel %vm2086_vm8, %v2083_v5, %v1629_v34 }
 0x385   : > { %v2141_v3 = vsel %vm2119_vm9, %v2108_v9, %v1741_v12  ;;  %v1743_v43 = vpop.permute.xlu2 %1742 }
 0x386   : > { %v2174_v58 = vsel %vm2152_vm10, %v2141_v3, %v1869_v41 }
 0x387   : > { %2953 = vmatmul.msk.f32.gmra.mxu1 %vm2194_vm11, %v2174_v58  ;;  %v2545_v15 = vpop.f32.mrf.mxu2  ;;  %v5061_v58 = vld [vmem:[#allocation15_spill] sm:$0xff] }
 0x388   : > { %v2627_v30 = vmul.f32 %v4723_v40, %v2545_v15  ;;  %v1953_v49 = vsel %vm498_vm2, %v640_v38, %v5061_v58  ;;  %v3088_v58 = vld [vmem:[%s3267_s15 + $0x88] sm:$0xff] }
 0x389   : > { %v1986_v10 = vsel %vm1954_vm4, %v1953_v49, %v5062_v4  ;;  %v2735_v49 = vsel %vm283_vm1, %v3088_v58, 0.0 }
 0x38a   : > { %v2663_v35 = vadd.f32 %v4729_v22, %v2627_v30 }
 0x38b   : > { %v1885_v17 = vpop.permute.xlu1 %1884 }
 0x38c   : > { %v2695_v55 = vmax.f32 %v2663_v35, 0.0  ;;  %v1757_v44 = vpop.permute.xlu0 %1756 }
 0x38d   : > { %v2149_v59 = vsel %vm2119_vm9, %v2116_v61, %v1757_v44  ;;  %v1759_v2 = vpop.permute.xlu2 %1758 }
 0x38e   : > { %v2759_v32 = vadd.f32 %v2727_v54, %v2695_v55  ;;  %v2182_v51 = vsel %vm2152_vm10, %v2149_v59, %v1885_v17  ;;  %v3083_v54 = vld [vmem:[%s3267_s15 + $0x60] sm:$0xff]  ;;  %v4782_v55 = vpop.f32.mrf.mxu3 }
 0x38f   : > { %2961 = vmatmul.msk.f32.gmra.mxu3 %vm2194_vm11, %v2182_v51  ;;  %v2730_v5 = vsel %vm283_vm1, %v3083_v54, 0.0 }
 0x390   : > { %2791 = vst.msk [vmem:[%s4190_s10 + $0x48] sm:$0xff] %vm2020_vm6, %v2759_v32 }
 0x391   : > { %v2548_v18 = vpop.f32.mrf.mxu2 }
 0x392   : > { %v2628_v7 = vmul.f32 %v4723_v40, %v2548_v18 }
 0x393   : > { %v2359_v14 = vpop.f32.mrf.mxu1  ;;  %v1487_v47 = vpop.permute.xlu1 %1486 }
 0x394   : > { %v2664_v20 = vadd.f32 %v4729_v22, %v2628_v7  ;;  %v1247_v60 = vpop.permute.xlu0 %1246  ;;  %2981 = vmatmul.msk.f32.gmra.mxu2 %vm498_vm2, %v2359_v14  ;;  %v2076_v25 = vsel %vm2053_vm7, %v2043_v37, %v1487_v47 }
 0x395   : > { %v2018_v48 = vsel %vm1987_vm5, %v1985_v29, %v1247_v60  ;;  %v1377_v30 = vpop.permute.xlu2 %1376 }
 0x396   : > { %v2696_v63 = vmax.f32 %v2664_v20, 0.0  ;;  %v2051_v6 = vsel %vm2020_vm6, %v2018_v48, %v1375_v26 }
 0x398   : > { %v2760_v0 = vadd.f32 %v2728_v23, %v2696_v63  ;;  %v2731_v23 = vsel %vm283_vm1, %v3084_v36, 0.0  ;;  %v2380_v63 = vpop.f32.mrf.mxu3 }
 0x39a   : > { %2792 = vst.msk [vmem:[%s4190_s10 + $0x50] sm:$0xff] %vm2020_vm6, %v2760_v0 }
 0x39b   : > { %v1503_v33 = vpop.permute.xlu1 %1502 }
 0x39c   : > { %v1615_v28 = vpop.permute.xlu0 %1614  ;;  %v2084_v34 = vsel %vm2053_vm7, %v2051_v6, %v1503_v33 }
 0x39d   : > { %v2109_v62 = vsel %vm2086_vm8, %v2076_v25, %v1615_v28  ;;  %v1761_v14 = vpop.permute.xlu2 %1760 }
 0x39e   : > { %v2142_v24 = vsel %vm2119_vm9, %v2109_v62, %v1743_v43  ;;  %v2732_v62 = vsel %vm283_vm1, %v3085_v52, 0.0 }
 0x3a0   : > { %v2551_v56 = vpop.f32.mrf.mxu2  ;;  %v2383_v43 = vpop.f32.mrf.mxu3 }
 0x3a1   : > { %v2629_v31 = vmul.f32 %v4723_v40, %v2551_v56 }
 0x3a3   : > { %v2665_v50 = vadd.f32 %v4729_v22, %v2629_v31  ;;  %v1871_v16 = vpop.permute.xlu1 %1870 }
 0x3a4   : > { %v1631_v1 = vpop.permute.xlu0 %1630  ;;  %v2175_v21 = vsel %vm2152_vm10, %v2142_v24, %v1871_v16 }
 0x3a5   : > { %v2697_v41 = vmax.f32 %v2665_v50, 0.0  ;;  %2954 = vmatmul.msk.f32.gmra.mxu1 %vm2194_vm11, %v2175_v21  ;;  %v2117_v27 = vsel %vm2086_vm8, %v2084_v34, %v1631_v1  ;;  %v3087_v34 = vld [vmem:[%s3267_s15 + $0x80] sm:$0xff] }
 0x3a6   : > { %v2150_v19 = vsel %vm2119_vm9, %v2117_v27, %v1759_v2  ;;  %v2734_v27 = vsel %vm283_vm1, %v3087_v34, 0.0 }
 0x3a7   : > { %v2761_v11 = vadd.f32 %v2729_v57, %v2697_v41  ;;  %v2733_v57 = vsel %vm283_vm1, %v3086_v46, 0.0 }
 0x3a9   : > { %2793 = vst.msk [vmem:[%s4190_s10 + $0x58] sm:$0xff] %vm2020_vm6, %v2761_v11 }
 0x3ab   : > { %v1249_v9 = vpop.permute.xlu1 %1248 }
 0x3ac   : > { %v1887_v12 = vpop.permute.xlu0 %1886  ;;  %v2362_v39 = vpop.f32.mrf.mxu1  ;;  %v2019_v35 = vsel %vm1987_vm5, %v1986_v10, %v1249_v9 }
 0x3ad   : > { %2982 = vmatmul.msk.f32.gmra.mxu2 %vm498_vm2, %v2362_v39  ;;  %v2183_v3 = vsel %vm2152_vm10, %v2150_v19, %v1887_v12  ;;  %v2052_v44 = vsel %vm2020_vm6, %v2019_v35, %v1377_v30 }
 0x3ae   : > { %2962 = vmatmul.msk.f32.gmra.mxu3 %vm2194_vm11, %v2183_v3 }
 0x3af   : > { %v2554_v42 = vpop.f32.mrf.mxu2 }
 0x3b0   : > { %v2630_v15 = vmul.f32 %v4723_v40, %v2554_v42 }
 0x3b2   : > { %v2666_v53 = vadd.f32 %v4729_v22, %v2630_v15 }
 0x3b3   : > { %v1633_v51 = vpop.permute.xlu1 %1632 }
 0x3b4   : > { %v2698_v17 = vmax.f32 %v2666_v53, 0.0  ;;  %v1505_v61 = vpop.permute.xlu0 %1504 }
 0x3b5   : > { %v2085_v32 = vsel %vm2053_vm7, %v2052_v44, %v1505_v61 }
 0x3b6   : > { %v2762_v59 = vadd.f32 %v2730_v5, %v2698_v17  ;;  %v2118_v18 = vsel %vm2086_vm8, %v2085_v32, %v1633_v51  ;;  %v3089_v5 = vld [vmem:[%s3267_s15 + $0x90] sm:$0xff] }
 0x3b7   : > { %v2151_v60 = vsel %vm2119_vm9, %v2118_v18, %v1761_v14  ;;  %v2736_v17 = vsel %vm283_vm1, %v3089_v5, 0.0  ;;  %v3090_v18 = vld [vmem:[%s3267_s15 + $0xc8] sm:$0xff] }
 0x3b8   : > { %2794 = vst.msk [vmem:[%s4190_s10 + $0x60] sm:$0xff] %vm2020_vm6, %v2762_v59 }
 0x3b9   : > { %v2557_v26 = vpop.f32.mrf.mxu2 }
 0x3ba   : > { %v2631_v7 = vmul.f32 %v4723_v40, %v2557_v26  ;;  %v2386_v56 = vpop.f32.mrf.mxu3  ;;  %v2743_v26 = vsel %vm283_vm1, %v3090_v18, 0.0 }
 0x3bc   : > { %v2667_v47 = vadd.f32 %v4729_v22, %v2631_v7  ;;  %v1889_v20 = vpop.permute.xlu0 %1888 }
 0x3bd   : > { %v2184_v0 = vsel %vm2152_vm10, %v2151_v60, %v1889_v20 }
 0x3be   : > { %v2699_v33 = vmax.f32 %v2667_v47, 0.0  ;;  %2963 = vmatmul.msk.f32.gmra.mxu3 %vm2194_vm11, %v2184_v0 }
 0x3c0   : > { %v2763_v28 = vadd.f32 %v2731_v23, %v2699_v33  ;;  %v3091_v23 = vld [vmem:[%s3267_s15 + $0x98] sm:$0xff] }
 0x3c2   : > { %2795 = vst.msk [vmem:[%s4190_s10 + $0x68] sm:$0xff] %vm2020_vm6, %v2763_v28 }
 0x3c6   : > { %2989 = vmatmul.msk.f32.vlgmr.msra.gmra.mxu3 %vm498_vm2, %v2383_v43  ;;  %v3092_v43 = vld [vmem:[%s3267_s15 + $0xd0] sm:$0xff] }
 0x3c8   : > { %v2560_v37 = vpop.f32.mrf.mxu2 }
 0x3c9   : > { %v2632_v13 = vmul.f32 %v4723_v40, %v2560_v37  ;;  %v2744_v37 = vsel %vm283_vm1, %v3092_v43, 0.0  ;;  %v3101_v43 = vld [vmem:[%s3267_s15 + $0xc0] sm:$0xff] }
 0x3ca   : > { %v2365_v25 = vpop.f32.mrf.mxu1 }
 0x3cb   : > { %v2668_v8 = vadd.f32 %v4729_v22, %v2632_v13  ;;  %2983 = vmatmul.msk.f32.gmra.mxu2 %vm498_vm2, %v2365_v25 }
 0x3cd   : > { %v2700_v31 = vmax.f32 %v2668_v8, 0.0 }
 0x3ce   : > { %2990 = vmatmul.msk.f32.gmra.mxu3 %vm498_vm2, %v2386_v56 }
 0x3cf   : > { %v2764_v45 = vadd.f32 %v2732_v62, %v2700_v31  ;;  %v3093_v31 = vld [vmem:[%s3267_s15 + $0xd8] sm:$0xff] }
 0x3d1   : > { %2796 = vst.msk [vmem:[%s4190_s10 + $0x70] sm:$0xff] %vm2020_vm6, %v2764_v45  ;;  %v2745_v45 = vsel %vm283_vm1, %v3093_v31, 0.0 }
 0x3d9   : > { %v2389_v29 = vpop.f32.mrf.mxu3 }
 0x3da   : > { %2991 = vmatmul.msk.f32.gmra.mxu3 %vm498_vm2, %v2389_v29 }
 0x3df   : > { %v2563_v50 = vpop.f32.mrf.mxu2 }
 0x3e0   : > { %v2633_v16 = vmul.f32 %v4723_v40, %v2563_v50 }
 0x3e2   : > { %v2669_v24 = vadd.f32 %v4729_v22, %v2633_v16 }
 0x3e4   : > { %v2701_v48 = vmax.f32 %v2669_v24, 0.0 }
 0x3e6   : > { %v2765_v1 = vadd.f32 %v2733_v57, %v2701_v48  ;;  %v3094_v57 = vld [vmem:[%s3267_s15 + $0xa0] sm:$0xff] }
 0x3e7   : > { %v2738_v48 = vsel %vm283_vm1, %v3094_v57, 0.0 }
 0x3e8   : > { %2797 = vst.msk [vmem:[%s4190_s10 + $0x78] sm:$0xff] %vm2020_vm6, %v2765_v1 }
 0x3eb   : > { %v2368_v21 = vpop.f32.mrf.mxu1 }
 0x3ec   : > { %2984 = vmatmul.msk.f32.gmra.mxu2 %vm498_vm2, %v2368_v21 }
 0x3f1   : > { %v2392_v41 = vpop.f32.mrf.mxu3 }
 0x3f2   : > { %2992 = vmatmul.msk.f32.gmra.mxu3 %vm498_vm2, %v2392_v41 }
 0x3f6   : > { %v2566_v2 = vpop.f32.mrf.mxu2 }
 0x3f7   : > { %v2634_v6 = vmul.f32 %v4723_v40, %v2566_v2 }
 0x3f9   : > { %v2670_v11 = vadd.f32 %v4729_v22, %v2634_v6 }
 0x3fb   : > { %v2702_v9 = vmax.f32 %v2670_v11, 0.0  ;;  %v3095_v11 = vld [vmem:[%s3267_s15 + $0xe0] sm:$0xff] }
 0x3fc   : > { %v2746_v34 = vsel %vm283_vm1, %v3095_v11, 0.0 }
 0x3fd   : > { %v2766_v12 = vadd.f32 %v2734_v27, %v2702_v9 }
 0x3ff   : > { %2798 = vst.msk [vmem:[%s4190_s10 + $0x80] sm:$0xff] %vm2020_vm6, %v2766_v12 }
 0x404   : > { %v2371_v39 = vpop.f32.mrf.mxu1 }
 0x405   : > { %2985 = vmatmul.msk.f32.gmra.mxu2 %vm498_vm2, %v2371_v39 }
 0x412   : > { %v2395_v19 = vpop.f32.mrf.mxu3 }
 0x413   : > { %2993 = vmatmul.msk.f32.gmra.mxu3 %vm498_vm2, %v2395_v19 }
 0x417   : > { %v2569_v3 = vpop.f32.mrf.mxu2 }
 0x418   : > { %v2635_v38 = vmul.f32 %v4723_v40, %v2569_v3  ;;  %v3096_v3 = vld [vmem:[%s3267_s15 + $0xa8] sm:$0xff] }
 0x41a   : > { %v2671_v42 = vadd.f32 %v4729_v22, %v2635_v38  ;;  %v2739_v38 = vsel %vm283_vm1, %v3096_v3, 0.0 }
 0x41c   : > { %v2703_v15 = vmax.f32 %v2671_v42, 0.0 }
 0x41e   : > { %v2767_v4 = vadd.f32 %v2735_v49, %v2703_v15 }
 0x420   : > { %2799 = vst.msk [vmem:[%s4190_s10 + $0x88] sm:$0xff] %vm2020_vm6, %v2767_v4 }
 0x422   : > { %v2374_v10 = vpop.f32.mrf.mxu1 }
 0x423   : > { %2986 = vmatmul.msk.f32.gmra.mxu2 %vm498_vm2, %v2374_v10  ;;  %v3097_v10 = vld [vmem:[%s3267_s15 + $0xe8] sm:$0xff] }
 0x42b   : > { %2987 = vmatmul.msk.f32.gmra.mxu2 %vm498_vm2, %v4782_v55 }
 0x430   : > { %v2572_v30 = vpop.f32.mrf.mxu2 }
 0x431   : > { %v2636_v35 = vmul.f32 %v4723_v40, %v2572_v30  ;;  %v2398_v53 = vpop.f32.mrf.mxu3  ;;  %v2747_v30 = vsel %vm283_vm1, %v3097_v10, 0.0 }
 0x432   : > { %2994 = vmatmul.msk.f32.gmra.mxu3 %vm498_vm2, %v2398_v53 }
 0x433   : > { %v2672_v54 = vadd.f32 %v4729_v22, %v2636_v35  ;;  %2988 = vmatmul.msk.f32.gmra.mxu2 %vm498_vm2, %v2380_v63  ;;  %v2737_v63 = vsel %vm283_vm1, %v3091_v23, 0.0 }
 0x435   : > { %v2704_v61 = vmax.f32 %v2672_v54, 0.0 }
 0x437   : > { %v2768_v44 = vadd.f32 %v2736_v17, %v2704_v61  ;;  %v3098_v61 = vld [vmem:[%s3267_s15 + $0xb0] sm:$0xff] }
 0x439   : > { %2800 = vst.msk [vmem:[%s4190_s10 + $0x90] sm:$0xff] %vm2020_vm6, %v2768_v44  ;;  %v2740_v44 = vsel %vm283_vm1, %v3098_v61, 0.0 }
 0x441   : > { %v2401_v55 = vpop.f32.mrf.mxu3 }
 0x442   : > { %2995 = vmatmul.msk.f32.gmra.mxu3 %vm498_vm2, %v2401_v55 }
 0x449   : > { %v2593_v59 = vpop.f32.mrf.mxu3 }
 0x44a   : > { %v2643_v32 = vmul.f32 %v4723_v40, %v2593_v59 }
 0x44c   : > { %v2679_v51 = vadd.f32 %v4729_v22, %v2643_v32 }
 0x44e   : > { %v2711_v7 = vmax.f32 %v2679_v51, 0.0  ;;  %v2575_v14 = vpop.f32.mrf.mxu2 }
 0x44f   : > { %v2637_v47 = vmul.f32 %v4723_v40, %v2575_v14 }
 0x450   : > { %v2775_v20 = vadd.f32 %v2743_v26, %v2711_v7  ;;  %v3099_v26 = vld [vmem:[%s3267_s15 + $0xb8] sm:$0xff] }
 0x451   : > { %v2673_v60 = vadd.f32 %v4729_v22, %v2637_v47  ;;  %v2596_v36 = vpop.f32.mrf.mxu3  ;;  %v2741_v7 = vsel %vm283_vm1, %v3099_v26, 0.0 }
 0x452   : > { %2807 = vst.msk [vmem:[%s4190_s10 + $0xc8] sm:$0xff] %vm2020_vm6, %v2775_v20  ;;  %v2644_v0 = vmul.f32 %v4723_v40, %v2596_v36 }
 0x453   : > { %v2705_v33 = vmax.f32 %v2673_v60, 0.0 }
 0x454   : > { %v2680_v28 = vadd.f32 %v4729_v22, %v2644_v0  ;;  %v3100_v0 = vld [vmem:[%s3267_s15 + $0xf0] sm:$0xff] }
 0x455   : > { %v2769_v13 = vadd.f32 %v2737_v63, %v2705_v33  ;;  %v2748_v33 = vsel %vm283_vm1, %v3100_v0, 0.0 }
 0x456   : > { %v2712_v25 = vmax.f32 %v2680_v28, 0.0 }
 0x457   : > { %2801 = vst.msk [vmem:[%s4190_s10 + $0x98] sm:$0xff] %vm2020_vm6, %v2769_v13 }
 0x458   : > { %v2776_v8 = vadd.f32 %v2744_v37, %v2712_v25  ;;  %v2742_v37 = vsel %vm283_vm1, %v3101_v43, 0.0 }
 0x45a   : > { %2808 = vst.msk [vmem:[%s4190_s10 + $0xd0] sm:$0xff] %vm2020_vm6, %v2776_v8 }
 0x45d   : > { %v2599_v52 = vpop.f32.mrf.mxu3 }
 0x45e   : > { %v2645_v62 = vmul.f32 %v4723_v40, %v2599_v52 }
 0x460   : > { %v2681_v56 = vadd.f32 %v4729_v22, %v2645_v62 }
 0x462   : > { %v2713_v29 = vmax.f32 %v2681_v56, 0.0 }
 0x464   : > { %v2777_v50 = vadd.f32 %v2745_v45, %v2713_v29  ;;  %v3102_v45 = vld [vmem:[%s3267_s15 + $0xf8] sm:$0xff] }
 0x465   : > { %v2749_v29 = vsel %vm283_vm1, %v3102_v45, 0.0 }
 0x466   : > { %2809 = vst.msk [vmem:[%s4190_s10 + $0xd8] sm:$0xff] %vm2020_vm6, %v2777_v50 }
 0x46f   : > { %v2578_v16 = vpop.f32.mrf.mxu2 }
 0x470   : > { %v2638_v24 = vmul.f32 %v4723_v40, %v2578_v16 }
 0x472   : > { %v2674_v46 = vadd.f32 %v4729_v22, %v2638_v24 }
 0x474   : > { %v2706_v1 = vmax.f32 %v2674_v46, 0.0 }
 0x475   : > { %v2602_v21 = vpop.f32.mrf.mxu3 }
 0x476   : > { %v2770_v41 = vadd.f32 %v2738_v48, %v2706_v1  ;;  %v2646_v2 = vmul.f32 %v4723_v40, %v2602_v21 }
 0x478   : > { %2802 = vst.msk [vmem:[%s4190_s10 + $0xa0] sm:$0xff] %vm2020_vm6, %v2770_v41  ;;  %v2682_v6 = vadd.f32 %v4729_v22, %v2646_v2 }
 0x47a   : > { %v2714_v27 = vmax.f32 %v2682_v6, 0.0 }
 0x47c   : > { %v2778_v9 = vadd.f32 %v2746_v34, %v2714_v27 }
 0x47e   : > { %2810 = vst.msk [vmem:[%s4190_s10 + $0xe0] sm:$0xff] %vm2020_vm6, %v2778_v9 }
 0x488   : > { %v2581_v12 = vpop.f32.mrf.mxu2 }
 0x489   : > { %v2639_v39 = vmul.f32 %v4723_v40, %v2581_v12 }
 0x48b   : > { %v2675_v19 = vadd.f32 %v4729_v22, %v2639_v39 }
 0x48d   : > { %v2707_v42 = vmax.f32 %v2675_v19, 0.0 }
 0x48f   : > { %v2771_v58 = vadd.f32 %v2739_v38, %v2707_v42 }
 0x491   : > { %2803 = vst.msk [vmem:[%s4190_s10 + $0xa8] sm:$0xff] %vm2020_vm6, %v2771_v58 }
 0x496   : > { %v2605_v49 = vpop.f32.mrf.mxu3 }
 0x497   : > { %v2647_v15 = vmul.f32 %v4723_v40, %v2605_v49 }
 0x499   : > { %v2683_v4 = vadd.f32 %v4729_v22, %v2647_v15 }
 0x49b   : > { %v2715_v35 = vmax.f32 %v2683_v4, 0.0 }
 0x49d   : > { %v2779_v53 = vadd.f32 %v2747_v30, %v2715_v35 }
 0x49f   : > { %2811 = vst.msk [vmem:[%s4190_s10 + $0xe8] sm:$0xff] %vm2020_vm6, %v2779_v53 }
 0x4a6   : > { %v2584_v54 = vpop.f32.mrf.mxu2 }
 0x4a7   : > { %v2640_v5 = vmul.f32 %v4723_v40, %v2584_v54 }
 0x4a9   : > { %v2676_v17 = vadd.f32 %v4729_v22, %v2640_v5 }
 0x4ab   : > { %v2708_v55 = vmax.f32 %v2676_v17, 0.0 }
 0x4ad   : > { %v2772_v59 = vadd.f32 %v2740_v44, %v2708_v55 }
 0x4ae   : > { %v2587_v32 = vpop.f32.mrf.mxu2 }
 0x4af   : > { %2804 = vst.msk [vmem:[%s4190_s10 + $0xb0] sm:$0xff] %vm2020_vm6, %v2772_v59  ;;  %v2641_v51 = vmul.f32 %v4723_v40, %v2587_v32 }
 0x4b1   : > { %v2677_v18 = vadd.f32 %v4729_v22, %v2641_v51 }
 0x4b3   : > { %v2709_v14 = vmax.f32 %v2677_v18, 0.0 }
 0x4b5   : > { %v2773_v47 = vadd.f32 %v2741_v7, %v2709_v14  ;;  %v2608_v20 = vpop.f32.mrf.mxu3 }
 0x4b6   : > { %v2648_v60 = vmul.f32 %v4723_v40, %v2608_v20  ;;  %v2590_v36 = vpop.f32.mrf.mxu2 }
 0x4b7   : > { %2805 = vst.msk [vmem:[%s4190_s10 + $0xb8] sm:$0xff] %vm2020_vm6, %v2773_v47  ;;  %v2642_v23 = vmul.f32 %v4723_v40, %v2590_v36 }
 0x4b8   : > { %v2684_v63 = vadd.f32 %v4729_v22, %v2648_v60 }
 0x4b9   : > { %v2678_v28 = vadd.f32 %v4729_v22, %v2642_v23 }
 0x4ba   : > { %v2716_v13 = vmax.f32 %v2684_v63, 0.0 }
 0x4bb   : > { %v2710_v25 = vmax.f32 %v2678_v28, 0.0 }
 0x4bc   : > { %v2780_v8 = vadd.f32 %v2748_v33, %v2716_v13 }
 0x4bd   : > { %v2774_v52 = vadd.f32 %v2742_v37, %v2710_v25 }
 0x4be   : > { %2812 = vst.msk [vmem:[%s4190_s10 + $0xf0] sm:$0xff] %vm2020_vm6, %v2780_v8 }
 0x4bf   : > { %2806 = vst.msk [vmem:[%s4190_s10 + $0xc0] sm:$0xff] %vm2020_vm6, %v2774_v52 }
 0x4c5   : > { %v2611_v62 = vpop.f32.mrf.mxu3 }
 0x4c6   : > { %v2649_v56 = vmul.f32 %v4723_v40, %v2611_v62 }
 0x4c8   : > { %v2685_v31 = vadd.f32 %v4729_v22, %v2649_v56 }
 0x4ca   : > { %v2717_v50 = vmax.f32 %v2685_v31, 0.0 }
 0x4cc   : > { %v2781_v16 = vadd.f32 %v2749_v29, %v2717_v50 }
 0x4ce   : > { %2813 = vst.msk [vmem:[%s4190_s10 + $0xf8] sm:$0xff] %vm2020_vm6, %v2781_v16 }
 0x4cf   : > { %3130 = shalt.err (!%p3127_p3)
}
 0x4d0   : > { %s3175_s14 = smov 128  }
 0x4d1   : > { %3014 = dma.vmem_to_hbm [thread:$0]  (%p3249_p5), %s2828_s12, 4096, %s2830_s13, %s2815_s25, %s3175_s14, %s3175_s14, %s3168_s17  }
 0x4d2 PF: > { %p3020_p4 = scmp.ge.s32.totalorder %s3165_s24, 2  ;;  %s2844_s10 = sand.u32 1, %s3153_s21  }
 0x4d3   : > { %s2845_s29 = scalar_lea.sflag [#allocation4], %s2844_s10 }
 0x4d4   : > { %p3017_p7 = pnand %p3020_p4, %p3253_p6 }
 0x4d6   : > { %p3018_p8 = pneg %p3017_p7 }
 0x4d8   : > { %3148 = dma.done.wait (%p3018_p8), %s2845_s29, 4096  }
 0x4d9   : > { %3150 = vsyncadd (%p3018_p8), %s2845_s29, 4294963200  ;;  %p16_p9 = scmp.ge.s32.totalorder %s3236_s27, 4   ;;  %s5063_s21 = smov %s3157_s22 }
 0x4da   : > { %s5064_s22 = smov %s3161_s23  ;;  %s5065_s23 = smov %s3247_s30 }
 0x4db   : > { %s5066_s24 = smov %s3236_s27  ;;  %18 = sbr.rel (!%p16_p9) target bundleno = 3 (0x3), region = 82 }
 0x4e0   :  { %2851 = vsyncpa [#allocation4], 1 }
 0x4e1   :  { %2853 = vsyncpa [#allocation4 + $0x1], 1 }

</bundles_post_ra>
